<compile_context>
chip_gen: v7x
topology: tpu7x:2x2x1
jax: 0.10.0
libtpu: 0.0.40
codegen_flags: <defaults>
</compile_context>

<pallas_src>
import functools
import math

import jax
import jax.numpy as jnp
from jax import lax
from jax.experimental import pallas as pl
from jax.experimental.pallas import tpu as pltpu

PAD_ID = 1          # RobertaTokenizer.pad_token_id
LN_EPS = 1e-5

# small, deterministic model config
VOCAB = 64
SEQ = 8
HIDDEN = 32
NUM_HEADS = 4
HEAD_DIM = HIDDEN // NUM_HEADS
FFN = 64
NUM_LAYERS = 2
NUM_LABELS = 2
BATCH = 2
LANE = 128          # lane-dense width for the logits slab (sliced to NUM_LABELS in glue)
EMB_ROWS = VOCAB + SEQ   # word table rows + position table rows (stacked)


# ---------------------------------------------------------------------------
# Fused Pallas kernel (whole forward in one launch)
# ---------------------------------------------------------------------------
def _ln(x, g, b):
    mu = jnp.mean(x, axis=-1, keepdims=True)
    xc = x - mu
    var = jnp.mean(xc * xc, axis=-1, keepdims=True)
    return xc * lax.rsqrt(var + LN_EPS) * g + b


def fused_forward_kernel(ids_ref, emb_tab_ref, wproj_ref, w1_ref, w2_ref, b1_ref,
                         vecs_ref, wd_ref, wcls_ref, bcls_ref, out_ref, *,
                         num_heads, head_dim, num_layers):
    B, S = ids_ref.shape
    H = emb_tab_ref.shape[1]
    BS = B * S
    NH, HD = num_heads, head_dim
    BH = B * NH

    # All tiny LN/bias vectors live in one (R, H) slab; static row slices.
    vecs = vecs_ref[...]

    def vrow(r):
        return vecs[r:r + 1, :]                                      # (1, H)

    ids = ids_ref[...]                                               # (B, S) int32

    # attention_mask = (input_ids != pad_token_id) -> additive key bias,
    # broadcast across heads once, hoisted out of the layer loop.
    bias = jnp.where(ids == PAD_ID, -1e9, 0.0).astype(jnp.float32)   # (B, S)
    bias_bh = jnp.broadcast_to(bias[:, None, :], (B, NH, S)).reshape(BH, 1, S)

    # Embedding gather inside the kernel: one-hot (word OR position bit set)
    # times the stacked [word_emb; pos_emb] table -> word_emb[id] + pos_emb[pos]
    # in a single MXU matmul.
    # TODO(synk): RoBERTa's padding-aware position ids (padding_idx + cumsum of
    # the mask) are simplified to plain arange positions.
    col = lax.broadcasted_iota(jnp.int32, (B, S, EMB_ROWS), 2)
    tok = jnp.broadcast_to(ids[:, :, None], (B, S, EMB_ROWS))
    posr = lax.broadcasted_iota(jnp.int32, (B, S, EMB_ROWS), 1) + VOCAB
    onehot = jnp.logical_or(col == tok, col == posr).astype(jnp.float32)
    emb = jnp.dot(onehot.reshape(BS, EMB_ROWS), emb_tab_ref[...],
                  preferred_element_type=jnp.float32)                # (BS, H)

    # Embedding LayerNorm on the flattened (B*S, H) activation slab.
    x = _ln(emb, vrow(0), vrow(1))

    scale = 1.0 / math.sqrt(HD)

    def split_heads(t):   # (BS, H) -> (B*NH, S, HD)
        return jnp.transpose(t.reshape(B, S, NH, HD), (0, 2, 1, 3)).reshape(BH, S, HD)

    for li in range(num_layers):                                     # static unroll
        base = 2 + li * 9
        wq = wproj_ref[li, 0]
        wk = wproj_ref[li, 1]
        wv = wproj_ref[li, 2]
        wo = wproj_ref[li, 3]

        # Full-width Q/K/V projections (no lane sub-slices), heads folded into
        # the leading (batch) dim for the attention contractions.
        q = split_heads(jnp.dot(x, wq, preferred_element_type=jnp.float32) + vrow(base + 0))
        k = split_heads(jnp.dot(x, wk, preferred_element_type=jnp.float32) + vrow(base + 1))
        v = split_heads(jnp.dot(x, wv, preferred_element_type=jnp.float32) + vrow(base + 2))

        s = jnp.einsum('bqd,bkd->bqk', q, k,
                       preferred_element_type=jnp.float32) * scale   # (BH, S, S)
        s = s + bias_bh                                              # mask padded keys

        # Explicit softmax: divide on the EUP, computed once for all heads.
        m = jnp.max(s, axis=-1, keepdims=True)
        e = jnp.exp(s - m)
        p = e * pl.reciprocal(jnp.sum(e, axis=-1, keepdims=True), approx=True)

        c = jnp.einsum('bqk,bkd->bqd', p, v,
                       preferred_element_type=jnp.float32)           # (BH, S, HD)
        ctx = jnp.transpose(c.reshape(B, NH, S, HD), (0, 2, 1, 3)).reshape(BS, H)

        # Single output projection with the full wo.
        attn = jnp.dot(ctx, wo, preferred_element_type=jnp.float32) + vrow(base + 3)

        h1 = _ln(x + attn, vrow(base + 4), vrow(base + 5))           # post-LN (RoBERTa)

        ff = jnp.dot(h1, w1_ref[li], preferred_element_type=jnp.float32) + b1_ref[li]
        # TODO(synk): HF RoBERTa uses exact (erf) GELU; tanh approximation kept here.
        ff = jax.nn.gelu(ff, approximate=True)
        ff = jnp.dot(ff, w2_ref[li], preferred_element_type=jnp.float32) + vrow(base + 6)

        x = _ln(h1 + ff, vrow(base + 7), vrow(base + 8))

    # Classification head on the <s> token; output is a lane-dense (B, 128) slab.
    h0 = x.reshape(B, S, H)[:, 0:1, :].reshape(B, H)                 # (B, H)
    t = jnp.tanh(jnp.dot(h0, wd_ref[...], preferred_element_type=jnp.float32)
                 + vrow(2 + 9 * num_layers))
    out_ref[...] = (jnp.dot(t, wcls_ref[...], preferred_element_type=jnp.float32)
                    + bcls_ref[...]).astype(out_ref.dtype)


# ---------------------------------------------------------------------------
# One-time parameter packing (NOT in the per-call path)
# ---------------------------------------------------------------------------
def pack_params(params):
    layers = params["layers"]
    emb_tab = jnp.concatenate([params["word_emb"], params["pos_emb"]], axis=0)

    wproj = jnp.stack(
        [jnp.stack([lp["wq"], lp["wk"], lp["wv"], lp["wo"]], axis=0) for lp in layers],
        axis=0)                                                     # (L, 4, H, H)
    w1s = jnp.stack([lp["w1"] for lp in layers], axis=0)            # (L, H, FFN)
    w2s = jnp.stack([lp["w2"] for lp in layers], axis=0)            # (L, FFN, H)
    b1s = jnp.stack([lp["b1"] for lp in layers], axis=0)            # (L, 1, FFN)

    # All (1, H) LN / bias vectors concatenated into one slab, fixed row layout:
    #   0: emb_ln_g, 1: emb_ln_b,
    #   per layer (base = 2 + 9*li): bq, bk, bv, bo, ln1_g, ln1_b, b2, ln2_g, ln2_b,
    #   last: classifier dense bias bd.
    rows = [params["emb_ln_g"], params["emb_ln_b"]]
    for lp in layers:
        rows += [lp["bq"], lp["bk"], lp["bv"], lp["bo"],
                 lp["ln1_g"], lp["ln1_b"], lp["b2"], lp["ln2_g"], lp["ln2_b"]]
    rows.append(params["cls"]["bd"])
    vecs = jnp.concatenate(rows, axis=0)                            # (2 + 9L + 1, H)

    cls = params["cls"]
    wcls = jnp.zeros((HIDDEN, LANE), jnp.float32).at[:, :NUM_LABELS].set(cls["wo"])
    bcls = jnp.zeros((1, LANE), jnp.float32).at[:, :NUM_LABELS].set(cls["bo"])

    return dict(emb_tab=emb_tab, wproj=wproj, w1s=w1s, w2s=w2s, b1s=b1s,
                vecs=vecs, wd=cls["wd"], wcls=wcls, bcls=bcls)


# ---------------------------------------------------------------------------
# Forward pass == CustomTransformerModel.forward
# ---------------------------------------------------------------------------
def custom_transformer_forward(packed, input_ids):
    B, S = input_ids.shape

    args = (input_ids, packed["emb_tab"], packed["wproj"], packed["w1s"],
            packed["w2s"], packed["b1s"], packed["vecs"],
            packed["wd"], packed["wcls"], packed["bcls"])

    kernel = functools.partial(fused_forward_kernel,
                               num_heads=NUM_HEADS, head_dim=HEAD_DIM,
                               num_layers=NUM_LAYERS)

    # Single grid-less launch: every operand is the full array resident in VMEM
    # (total weights + activations << VMEM on v5e/v6e/v7x).  A real
    # roberta-large would instead need a per-layer streamed pipeline and a
    # "parallel" batch grid axis (2nd v7x TensorCore) — moot at this toy size.
    logits_pad = pl.pallas_call(
        kernel,
        out_shape=jax.ShapeDtypeStruct((B, LANE), jnp.float32),
        in_specs=[pl.BlockSpec(memory_space=pltpu.MemorySpace.VMEM) for _ in args],
        out_specs=pl.BlockSpec(memory_space=pltpu.MemorySpace.VMEM),
    )(*args)

    return logits_pad[:, :NUM_LABELS]


# ---------------------------------------------------------------------------
# Deterministic synthetic parameters
# ---------------------------------------------------------------------------
def init_params(key):
    ks = jax.random.split(key, 4 + NUM_LAYERS)

    def normal(k, shape, scale=0.02):
        return (scale * jax.random.normal(k, shape)).astype(jnp.float32)

    params = {
        "word_emb": normal(ks[0], (VOCAB, HIDDEN)),
        "pos_emb": normal(ks[1], (SEQ, HIDDEN)),
        "emb_ln_g": jnp.ones((1, HIDDEN), jnp.float32),
        "emb_ln_b": jnp.zeros((1, HIDDEN), jnp.float32),
        "layers": [],
        "cls": {
            "wd": normal(ks[2], (HIDDEN, HIDDEN)),
            "bd": jnp.zeros((1, HIDDEN), jnp.float32),
            "wo": normal(ks[3], (HIDDEN, NUM_LABELS)),
            "bo": jnp.zeros((1, NUM_LABELS), jnp.float32),
        },
    }
    for li in range(NUM_LAYERS):
        lk = jax.random.split(ks[4 + li], 6)
        params["layers"].append({
            "wq": normal(lk[0], (HIDDEN, HIDDEN)),
            "bq": jnp.zeros((1, HIDDEN), jnp.float32),
            "wk": normal(lk[1], (HIDDEN, HIDDEN)),
            "bk": jnp.zeros((1, HIDDEN), jnp.float32),
            "wv": normal(lk[2], (HIDDEN, HIDDEN)),
            "bv": jnp.zeros((1, HIDDEN), jnp.float32),
            "wo": normal(lk[3], (HIDDEN, HIDDEN)),
            "bo": jnp.zeros((1, HIDDEN), jnp.float32),
            "ln1_g": jnp.ones((1, HIDDEN), jnp.float32),
            "ln1_b": jnp.zeros((1, HIDDEN), jnp.float32),
            "w1": normal(lk[4], (HIDDEN, FFN)),
            "b1": jnp.zeros((1, FFN), jnp.float32),
            "w2": normal(lk[5], (FFN, HIDDEN)),
            "b2": jnp.zeros((1, HIDDEN), jnp.float32),
            "ln2_g": jnp.ones((1, HIDDEN), jnp.float32),
            "ln2_b": jnp.zeros((1, HIDDEN), jnp.float32),
        })
    return params


if __name__ == "__main__":
    key = jax.random.PRNGKey(0)
    pkey, dkey = jax.random.split(key)
    params = init_params(pkey)
    packed = pack_params(params)          # packed once, outside the call path

    input_ids = jax.random.randint(dkey, (BATCH, SEQ), 2, VOCAB, dtype=jnp.int32)
    input_ids = input_ids.at[1, 5:].set(PAD_ID)   # exercise the padding mask

    logits = custom_transformer_forward(packed, input_ids)
    jax.block_until_ready(logits)
    assert logits.shape == (BATCH, NUM_LABELS) and logits.dtype == jnp.float32
    print("KERNEL_OK")
</pallas_src>

<mosaic_0001>
module attributes {stable_mosaic.version = 11 : i64} {
  func.func @fused_forward_kernel(%arg0: memref<2x8xi32, #tpu.memory_space<vmem>>, %arg1: memref<72x32xf32, #tpu.memory_space<vmem>>, %arg2: memref<2x4x32x32xf32, #tpu.memory_space<vmem>>, %arg3: memref<2x32x64xf32, #tpu.memory_space<vmem>>, %arg4: memref<2x64x32xf32, #tpu.memory_space<vmem>>, %arg5: memref<2x1x64xf32, #tpu.memory_space<vmem>>, %arg6: memref<21x32xf32, #tpu.memory_space<vmem>>, %arg7: memref<32x32xf32, #tpu.memory_space<vmem>>, %arg8: memref<32x128xf32, #tpu.memory_space<vmem>>, %arg9: memref<1x128xf32, #tpu.memory_space<vmem>>, %arg10: memref<2x128xf32, #tpu.memory_space<vmem>>) attributes {dimension_semantics = [], scalar_prefetch = 0 : i64, scratch_operands = 0 : i64, tpu.core_type = #tpu.core_type<tc>} {
    %c0 = arith.constant 0 : index
    %c0_0 = arith.constant 0 : index
    %0 = vector.load %arg6[%c0, %c0_0] : memref<21x32xf32, #tpu.memory_space<vmem>>, vector<21x32xf32>
    %c0_1 = arith.constant 0 : index
    %c0_2 = arith.constant 0 : index
    %1 = vector.load %arg0[%c0_1, %c0_2] : memref<2x8xi32, #tpu.memory_space<vmem>>, vector<2x8xi32>
    %c1_i32 = arith.constant 1 : i32
    %2 = vector.broadcast %c1_i32 : i32 to vector<2x8xi32>
    %3 = arith.cmpi eq, %1, %2 : vector<2x8xi32>
    %cst = arith.constant -1.000000e+09 : f32
    %cst_3 = arith.constant 0.000000e+00 : f32
    %4 = vector.broadcast %cst : f32 to vector<2x8xf32>
    %5 = vector.broadcast %cst_3 : f32 to vector<2x8xf32>
    %6 = arith.select %3, %4, %5 : vector<2x8xi1>, vector<2x8xf32>
    %7 = vector.shape_cast %6 : vector<2x8xf32> to vector<2x1x8xf32>
    %8 = vector.shape_cast %7 : vector<2x1x8xf32> to vector<2x1x8xf32>
    %9 = vector.broadcast %8 : vector<2x1x8xf32> to vector<2x4x8xf32>
    %10 = vector.shape_cast %9 : vector<2x4x8xf32> to vector<8x1x8xf32>
    %11 = tpu.iota {dimensions = array<i32: 2>} : vector<2x8x72xi32>
    %12 = vector.shape_cast %1 : vector<2x8xi32> to vector<2x8x1xi32>
    %13 = vector.shape_cast %12 : vector<2x8x1xi32> to vector<2x8x1xi32>
    %14 = vector.broadcast %13 : vector<2x8x1xi32> to vector<2x8x72xi32>
    %15 = tpu.iota {dimensions = array<i32: 1>} : vector<2x8x72xi32>
    %c64_i32 = arith.constant 64 : i32
    %16 = vector.broadcast %c64_i32 : i32 to vector<2x8x72xi32>
    %17 = arith.addi %15, %16 : vector<2x8x72xi32>
    %18 = arith.cmpi eq, %11, %14 : vector<2x8x72xi32>
    %19 = arith.cmpi eq, %11, %17 : vector<2x8x72xi32>
    %20 = arith.ori %18, %19 : vector<2x8x72xi1>
    %21 = arith.extui %20 : vector<2x8x72xi1> to vector<2x8x72xi32>
    %22 = arith.sitofp %21 : vector<2x8x72xi32> to vector<2x8x72xf32>
    %23 = vector.shape_cast %22 : vector<2x8x72xf32> to vector<16x72xf32>
    %c0_4 = arith.constant 0 : index
    %c0_5 = arith.constant 0 : index
    %24 = vector.load %arg1[%c0_4, %c0_5] : memref<72x32xf32, #tpu.memory_space<vmem>>, vector<72x32xf32>
    %cst_6 = arith.constant dense<0.000000e+00> : vector<16x32xf32>
    %25 = tpu.matmul %23, %24, %cst_6 {dimension_numbers = #tpu.dot_dimension_numbers<[1], [0], [0], [1], [0, 0, 1, 1], [], []>} : vector<16x72xf32>, vector<72x32xf32>, vector<16x32xf32> -> vector<16x32xf32>
    %26 = vector.extract_strided_slice %0 {offsets = [0, 0], sizes = [1, 32], strides = [1, 1]} : vector<21x32xf32> to vector<1x32xf32>
    %27 = vector.extract_strided_slice %0 {offsets = [1, 0], sizes = [1, 32], strides = [1, 1]} : vector<21x32xf32> to vector<1x32xf32>
    %cst_7 = arith.constant dense<0.000000e+00> : vector<16xf32>
    %28 = vector.multi_reduction <add>, %25, %cst_7 [1] : vector<16x32xf32> to vector<16xf32>
    %29 = vector.shape_cast %28 : vector<16xf32> to vector<16x1xf32>
    %cst_8 = arith.constant 3.200000e+01 : f32
    %30 = vector.broadcast %cst_8 : f32 to vector<16x1xf32>
    %31 = arith.divf %29, %30 : vector<16x1xf32>
    %32 = vector.broadcast %31 : vector<16x1xf32> to vector<16x32xf32>
    %33 = arith.subf %25, %32 : vector<16x32xf32>
    %34 = arith.mulf %33, %33 : vector<16x32xf32>
    %cst_9 = arith.constant dense<0.000000e+00> : vector<16xf32>
    %35 = vector.multi_reduction <add>, %34, %cst_9 [1] : vector<16x32xf32> to vector<16xf32>
    %36 = vector.shape_cast %35 : vector<16xf32> to vector<16x1xf32>
    %cst_10 = arith.constant 3.200000e+01 : f32
    %37 = vector.broadcast %cst_10 : f32 to vector<16x1xf32>
    %38 = arith.divf %36, %37 : vector<16x1xf32>
    %cst_11 = arith.constant 9.99999974E-6 : f32
    %39 = vector.broadcast %cst_11 : f32 to vector<16x1xf32>
    %40 = arith.addf %38, %39 : vector<16x1xf32>
    %41 = math.rsqrt %40 : vector<16x1xf32>
    %42 = vector.broadcast %41 : vector<16x1xf32> to vector<16x32xf32>
    %43 = arith.mulf %33, %42 : vector<16x32xf32>
    %44 = vector.broadcast %26 : vector<1x32xf32> to vector<16x32xf32>
    %45 = arith.mulf %43, %44 : vector<16x32xf32>
    %46 = vector.broadcast %27 : vector<1x32xf32> to vector<16x32xf32>
    %47 = arith.addf %45, %46 : vector<16x32xf32>
    %c0_12 = arith.constant 0 : index
    %c0_13 = arith.constant 0 : index
    %c0_14 = arith.constant 0 : index
    %c0_15 = arith.constant 0 : index
    %48 = vector.load %arg2[%c0_12, %c0_13, %c0_14, %c0_15] : memref<2x4x32x32xf32, #tpu.memory_space<vmem>>, vector<1x1x32x32xf32>
    %49 = vector.shape_cast %48 : vector<1x1x32x32xf32> to vector<32x32xf32>
    %c0_16 = arith.constant 0 : index
    %c1 = arith.constant 1 : index
    %c0_17 = arith.constant 0 : index
    %c0_18 = arith.constant 0 : index
    %50 = vector.load %arg2[%c0_16, %c1, %c0_17, %c0_18] : memref<2x4x32x32xf32, #tpu.memory_space<vmem>>, vector<1x1x32x32xf32>
    %51 = vector.shape_cast %50 : vector<1x1x32x32xf32> to vector<32x32xf32>
    %c0_19 = arith.constant 0 : index
    %c2 = arith.constant 2 : index
    %c0_20 = arith.constant 0 : index
    %c0_21 = arith.constant 0 : index
    %52 = vector.load %arg2[%c0_19, %c2, %c0_20, %c0_21] : memref<2x4x32x32xf32, #tpu.memory_space<vmem>>, vector<1x1x32x32xf32>
    %53 = vector.shape_cast %52 : vector<1x1x32x32xf32> to vector<32x32xf32>
    %c0_22 = arith.constant 0 : index
    %c3 = arith.constant 3 : index
    %c0_23 = arith.constant 0 : index
    %c0_24 = arith.constant 0 : index
    %54 = vector.load %arg2[%c0_22, %c3, %c0_23, %c0_24] : memref<2x4x32x32xf32, #tpu.memory_space<vmem>>, vector<1x1x32x32xf32>
    %55 = vector.shape_cast %54 : vector<1x1x32x32xf32> to vector<32x32xf32>
    %cst_25 = arith.constant dense<0.000000e+00> : vector<16x32xf32>
    %56 = tpu.matmul %47, %49, %cst_25 {dimension_numbers = #tpu.dot_dimension_numbers<[1], [0], [0], [1], [0, 0, 1, 1], [], []>} : vector<16x32xf32>, vector<32x32xf32>, vector<16x32xf32> -> vector<16x32xf32>
    %57 = vector.extract_strided_slice %0 {offsets = [2, 0], sizes = [1, 32], strides = [1, 1]} : vector<21x32xf32> to vector<1x32xf32>
    %58 = vector.broadcast %57 : vector<1x32xf32> to vector<16x32xf32>
    %59 = arith.addf %56, %58 : vector<16x32xf32>
    %60 = vector.shape_cast %59 : vector<16x32xf32> to vector<2x8x4x8xf32>
    %61 = tpu.transpose %60, [0, 2, 1, 3] : vector<2x8x4x8xf32> -> vector<2x4x8x8xf32>
    %62 = vector.shape_cast %61 : vector<2x4x8x8xf32> to vector<8x8x8xf32>
    %cst_26 = arith.constant dense<0.000000e+00> : vector<16x32xf32>
    %63 = tpu.matmul %47, %51, %cst_26 {dimension_numbers = #tpu.dot_dimension_numbers<[1], [0], [0], [1], [0, 0, 1, 1], [], []>} : vector<16x32xf32>, vector<32x32xf32>, vector<16x32xf32> -> vector<16x32xf32>
    %64 = vector.extract_strided_slice %0 {offsets = [3, 0], sizes = [1, 32], strides = [1, 1]} : vector<21x32xf32> to vector<1x32xf32>
    %65 = vector.broadcast %64 : vector<1x32xf32> to vector<16x32xf32>
    %66 = arith.addf %63, %65 : vector<16x32xf32>
    %67 = vector.shape_cast %66 : vector<16x32xf32> to vector<2x8x4x8xf32>
    %68 = tpu.transpose %67, [0, 2, 1, 3] : vector<2x8x4x8xf32> -> vector<2x4x8x8xf32>
    %69 = vector.shape_cast %68 : vector<2x4x8x8xf32> to vector<8x8x8xf32>
    %cst_27 = arith.constant dense<0.000000e+00> : vector<16x32xf32>
    %70 = tpu.matmul %47, %53, %cst_27 {dimension_numbers = #tpu.dot_dimension_numbers<[1], [0], [0], [1], [0, 0, 1, 1], [], []>} : vector<16x32xf32>, vector<32x32xf32>, vector<16x32xf32> -> vector<16x32xf32>
    %71 = vector.extract_strided_slice %0 {offsets = [4, 0], sizes = [1, 32], strides = [1, 1]} : vector<21x32xf32> to vector<1x32xf32>
    %72 = vector.broadcast %71 : vector<1x32xf32> to vector<16x32xf32>
    %73 = arith.addf %70, %72 : vector<16x32xf32>
    %74 = vector.shape_cast %73 : vector<16x32xf32> to vector<2x8x4x8xf32>
    %75 = tpu.transpose %74, [0, 2, 1, 3] : vector<2x8x4x8xf32> -> vector<2x4x8x8xf32>
    %76 = vector.shape_cast %75 : vector<2x4x8x8xf32> to vector<8x8x8xf32>
    "tpu.trace_start"() <{level = 10 : i32, message = "bqd,bkd->bqk"}> : () -> ()
    %cst_28 = arith.constant dense<0.000000e+00> : vector<8x8x8xf32>
    %77 = tpu.matmul %62, %69, %cst_28 {dimension_numbers = #tpu.dot_dimension_numbers<[2], [2], [1], [1], [0, 0, 0, 1, 1, 1], [0], [0]>} : vector<8x8x8xf32>, vector<8x8x8xf32>, vector<8x8x8xf32> -> vector<8x8x8xf32>
    "tpu.trace_stop"() : () -> ()
    %cst_29 = arith.constant 0.353553385 : f32
    %78 = vector.broadcast %cst_29 : f32 to vector<8x8x8xf32>
    %79 = arith.mulf %77, %78 : vector<8x8x8xf32>
    %80 = vector.broadcast %10 : vector<8x1x8xf32> to vector<8x8x8xf32>
    %81 = arith.addf %79, %80 : vector<8x8x8xf32>
    %cst_30 = arith.constant dense<0xFF800000> : vector<8x8xf32>
    %82 = vector.multi_reduction <maximumf>, %81, %cst_30 [2] : vector<8x8x8xf32> to vector<8x8xf32>
    %83 = vector.shape_cast %82 : vector<8x8xf32> to vector<8x8x1xf32>
    %84 = vector.broadcast %83 : vector<8x8x1xf32> to vector<8x8x8xf32>
    %85 = arith.subf %81, %84 : vector<8x8x8xf32>
    %86 = math.exp %85 : vector<8x8x8xf32>
    %cst_31 = arith.constant dense<0.000000e+00> : vector<8x8xf32>
    %87 = vector.multi_reduction <add>, %86, %cst_31 [2] : vector<8x8x8xf32> to vector<8x8xf32>
    %88 = vector.shape_cast %87 : vector<8x8xf32> to vector<8x8x1xf32>
    %89 = tpu.reciprocal %88 {approx = true} : vector<8x8x1xf32> -> vector<8x8x1xf32>
    %90 = vector.broadcast %89 : vector<8x8x1xf32> to vector<8x8x8xf32>
    %91 = arith.mulf %86, %90 : vector<8x8x8xf32>
    "tpu.trace_start"() <{level = 10 : i32, message = "bqk,bkd->bqd"}> : () -> ()
    %cst_32 = arith.constant dense<0.000000e+00> : vector<8x8x8xf32>
    %92 = tpu.matmul %91, %76, %cst_32 {dimension_numbers = #tpu.dot_dimension_numbers<[2], [1], [1], [2], [0, 0, 0, 1, 1, 2], [0], [0]>} : vector<8x8x8xf32>, vector<8x8x8xf32>, vector<8x8x8xf32> -> vector<8x8x8xf32>
    "tpu.trace_stop"() : () -> ()
    %93 = vector.shape_cast %92 : vector<8x8x8xf32> to vector<2x4x8x8xf32>
    %94 = tpu.transpose %93, [0, 2, 1, 3] : vector<2x4x8x8xf32> -> vector<2x8x4x8xf32>
    %95 = vector.shape_cast %94 : vector<2x8x4x8xf32> to vector<16x32xf32>
    %cst_33 = arith.constant dense<0.000000e+00> : vector<16x32xf32>
    %96 = tpu.matmul %95, %55, %cst_33 {dimension_numbers = #tpu.dot_dimension_numbers<[1], [0], [0], [1], [0, 0, 1, 1], [], []>} : vector<16x32xf32>, vector<32x32xf32>, vector<16x32xf32> -> vector<16x32xf32>
    %97 = vector.extract_strided_slice %0 {offsets = [5, 0], sizes = [1, 32], strides = [1, 1]} : vector<21x32xf32> to vector<1x32xf32>
    %98 = vector.broadcast %97 : vector<1x32xf32> to vector<16x32xf32>
    %99 = arith.addf %96, %98 : vector<16x32xf32>
    %100 = arith.addf %47, %99 : vector<16x32xf32>
    %101 = vector.extract_strided_slice %0 {offsets = [6, 0], sizes = [1, 32], strides = [1, 1]} : vector<21x32xf32> to vector<1x32xf32>
    %102 = vector.extract_strided_slice %0 {offsets = [7, 0], sizes = [1, 32], strides = [1, 1]} : vector<21x32xf32> to vector<1x32xf32>
    %cst_34 = arith.constant dense<0.000000e+00> : vector<16xf32>
    %103 = vector.multi_reduction <add>, %100, %cst_34 [1] : vector<16x32xf32> to vector<16xf32>
    %104 = vector.shape_cast %103 : vector<16xf32> to vector<16x1xf32>
    %cst_35 = arith.constant 3.200000e+01 : f32
    %105 = vector.broadcast %cst_35 : f32 to vector<16x1xf32>
    %106 = arith.divf %104, %105 : vector<16x1xf32>
    %107 = vector.broadcast %106 : vector<16x1xf32> to vector<16x32xf32>
    %108 = arith.subf %100, %107 : vector<16x32xf32>
    %109 = arith.mulf %108, %108 : vector<16x32xf32>
    %cst_36 = arith.constant dense<0.000000e+00> : vector<16xf32>
    %110 = vector.multi_reduction <add>, %109, %cst_36 [1] : vector<16x32xf32> to vector<16xf32>
    %111 = vector.shape_cast %110 : vector<16xf32> to vector<16x1xf32>
    %cst_37 = arith.constant 3.200000e+01 : f32
    %112 = vector.broadcast %cst_37 : f32 to vector<16x1xf32>
    %113 = arith.divf %111, %112 : vector<16x1xf32>
    %cst_38 = arith.constant 9.99999974E-6 : f32
    %114 = vector.broadcast %cst_38 : f32 to vector<16x1xf32>
    %115 = arith.addf %113, %114 : vector<16x1xf32>
    %116 = math.rsqrt %115 : vector<16x1xf32>
    %117 = vector.broadcast %116 : vector<16x1xf32> to vector<16x32xf32>
    %118 = arith.mulf %108, %117 : vector<16x32xf32>
    %119 = vector.broadcast %101 : vector<1x32xf32> to vector<16x32xf32>
    %120 = arith.mulf %118, %119 : vector<16x32xf32>
    %121 = vector.broadcast %102 : vector<1x32xf32> to vector<16x32xf32>
    %122 = arith.addf %120, %121 : vector<16x32xf32>
    %c0_39 = arith.constant 0 : index
    %c0_40 = arith.constant 0 : index
    %c0_41 = arith.constant 0 : index
    %123 = vector.load %arg3[%c0_39, %c0_40, %c0_41] : memref<2x32x64xf32, #tpu.memory_space<vmem>>, vector<1x32x64xf32>
    %124 = vector.shape_cast %123 : vector<1x32x64xf32> to vector<32x64xf32>
    %cst_42 = arith.constant dense<0.000000e+00> : vector<16x64xf32>
    %125 = tpu.matmul %122, %124, %cst_42 {dimension_numbers = #tpu.dot_dimension_numbers<[1], [0], [0], [1], [0, 0, 1, 1], [], []>} : vector<16x32xf32>, vector<32x64xf32>, vector<16x64xf32> -> vector<16x64xf32>
    %c0_43 = arith.constant 0 : index
    %c0_44 = arith.constant 0 : index
    %c0_45 = arith.constant 0 : index
    %126 = vector.load %arg5[%c0_43, %c0_44, %c0_45] : memref<2x1x64xf32, #tpu.memory_space<vmem>>, vector<1x1x64xf32>
    %127 = vector.shape_cast %126 : vector<1x1x64xf32> to vector<1x64xf32>
    %128 = vector.broadcast %127 : vector<1x64xf32> to vector<16x64xf32>
    %129 = arith.addf %125, %128 : vector<16x64xf32>
    %130 = arith.mulf %129, %129 : vector<16x64xf32>
    %131 = arith.mulf %129, %130 : vector<16x64xf32>
    %cst_46 = arith.constant 4.471500e-02 : f32
    %132 = vector.broadcast %cst_46 : f32 to vector<16x64xf32>
    %133 = arith.mulf %132, %131 : vector<16x64xf32>
    %134 = arith.addf %129, %133 : vector<16x64xf32>
    %cst_47 = arith.constant 0.797884583 : f32
    %135 = vector.broadcast %cst_47 : f32 to vector<16x64xf32>
    %136 = arith.mulf %135, %134 : vector<16x64xf32>
    %137 = math.tanh %136 : vector<16x64xf32>
    %cst_48 = arith.constant 1.000000e+00 : f32
    %138 = vector.broadcast %cst_48 : f32 to vector<16x64xf32>
    %139 = arith.addf %138, %137 : vector<16x64xf32>
    %cst_49 = arith.constant 5.000000e-01 : f32
    %140 = vector.broadcast %cst_49 : f32 to vector<16x64xf32>
    %141 = arith.mulf %140, %139 : vector<16x64xf32>
    %142 = arith.mulf %129, %141 : vector<16x64xf32>
    %c0_50 = arith.constant 0 : index
    %c0_51 = arith.constant 0 : index
    %c0_52 = arith.constant 0 : index
    %143 = vector.load %arg4[%c0_50, %c0_51, %c0_52] : memref<2x64x32xf32, #tpu.memory_space<vmem>>, vector<1x64x32xf32>
    %144 = vector.shape_cast %143 : vector<1x64x32xf32> to vector<64x32xf32>
    %cst_53 = arith.constant dense<0.000000e+00> : vector<16x32xf32>
    %145 = tpu.matmul %142, %144, %cst_53 {dimension_numbers = #tpu.dot_dimension_numbers<[1], [0], [0], [1], [0, 0, 1, 1], [], []>} : vector<16x64xf32>, vector<64x32xf32>, vector<16x32xf32> -> vector<16x32xf32>
    %146 = vector.extract_strided_slice %0 {offsets = [8, 0], sizes = [1, 32], strides = [1, 1]} : vector<21x32xf32> to vector<1x32xf32>
    %147 = vector.broadcast %146 : vector<1x32xf32> to vector<16x32xf32>
    %148 = arith.addf %145, %147 : vector<16x32xf32>
    %149 = arith.addf %122, %148 : vector<16x32xf32>
    %150 = vector.extract_strided_slice %0 {offsets = [9, 0], sizes = [1, 32], strides = [1, 1]} : vector<21x32xf32> to vector<1x32xf32>
    %151 = vector.extract_strided_slice %0 {offsets = [10, 0], sizes = [1, 32], strides = [1, 1]} : vector<21x32xf32> to vector<1x32xf32>
    %cst_54 = arith.constant dense<0.000000e+00> : vector<16xf32>
    %152 = vector.multi_reduction <add>, %149, %cst_54 [1] : vector<16x32xf32> to vector<16xf32>
    %153 = vector.shape_cast %152 : vector<16xf32> to vector<16x1xf32>
    %cst_55 = arith.constant 3.200000e+01 : f32
    %154 = vector.broadcast %cst_55 : f32 to vector<16x1xf32>
    %155 = arith.divf %153, %154 : vector<16x1xf32>
    %156 = vector.broadcast %155 : vector<16x1xf32> to vector<16x32xf32>
    %157 = arith.subf %149, %156 : vector<16x32xf32>
    %158 = arith.mulf %157, %157 : vector<16x32xf32>
    %cst_56 = arith.constant dense<0.000000e+00> : vector<16xf32>
    %159 = vector.multi_reduction <add>, %158, %cst_56 [1] : vector<16x32xf32> to vector<16xf32>
    %160 = vector.shape_cast %159 : vector<16xf32> to vector<16x1xf32>
    %cst_57 = arith.constant 3.200000e+01 : f32
    %161 = vector.broadcast %cst_57 : f32 to vector<16x1xf32>
    %162 = arith.divf %160, %161 : vector<16x1xf32>
    %cst_58 = arith.constant 9.99999974E-6 : f32
    %163 = vector.broadcast %cst_58 : f32 to vector<16x1xf32>
    %164 = arith.addf %162, %163 : vector<16x1xf32>
    %165 = math.rsqrt %164 : vector<16x1xf32>
    %166 = vector.broadcast %165 : vector<16x1xf32> to vector<16x32xf32>
    %167 = arith.mulf %157, %166 : vector<16x32xf32>
    %168 = vector.broadcast %150 : vector<1x32xf32> to vector<16x32xf32>
    %169 = arith.mulf %167, %168 : vector<16x32xf32>
    %170 = vector.broadcast %151 : vector<1x32xf32> to vector<16x32xf32>
    %171 = arith.addf %169, %170 : vector<16x32xf32>
    %c1_59 = arith.constant 1 : index
    %c0_60 = arith.constant 0 : index
    %c0_61 = arith.constant 0 : index
    %c0_62 = arith.constant 0 : index
    %172 = vector.load %arg2[%c1_59, %c0_60, %c0_61, %c0_62] : memref<2x4x32x32xf32, #tpu.memory_space<vmem>>, vector<1x1x32x32xf32>
    %173 = vector.shape_cast %172 : vector<1x1x32x32xf32> to vector<32x32xf32>
    %c1_63 = arith.constant 1 : index
    %c1_64 = arith.constant 1 : index
    %c0_65 = arith.constant 0 : index
    %c0_66 = arith.constant 0 : index
    %174 = vector.load %arg2[%c1_63, %c1_64, %c0_65, %c0_66] : memref<2x4x32x32xf32, #tpu.memory_space<vmem>>, vector<1x1x32x32xf32>
    %175 = vector.shape_cast %174 : vector<1x1x32x32xf32> to vector<32x32xf32>
    %c1_67 = arith.constant 1 : index
    %c2_68 = arith.constant 2 : index
    %c0_69 = arith.constant 0 : index
    %c0_70 = arith.constant 0 : index
    %176 = vector.load %arg2[%c1_67, %c2_68, %c0_69, %c0_70] : memref<2x4x32x32xf32, #tpu.memory_space<vmem>>, vector<1x1x32x32xf32>
    %177 = vector.shape_cast %176 : vector<1x1x32x32xf32> to vector<32x32xf32>
    %c1_71 = arith.constant 1 : index
    %c3_72 = arith.constant 3 : index
    %c0_73 = arith.constant 0 : index
    %c0_74 = arith.constant 0 : index
    %178 = vector.load %arg2[%c1_71, %c3_72, %c0_73, %c0_74] : memref<2x4x32x32xf32, #tpu.memory_space<vmem>>, vector<1x1x32x32xf32>
    %179 = vector.shape_cast %178 : vector<1x1x32x32xf32> to vector<32x32xf32>
    %cst_75 = arith.constant dense<0.000000e+00> : vector<16x32xf32>
    %180 = tpu.matmul %171, %173, %cst_75 {dimension_numbers = #tpu.dot_dimension_numbers<[1], [0], [0], [1], [0, 0, 1, 1], [], []>} : vector<16x32xf32>, vector<32x32xf32>, vector<16x32xf32> -> vector<16x32xf32>
    %181 = vector.extract_strided_slice %0 {offsets = [11, 0], sizes = [1, 32], strides = [1, 1]} : vector<21x32xf32> to vector<1x32xf32>
    %182 = vector.broadcast %181 : vector<1x32xf32> to vector<16x32xf32>
    %183 = arith.addf %180, %182 : vector<16x32xf32>
    %184 = vector.shape_cast %183 : vector<16x32xf32> to vector<2x8x4x8xf32>
    %185 = tpu.transpose %184, [0, 2, 1, 3] : vector<2x8x4x8xf32> -> vector<2x4x8x8xf32>
    %186 = vector.shape_cast %185 : vector<2x4x8x8xf32> to vector<8x8x8xf32>
    %cst_76 = arith.constant dense<0.000000e+00> : vector<16x32xf32>
    %187 = tpu.matmul %171, %175, %cst_76 {dimension_numbers = #tpu.dot_dimension_numbers<[1], [0], [0], [1], [0, 0, 1, 1], [], []>} : vector<16x32xf32>, vector<32x32xf32>, vector<16x32xf32> -> vector<16x32xf32>
    %188 = vector.extract_strided_slice %0 {offsets = [12, 0], sizes = [1, 32], strides = [1, 1]} : vector<21x32xf32> to vector<1x32xf32>
    %189 = vector.broadcast %188 : vector<1x32xf32> to vector<16x32xf32>
    %190 = arith.addf %187, %189 : vector<16x32xf32>
    %191 = vector.shape_cast %190 : vector<16x32xf32> to vector<2x8x4x8xf32>
    %192 = tpu.transpose %191, [0, 2, 1, 3] : vector<2x8x4x8xf32> -> vector<2x4x8x8xf32>
    %193 = vector.shape_cast %192 : vector<2x4x8x8xf32> to vector<8x8x8xf32>
    %cst_77 = arith.constant dense<0.000000e+00> : vector<16x32xf32>
    %194 = tpu.matmul %171, %177, %cst_77 {dimension_numbers = #tpu.dot_dimension_numbers<[1], [0], [0], [1], [0, 0, 1, 1], [], []>} : vector<16x32xf32>, vector<32x32xf32>, vector<16x32xf32> -> vector<16x32xf32>
    %195 = vector.extract_strided_slice %0 {offsets = [13, 0], sizes = [1, 32], strides = [1, 1]} : vector<21x32xf32> to vector<1x32xf32>
    %196 = vector.broadcast %195 : vector<1x32xf32> to vector<16x32xf32>
    %197 = arith.addf %194, %196 : vector<16x32xf32>
    %198 = vector.shape_cast %197 : vector<16x32xf32> to vector<2x8x4x8xf32>
    %199 = tpu.transpose %198, [0, 2, 1, 3] : vector<2x8x4x8xf32> -> vector<2x4x8x8xf32>
    %200 = vector.shape_cast %199 : vector<2x4x8x8xf32> to vector<8x8x8xf32>
    "tpu.trace_start"() <{level = 10 : i32, message = "bqd,bkd->bqk"}> : () -> ()
    %cst_78 = arith.constant dense<0.000000e+00> : vector<8x8x8xf32>
    %201 = tpu.matmul %186, %193, %cst_78 {dimension_numbers = #tpu.dot_dimension_numbers<[2], [2], [1], [1], [0, 0, 0, 1, 1, 1], [0], [0]>} : vector<8x8x8xf32>, vector<8x8x8xf32>, vector<8x8x8xf32> -> vector<8x8x8xf32>
    "tpu.trace_stop"() : () -> ()
    %cst_79 = arith.constant 0.353553385 : f32
    %202 = vector.broadcast %cst_79 : f32 to vector<8x8x8xf32>
    %203 = arith.mulf %201, %202 : vector<8x8x8xf32>
    %204 = vector.broadcast %10 : vector<8x1x8xf32> to vector<8x8x8xf32>
    %205 = arith.addf %203, %204 : vector<8x8x8xf32>
    %cst_80 = arith.constant dense<0xFF800000> : vector<8x8xf32>
    %206 = vector.multi_reduction <maximumf>, %205, %cst_80 [2] : vector<8x8x8xf32> to vector<8x8xf32>
    %207 = vector.shape_cast %206 : vector<8x8xf32> to vector<8x8x1xf32>
    %208 = vector.broadcast %207 : vector<8x8x1xf32> to vector<8x8x8xf32>
    %209 = arith.subf %205, %208 : vector<8x8x8xf32>
    %210 = math.exp %209 : vector<8x8x8xf32>
    %cst_81 = arith.constant dense<0.000000e+00> : vector<8x8xf32>
    %211 = vector.multi_reduction <add>, %210, %cst_81 [2] : vector<8x8x8xf32> to vector<8x8xf32>
    %212 = vector.shape_cast %211 : vector<8x8xf32> to vector<8x8x1xf32>
    %213 = tpu.reciprocal %212 {approx = true} : vector<8x8x1xf32> -> vector<8x8x1xf32>
    %214 = vector.broadcast %213 : vector<8x8x1xf32> to vector<8x8x8xf32>
    %215 = arith.mulf %210, %214 : vector<8x8x8xf32>
    "tpu.trace_start"() <{level = 10 : i32, message = "bqk,bkd->bqd"}> : () -> ()
    %cst_82 = arith.constant dense<0.000000e+00> : vector<8x8x8xf32>
    %216 = tpu.matmul %215, %200, %cst_82 {dimension_numbers = #tpu.dot_dimension_numbers<[2], [1], [1], [2], [0, 0, 0, 1, 1, 2], [0], [0]>} : vector<8x8x8xf32>, vector<8x8x8xf32>, vector<8x8x8xf32> -> vector<8x8x8xf32>
    "tpu.trace_stop"() : () -> ()
    %217 = vector.shape_cast %216 : vector<8x8x8xf32> to vector<2x4x8x8xf32>
    %218 = tpu.transpose %217, [0, 2, 1, 3] : vector<2x4x8x8xf32> -> vector<2x8x4x8xf32>
    %219 = vector.shape_cast %218 : vector<2x8x4x8xf32> to vector<16x32xf32>
    %cst_83 = arith.constant dense<0.000000e+00> : vector<16x32xf32>
    %220 = tpu.matmul %219, %179, %cst_83 {dimension_numbers = #tpu.dot_dimension_numbers<[1], [0], [0], [1], [0, 0, 1, 1], [], []>} : vector<16x32xf32>, vector<32x32xf32>, vector<16x32xf32> -> vector<16x32xf32>
    %221 = vector.extract_strided_slice %0 {offsets = [14, 0], sizes = [1, 32], strides = [1, 1]} : vector<21x32xf32> to vector<1x32xf32>
    %222 = vector.broadcast %221 : vector<1x32xf32> to vector<16x32xf32>
    %223 = arith.addf %220, %222 : vector<16x32xf32>
    %224 = arith.addf %171, %223 : vector<16x32xf32>
    %225 = vector.extract_strided_slice %0 {offsets = [15, 0], sizes = [1, 32], strides = [1, 1]} : vector<21x32xf32> to vector<1x32xf32>
    %226 = vector.extract_strided_slice %0 {offsets = [16, 0], sizes = [1, 32], strides = [1, 1]} : vector<21x32xf32> to vector<1x32xf32>
    %cst_84 = arith.constant dense<0.000000e+00> : vector<16xf32>
    %227 = vector.multi_reduction <add>, %224, %cst_84 [1] : vector<16x32xf32> to vector<16xf32>
    %228 = vector.shape_cast %227 : vector<16xf32> to vector<16x1xf32>
    %cst_85 = arith.constant 3.200000e+01 : f32
    %229 = vector.broadcast %cst_85 : f32 to vector<16x1xf32>
    %230 = arith.divf %228, %229 : vector<16x1xf32>
    %231 = vector.broadcast %230 : vector<16x1xf32> to vector<16x32xf32>
    %232 = arith.subf %224, %231 : vector<16x32xf32>
    %233 = arith.mulf %232, %232 : vector<16x32xf32>
    %cst_86 = arith.constant dense<0.000000e+00> : vector<16xf32>
    %234 = vector.multi_reduction <add>, %233, %cst_86 [1] : vector<16x32xf32> to vector<16xf32>
    %235 = vector.shape_cast %234 : vector<16xf32> to vector<16x1xf32>
    %cst_87 = arith.constant 3.200000e+01 : f32
    %236 = vector.broadcast %cst_87 : f32 to vector<16x1xf32>
    %237 = arith.divf %235, %236 : vector<16x1xf32>
    %cst_88 = arith.constant 9.99999974E-6 : f32
    %238 = vector.broadcast %cst_88 : f32 to vector<16x1xf32>
    %239 = arith.addf %237, %238 : vector<16x1xf32>
    %240 = math.rsqrt %239 : vector<16x1xf32>
    %241 = vector.broadcast %240 : vector<16x1xf32> to vector<16x32xf32>
    %242 = arith.mulf %232, %241 : vector<16x32xf32>
    %243 = vector.broadcast %225 : vector<1x32xf32> to vector<16x32xf32>
    %244 = arith.mulf %242, %243 : vector<16x32xf32>
    %245 = vector.broadcast %226 : vector<1x32xf32> to vector<16x32xf32>
    %246 = arith.addf %244, %245 : vector<16x32xf32>
    %c1_89 = arith.constant 1 : index
    %c0_90 = arith.constant 0 : index
    %c0_91 = arith.constant 0 : index
    %247 = vector.load %arg3[%c1_89, %c0_90, %c0_91] : memref<2x32x64xf32, #tpu.memory_space<vmem>>, vector<1x32x64xf32>
    %248 = vector.shape_cast %247 : vector<1x32x64xf32> to vector<32x64xf32>
    %cst_92 = arith.constant dense<0.000000e+00> : vector<16x64xf32>
    %249 = tpu.matmul %246, %248, %cst_92 {dimension_numbers = #tpu.dot_dimension_numbers<[1], [0], [0], [1], [0, 0, 1, 1], [], []>} : vector<16x32xf32>, vector<32x64xf32>, vector<16x64xf32> -> vector<16x64xf32>
    %c1_93 = arith.constant 1 : index
    %c0_94 = arith.constant 0 : index
    %c0_95 = arith.constant 0 : index
    %250 = vector.load %arg5[%c1_93, %c0_94, %c0_95] : memref<2x1x64xf32, #tpu.memory_space<vmem>>, vector<1x1x64xf32>
    %251 = vector.shape_cast %250 : vector<1x1x64xf32> to vector<1x64xf32>
    %252 = vector.broadcast %251 : vector<1x64xf32> to vector<16x64xf32>
    %253 = arith.addf %249, %252 : vector<16x64xf32>
    %254 = arith.mulf %253, %253 : vector<16x64xf32>
    %255 = arith.mulf %253, %254 : vector<16x64xf32>
    %cst_96 = arith.constant 4.471500e-02 : f32
    %256 = vector.broadcast %cst_96 : f32 to vector<16x64xf32>
    %257 = arith.mulf %256, %255 : vector<16x64xf32>
    %258 = arith.addf %253, %257 : vector<16x64xf32>
    %cst_97 = arith.constant 0.797884583 : f32
    %259 = vector.broadcast %cst_97 : f32 to vector<16x64xf32>
    %260 = arith.mulf %259, %258 : vector<16x64xf32>
    %261 = math.tanh %260 : vector<16x64xf32>
    %cst_98 = arith.constant 1.000000e+00 : f32
    %262 = vector.broadcast %cst_98 : f32 to vector<16x64xf32>
    %263 = arith.addf %262, %261 : vector<16x64xf32>
    %cst_99 = arith.constant 5.000000e-01 : f32
    %264 = vector.broadcast %cst_99 : f32 to vector<16x64xf32>
    %265 = arith.mulf %264, %263 : vector<16x64xf32>
    %266 = arith.mulf %253, %265 : vector<16x64xf32>
    %c1_100 = arith.constant 1 : index
    %c0_101 = arith.constant 0 : index
    %c0_102 = arith.constant 0 : index
    %267 = vector.load %arg4[%c1_100, %c0_101, %c0_102] : memref<2x64x32xf32, #tpu.memory_space<vmem>>, vector<1x64x32xf32>
    %268 = vector.shape_cast %267 : vector<1x64x32xf32> to vector<64x32xf32>
    %cst_103 = arith.constant dense<0.000000e+00> : vector<16x32xf32>
    %269 = tpu.matmul %266, %268, %cst_103 {dimension_numbers = #tpu.dot_dimension_numbers<[1], [0], [0], [1], [0, 0, 1, 1], [], []>} : vector<16x64xf32>, vector<64x32xf32>, vector<16x32xf32> -> vector<16x32xf32>
    %270 = vector.extract_strided_slice %0 {offsets = [17, 0], sizes = [1, 32], strides = [1, 1]} : vector<21x32xf32> to vector<1x32xf32>
    %271 = vector.broadcast %270 : vector<1x32xf32> to vector<16x32xf32>
    %272 = arith.addf %269, %271 : vector<16x32xf32>
    %273 = arith.addf %246, %272 : vector<16x32xf32>
    %274 = vector.extract_strided_slice %0 {offsets = [18, 0], sizes = [1, 32], strides = [1, 1]} : vector<21x32xf32> to vector<1x32xf32>
    %275 = vector.extract_strided_slice %0 {offsets = [19, 0], sizes = [1, 32], strides = [1, 1]} : vector<21x32xf32> to vector<1x32xf32>
    %cst_104 = arith.constant dense<0.000000e+00> : vector<16xf32>
    %276 = vector.multi_reduction <add>, %273, %cst_104 [1] : vector<16x32xf32> to vector<16xf32>
    %277 = vector.shape_cast %276 : vector<16xf32> to vector<16x1xf32>
    %cst_105 = arith.constant 3.200000e+01 : f32
    %278 = vector.broadcast %cst_105 : f32 to vector<16x1xf32>
    %279 = arith.divf %277, %278 : vector<16x1xf32>
    %280 = vector.broadcast %279 : vector<16x1xf32> to vector<16x32xf32>
    %281 = arith.subf %273, %280 : vector<16x32xf32>
    %282 = arith.mulf %281, %281 : vector<16x32xf32>
    %cst_106 = arith.constant dense<0.000000e+00> : vector<16xf32>
    %283 = vector.multi_reduction <add>, %282, %cst_106 [1] : vector<16x32xf32> to vector<16xf32>
    %284 = vector.shape_cast %283 : vector<16xf32> to vector<16x1xf32>
    %cst_107 = arith.constant 3.200000e+01 : f32
    %285 = vector.broadcast %cst_107 : f32 to vector<16x1xf32>
    %286 = arith.divf %284, %285 : vector<16x1xf32>
    %cst_108 = arith.constant 9.99999974E-6 : f32
    %287 = vector.broadcast %cst_108 : f32 to vector<16x1xf32>
    %288 = arith.addf %286, %287 : vector<16x1xf32>
    %289 = math.rsqrt %288 : vector<16x1xf32>
    %290 = vector.broadcast %289 : vector<16x1xf32> to vector<16x32xf32>
    %291 = arith.mulf %281, %290 : vector<16x32xf32>
    %292 = vector.broadcast %274 : vector<1x32xf32> to vector<16x32xf32>
    %293 = arith.mulf %291, %292 : vector<16x32xf32>
    %294 = vector.broadcast %275 : vector<1x32xf32> to vector<16x32xf32>
    %295 = arith.addf %293, %294 : vector<16x32xf32>
    %296 = vector.shape_cast %295 : vector<16x32xf32> to vector<2x8x32xf32>
    %297 = vector.extract_strided_slice %296 {offsets = [0, 0, 0], sizes = [2, 1, 32], strides = [1, 1, 1]} : vector<2x8x32xf32> to vector<2x1x32xf32>
    %298 = vector.shape_cast %297 : vector<2x1x32xf32> to vector<2x32xf32>
    %c0_109 = arith.constant 0 : index
    %c0_110 = arith.constant 0 : index
    %299 = vector.load %arg7[%c0_109, %c0_110] : memref<32x32xf32, #tpu.memory_space<vmem>>, vector<32x32xf32>
    %cst_111 = arith.constant dense<0.000000e+00> : vector<2x32xf32>
    %300 = tpu.matmul %298, %299, %cst_111 {dimension_numbers = #tpu.dot_dimension_numbers<[1], [0], [0], [1], [0, 0, 1, 1], [], []>} : vector<2x32xf32>, vector<32x32xf32>, vector<2x32xf32> -> vector<2x32xf32>
    %301 = vector.extract_strided_slice %0 {offsets = [20, 0], sizes = [1, 32], strides = [1, 1]} : vector<21x32xf32> to vector<1x32xf32>
    %302 = vector.broadcast %301 : vector<1x32xf32> to vector<2x32xf32>
    %303 = arith.addf %300, %302 : vector<2x32xf32>
    %304 = math.tanh %303 : vector<2x32xf32>
    %c0_112 = arith.constant 0 : index
    %c0_113 = arith.constant 0 : index
    %305 = vector.load %arg8[%c0_112, %c0_113] : memref<32x128xf32, #tpu.memory_space<vmem>>, vector<32x128xf32>
    %cst_114 = arith.constant dense<0.000000e+00> : vector<2x128xf32>
    %306 = tpu.matmul %304, %305, %cst_114 {dimension_numbers = #tpu.dot_dimension_numbers<[1], [0], [0], [1], [0, 0, 1, 1], [], []>} : vector<2x32xf32>, vector<32x128xf32>, vector<2x128xf32> -> vector<2x128xf32>
    %c0_115 = arith.constant 0 : index
    %c0_116 = arith.constant 0 : index
    %307 = vector.load %arg9[%c0_115, %c0_116] : memref<1x128xf32, #tpu.memory_space<vmem>>, vector<1x128xf32>
    %308 = vector.broadcast %307 : vector<1x128xf32> to vector<2x128xf32>
    %309 = arith.addf %306, %308 : vector<2x128xf32>
    %c0_117 = arith.constant 0 : index
    %c0_118 = arith.constant 0 : index
    %310 = vector.load %arg10[%c0_117, %c0_118] : memref<2x128xf32, #tpu.memory_space<vmem>>, vector<2x128xf32>
    tpu.vector_store %arg10[%c0_117, %c0_118], %309 {strides = array<i32>} : memref<2x128xf32, #tpu.memory_space<vmem>>, vector<2x128xf32>,
    return
  }
}

</mosaic_0001>

<bundles_post_ra>
// kernel: tpu_custom_call.1
= control target key start
LH: loop header
LB: loop body
LE: loop exit
PB: predicated region body
PF: predicated region fallthrough
CT: control target
= control target key end

     0   :  { %15 = vsyncpa [#allocation3], 0  ;;  %s9020_s0 = inlined_call_operand.vmem [shape: s32[2,8], index: 0, kind: input, shape index: {}]   ;;  %s9021_s1 = inlined_call_operand.vmem [shape: f32[72,32], index: 1, kind: input, shape index: {}]   ;;  %s9022_s2 = inlined_call_operand.vmem [shape: f32[2,4,32,32], index: 2, kind: input, shape index: {}]   ;;  %s9023_s3 = inlined_call_operand.hbm [shape: f32[2,32,64], index: 3, kind: input, shape index: {}]   ;;  %s9024_s4 = inlined_call_operand.vmem [shape: f32[2,64,32], index: 4, kind: input, shape index: {}]   ;;  %s9025_s5 = inlined_call_operand.hbm [shape: f32[2,1,64], index: 5, kind: input, shape index: {}]   ;;  %s9026_s6 = inlined_call_operand.hbm [shape: f32[21,32], index: 6, kind: input, shape index: {}]   ;;  %s9027_s7 = inlined_call_operand.vmem [shape: f32[32,32], index: 7, kind: input, shape index: {}]   ;;  %s9028_s8 = inlined_call_operand.vmem [shape: f32[32,128], index: 8, kind: input, shape index: {}]   ;;  %s9029_s9 = inlined_call_operand.vmem [shape: f32[1,128], index: 9, kind: input, shape index: {}]   ;;  %s9030_s10 = inlined_call_operand.hbm [shape: f32[2,128], index: 10, kind: output, shape index: {}]  }
   0x1   :  { %16 = vsyncpa [#allocation6], 0 }
   0x2   :  { %17 = vsyncpa [#allocation4], 0  ;;  %s7777_s13 = smov [#allocation5]   ;;  %s7683_s17 = scalar_lea.hbm %s9025_s5, 32 }
   0x3   :  { %s43_s14 = sshll.u32 %s7777_s13, 4  ;;  %p7684_p0 = scmp.ne.s32.totalorder %s9025_s5, %s7683_s17  ;;  %s44_s14 = int_to_ptr.vmem [resolvable:$true] %s43_s14 }
   0x4   :  { %p7687_p1 = scmp.lt.u32.totalorder %s7683_s17, %s9025_s5 }
   0x6   :  { %p7689_p2 = pnand %p7687_p1, %p7684_p0 }
   0x8   :  { %7692 = shalt.err (!%p7689_p2)
}
   0x9   :  { %s7693_s22 = scalar_lea.vmem %s44_s14, 32  ;;  %p7698_p4 = scmp.lt.s32.totalorder %s44_s14, %s44_s14 }
   0xa   :  { %p7694_p3 = scmp.ne.s32.totalorder %s44_s14, %s7693_s22  ;;  %p7699_p5 = scmp.lt.s32.totalorder %s7693_s22, %s7693_s22 }
   0xc   :  { %p7700_p6 = por %p7699_p5, %p7698_p4 }
   0xe   :  { %p7701_p7 = pnand %p7700_p6, %p7694_p3 }
  0x10   :  { %7704 = shalt.err (!%p7701_p7)
}
  0x11   :  { %s7778_s23 = smov 16   ;;  %s7779_s24 = smov 1  }
  0x12   :  { %49 = dma.hbm_to_vmem [thread:$0]  %s9025_s5, 32, %s44_s14, [#allocation6], %s7778_s23, %s7778_s23, %s7779_s24  }
  0x13   :  { %s7780_s27 = smov [#allocation2]   ;;  %s7705_s11 = scalar_lea.hbm %s9023_s3, 1024 }
  0x14   :  { %s29_s28 = sshll.u32 %s7780_s27, 4  ;;  %p7706_p8 = scmp.ne.s32.totalorder %s9023_s3, %s7705_s11  ;;  %s30_s28 = int_to_ptr.vmem [resolvable:$true] %s29_s28 }
  0x15   :  { %p7709_p9 = scmp.lt.u32.totalorder %s7705_s11, %s9023_s3 }
  0x17   :  { %p7711_p10 = pnand %p7709_p9, %p7706_p8 }
  0x19   :  { %7714 = shalt.err (!%p7711_p10)
}
  0x1a   :  { %s7715_s17 = scalar_lea.vmem %s30_s28, 1024  ;;  %p7720_p12 = scmp.lt.s32.totalorder %s30_s28, %s30_s28 }
  0x1b   :  { %p7716_p11 = scmp.ne.s32.totalorder %s30_s28, %s7715_s17  ;;  %p7721_p13 = scmp.lt.s32.totalorder %s7715_s17, %s7715_s17 }
  0x1d   :  { %p7722_p0 = por %p7721_p13, %p7720_p12 }
  0x1f   :  { %p7723_p1 = pnand %p7722_p0, %p7716_p11 }
  0x21   :  { %7726 = shalt.err (!%p7723_p1)
}
  0x22   :  { %s7781_s5 = smov 128   ;;  %s7782_s14 = smov 8  }
  0x23   :  { %35 = dma.hbm_to_vmem [thread:$0]  %s9023_s3, 1024, %s30_s28, [#allocation3], %s7781_s5, %s7781_s5, %s7782_s14  }
  0x24   :  { %s7783_s20 = smov [#allocation7]   ;;  %s7727_s25 = scalar_lea.hbm %s9026_s6, 384 }
  0x25   :  { %s55_s21 = sshll.u32 %s7783_s20, 4  ;;  %p7728_p2 = scmp.ne.s32.totalorder %s9026_s6, %s7727_s25  ;;  %s56_s21 = int_to_ptr.vmem [resolvable:$true] %s55_s21 }
  0x26   :  { %p7731_p3 = scmp.lt.u32.totalorder %s7727_s25, %s9026_s6 }
  0x28   :  { %p7733_p4 = pnand %p7731_p3, %p7728_p2 }
  0x2a   :  { %7736 = shalt.err (!%p7733_p4)
}
  0x2b   :  { %s7737_s11 = scalar_lea.vmem %s56_s21, 384  ;;  %p7742_p6 = scmp.lt.s32.totalorder %s56_s21, %s56_s21 }
  0x2c   :  { %p7738_p5 = scmp.ne.s32.totalorder %s56_s21, %s7737_s11  ;;  %p7743_p7 = scmp.lt.s32.totalorder %s7737_s11, %s7737_s11 }
  0x2e   :  { %p7744_p8 = por %p7743_p7, %p7742_p6 }
  0x30   :  { %p7745_p9 = pnand %p7744_p8, %p7738_p5 }
  0x32   :  { %7748 = shalt.err (!%p7745_p9)
}
  0x33   :  { %61 = dma.hbm_to_vmem [thread:$0]  %s9026_s6, 384, %s56_s21, [#allocation6], %s7781_s5, %s7781_s5, %s7782_s14  }
  0x34   :  { %7771 = dma.done.wait [#allocation3], 1024  }
  0x35   :  { %7772 = vsyncadd [#allocation3], 4294966272 }
  0x36   :  { %7773 = dma.done.wait [#allocation6], 416  }
  0x37   :  { %7774 = vsyncadd [#allocation6], 4294966880  ;;  %v87_v0 = vlaneseq  ;;  %v7901_v4 = vld [vmem:[%s9020_s0] sm:$0x3]  ;;  %v191_v6 = vld [vmem:[%s9021_s1 + $0x8] sm:$0xff]  ;;  %v7784_v20 = vmov 0.0  }
  0x38   :  { %v190_v5 = vld [vmem:[%s9021_s1] sm:$0xff]  ;;  %v192_v9 = vld [vmem:[%s9021_s1 + $0x10] sm:$0xff]  ;;  %v193_v10 = vld [vmem:[%s9021_s1 + $0x18] sm:$0xff]  ;;  %vm199_vm2 = vcmask 588800   ;;  %vm281_vm6 = vcmask 261120   ;;  %s7785_s3 = smov 112  }
  0x39   :  { %v7890_v1 = vshrl.u32 %v87_v0, 7  ;;  %v7429_v8 = vpack.c.bf16 %v191_v6, %v190_v5  ;;  %v7433_v11 = vpack.c.bf16 %v193_v10, %v192_v9  ;;  %v194_v12 = vld [vmem:[%s9021_s1 + $0x20] sm:$0xff]  ;;  %v195_v13 = vld [vmem:[%s9021_s1 + $0x28] sm:$0xff]  ;;  %v196_v16 = vld [vmem:[%s9021_s1 + $0x30] sm:$0xff]  ;;  %v163_v21 = vand.u32 127, %v87_v0  ;;  %s7786_s28 = smov 120  }
  0x3a   :  { %v7437_v15 = vpack.c.bf16 %v195_v13, %v194_v12  ;;  %v197_v17 = vld [vmem:[%s9021_s1 + $0x38] sm:$0xff]  ;;  %v198_v19 = vld [vmem:[%s9021_s1 + $0x40] sm:$0xff]  ;;  %v322_v42 = vld [vmem:[%s9022_s2 + $0x8] sm:$0xff]  ;;  %s7787_s12 = smov 104   ;;  %vm7788_vm7 = vmmov 0   ;;  %vm1459_vm8 = vcmask 64512  }
  0x3b   :  { %v7893_v2 = vsub.s32 0, %v7890_v1  ;;  %v7896_v3 = vsub.s32 1, %v7890_v1  ;;  %7430 = vmatprep.subr.bf16.mxu0 %v7429_v8  ;;  %v7441_v18 = vpack.c.bf16 %v197_v17, %v196_v16  ;;  %v180_v22 = vadd.s32 64, %v7890_v1  ;;  %v321_v41 = vld [vmem:[%s9022_s2] sm:$0xff]  ;;  %v323_v43 = vld [vmem:[%s9022_s2 + $0x10] sm:$0xff]  ;;  %v324_v45 = vld [vmem:[%s9022_s2 + $0x18] sm:$0xff] }
  0x3c   :  { %7432 = vmatpush3.bf16.msra.mxu0 %v7429_v8  ;;  %v7445_v44 = vpack.c.bf16 %v322_v42, %v321_v41  ;;  %v7449_v46 = vpack.c.bf16 %v324_v45, %v323_v43  ;;  %v6768_v47 = vld [vmem:[%s9022_s2 + $0x20] sm:$0xff]  ;;  %v6769_v48 = vld [vmem:[%s9022_s2 + $0x28] sm:$0xff]  ;;  %v6770_v5 = vld [vmem:[%s9022_s2 + $0x30] sm:$0xff]  ;;  %v7998_v16 = vsub.s32 2, %v7890_v1  ;;  %vm81_vm9 = vcmp.eq.s32.totalorder %v7901_v4, 1  ;;  %s7792_s13 = smov 24  }
  0x3d   :  { %v167_v7 = vrot.slane %v7901_v4, %v7893_v2  ;;  %v174_v14 = vrot.slane %v7901_v4, %v7896_v3  ;;  %7434 = vmatprep.subr.bf16.mxu0 %v7433_v11  ;;  %vm183_vm0 = vcmp.eq.s32.totalorder %v163_v21, %v180_v22  ;;  %v7453_v49 = vpack.c.bf16 %v6769_v48, %v6768_v47  ;;  %v77_v56 = vld [vmem:[#allocation7] sm:$0xff]  ;;  %v6771_v6 = vld [vmem:[%s9022_s2 + $0x38] sm:$0xff]  ;;  %v6774_v13 = vld [vmem:[%s9022_s2 + $0x50] sm:$0xff]  ;;  %s7794_s11 = smov [#allocation8]  }
  0x3e   :  { %7446 = vmatprep.subr.bf16.mxu1 %v7445_v44  ;;  %v312_v57 = vrot.slane %v77_v56, %v7893_v2  ;;  %v318_v60 = vrot.slane %v77_v56, %v7896_v3  ;;  %v7457_v9 = vpack.c.bf16 %v6771_v6, %v6770_v5  ;;  %v6772_v10 = vld [vmem:[%s9022_s2 + $0x40] sm:$0xff]  ;;  %v343_v17 = vrot.slane %v77_v56, %v7998_v16 }
  0x3f   :  { %169 = vbcast.lane.b32.xlu0 %v167_v7, 256  ;;  %7448 = vmatpush3.bf16.msra.mxu1 %v7445_v44  ;;  %v8002_v22 = vsub.s32 3, %v7890_v1  ;;  %vm3094_vm10 = vcmask 130048   ;;  %vm3097_vm11 = vcmask 195584   ;;  %vm3347_vm12 = vcmask 523264  }
  0x40   :  { %7436 = vmatpush3.bf16.msra.mxu0 %v7433_v11  ;;  %7450 = vmatprep.subr.bf16.mxu1 %v7449_v46  ;;  %v6773_v11 = vld [vmem:[%s9022_s2 + $0x48] sm:$0xff]  ;;  %vm6588_vm13 = vcmask 1041409  }
  0x41   :  { %7438 = vmatprep.subr.bf16.mxu0 %v7437_v15  ;;  %v7461_v12 = vpack.c.bf16 %v6773_v11, %v6772_v10 }
  0x43   :  { %176 = vbcast.lane.b32.xlu0 %v174_v14, 256  ;;  %7452 = vmatpush3.bf16.msra.mxu1 %v7449_v46  ;;  %v6775_v14 = vld [vmem:[%s9022_s2 + $0x58] sm:$0xff] }
  0x44   :  { %7440 = vmatpush3.bf16.msra.mxu0 %v7437_v15  ;;  %7454 = vmatprep.subr.bf16.mxu1 %v7453_v49  ;;  %v7465_v15 = vpack.c.bf16 %v6775_v14, %v6774_v13 }
  0x45   :  { %7442 = vmatprep.subr.bf16.mxu0 %v7441_v18 }
  0x48   :  { %7444 = vmatpush3.bf16.msra.mxu0 %v7441_v18 }
  0x49   :  { %7094 = vmatprep.subr.mxu0 %v198_v19 }
  0x4c   :  { %7095 = vmatpush3.msra.mxu0 %v198_v19 }
  0x4d   :  { %7132 = vmatprep.subr.mxu0 %v7784_v20 }
  0xb1   :  { %v170_v23 = vpop.permute.xlu0 %169 }
  0xb2   :  { %vm181_vm1 = vcmp.eq.s32.totalorder %v163_v21, %v170_v23 }
  0xb3   :  { %vm184_vm3 = vmor %vm181_vm1, %vm183_vm0 }
  0xb4   :  { %v6764_v24 = vsel %vm184_vm3, 1.0, %v7784_v20 }
  0xb5   :  { %7096 = vmatprep.mubr.msk.f32.mxu0 %vm199_vm2, %v6764_v24  ;;  %v177_v25 = vpop.permute.xlu0 %176  ;;  %v720_v24 = vrot.slane %v77_v56, %v8002_v22 }
  0xb6   :  { %vm182_vm4 = vcmp.eq.s32.totalorder %v163_v21, %v177_v25 }
  0xb7   :  { %vm185_vm5 = vmor %vm182_vm4, %vm183_vm0 }
  0xb8   :  { %v6765_v26 = vsel %vm185_vm5, 1.0, %v7784_v20 }
  0xb9   :  { %7097 = vmatmul.mubr.msk.f32.vlgmr.msra.gmra.mrb[0].mxu0 %vm199_vm2, %v6765_v26 }
  0xba   :  { %7134 = vmatprep.mubr.msk.f32.mxu0 %vm7788_vm7, %v7784_v20 }
 0x18c   :  { %v7098_v27 = vpop.f32.mrb[0].mxu0 }
 0x18d   :  { %v272_v28 = vpop.f32.mrb[1].mxu0  ;;  %v285_v30 = vsel %vm281_vm6, %v7098_v27, 0.0 }
 0x18e   :  { %v282_v29 = vsel %vm281_vm6, %v272_v28, 0.0 }
 0x18f   :  { %283 = vadd.xlane.f32.xlu1 %v282_v29 }
 0x193   :  { %286 = vadd.xlane.f32.xlu1 %v285_v30 }
 0x21c   :  { %v284_v31 = vpop.xlane.xlu1 %283 }
 0x21d   :  { %v289_v32 = vmul.f32 0.03125, %v284_v31 }
 0x21f   :  { %v291_v33 = vsub.f32 %v272_v28, %v289_v32 }
 0x220   :  { %v287_v34 = vpop.xlane.xlu1 %286 }
 0x221   :  { %v290_v35 = vmul.f32 0.03125, %v287_v34  ;;  %v293_v36 = vmul.f32 %v291_v33, %v291_v33 }
 0x223   :  { %v292_v37 = vsub.f32 %v7098_v27, %v290_v35  ;;  %v295_v38 = vsel %vm281_vm6, %v293_v36, 0.0  ;;  %v8013_v27 = vsub.s32 4, %v7890_v1  ;;  %v7789_v35 = vmov 1983009808  }
 0x224   :  { %296 = vadd.xlane.f32.xlu0 %v295_v38  ;;  %v448_v36 = vunpack.c.l.s4 %v7789_v35 }
 0x225   :  { %v294_v39 = vmul.f32 %v292_v37, %v292_v37  ;;  %v1091_v29 = vrot.slane %v77_v56, %v8013_v27 }
 0x227   :  { %v298_v40 = vsel %vm281_vm6, %v294_v39, 0.0  ;;  %v449_v39 = vunpack.c.0.s8 %v448_v36 }
 0x228   :  { %299 = vadd.xlane.f32.xlu1 %v298_v40 }
 0x229   :  { %v8047_v43 = vsub.s32 %v449_v39, %v7890_v1 }
 0x2b1   :  { %v297_v50 = vpop.xlane.xlu0 %296 }
 0x2b2   :  { %v301_v51 = vmul.f32 0.03125, %v297_v50 }
 0x2b4   :  { %v303_v52 = vadd.f32 1e-05, %v301_v51 }
 0x2b5   :  { %v300_v53 = vpop.xlane.xlu1 %299 }
 0x2b6   :  { %7587 = vrsqrt.f32 %v303_v52  ;;  %v302_v54 = vmul.f32 0.03125, %v300_v53 }
 0x2b8   :  { %v304_v55 = vadd.f32 1e-05, %v302_v54 }
 0x2ba   :  { %7589 = vrsqrt.f32 %v304_v55 }
 0x2c0   :  { %v7588_v58 = vpop.eup %7587 }
 0x2c1   :  { %v307_v59 = vmul.f32 %v7588_v58, %v291_v33 }
 0x2c3   :  { %v313_v61 = vmul.f32 %v312_v57, %v307_v59 }
 0x2c4   :  { %v7590_v62 = vpop.eup %7589 }
 0x2c5   :  { %v7962_v63 = vadd.f32 %v318_v60, %v313_v61  ;;  %v308_v0 = vmul.f32 %v7590_v62, %v292_v37  ;;  %v7790_v37 = vmov 1934713408  }
 0x2c6   :  { %v480_v38 = vunpack.c.l.s4 %v7790_v37 }
 0x2c7   :  { %7107 = vmatprep.mubr.msk.f32.mxu1 %vm281_vm6, %v7962_v63  ;;  %v314_v7 = vmul.f32 %v312_v57, %v308_v0 }
 0x2c8   :  { %v481_v42 = vunpack.c.0.s8 %v480_v38 }
 0x2c9   :  { %v7972_v8 = vadd.f32 %v318_v60, %v314_v7 }
 0x2cb   :  { %7108 = vmatmul.mubr.msk.f32.vlgmr.msra.gmra.mrb[0].mxu1 %vm281_vm6, %v7972_v8 }
 0x2cc   :  { %7456 = vmatpush3.bf16.msra.mxu1 %v7453_v49  ;;  %7118 = vmatprep.mubr.msk.f32.mxu1 %vm281_vm6, %v7962_v63  ;;  %v8050_v49 = vsub.s32 %v481_v42, %v7890_v1 }
 0x2cd   :  { %7458 = vmatprep.subr.bf16.mxu1 %v7457_v9 }
 0x2d0   :  { %7460 = vmatpush3.bf16.msra.mxu1 %v7457_v9 }
 0x2d1   :  { %7462 = vmatprep.subr.bf16.mxu1 %v7461_v12 }
 0x2d3   :  { %7119 = vmatmul.mubr.msk.f32.vlgmr.msra.gmra.mrb[2].mxu1 %vm281_vm6, %v7972_v8 }
 0x2d4   :  { %7464 = vmatpush3.bf16.msra.mxu1 %v7461_v12  ;;  %7129 = vmatprep.mubr.msk.f32.mxu1 %vm281_vm6, %v7962_v63 }
 0x2d5   :  { %7466 = vmatprep.subr.bf16.mxu1 %v7465_v15 }
 0x2d8   :  { %7468 = vmatpush3.bf16.msra.mxu1 %v7465_v15 }
 0x2d9   :  { %7142 = vmatprep.subr.mxu1 %v7784_v20 }
 0x2db   :  { %7130 = vmatmul.mubr.msk.f32.vlgmr.msra.gmra.mrb[4].mxu1 %vm281_vm6, %v7972_v8 }
 0x2dc   :  { %7144 = vmatprep.mubr.msk.f32.mxu1 %vm7788_vm7, %v7784_v20 }
 0x39e   :  { %v7109_v18 = vpop.f32.mrb[0].mxu1 }
 0x39f   :  { %v416_v19 = vpop.f32.mrb[1].mxu1  ;;  %v8006_v23 = vadd.f32 %v7109_v18, %v343_v17 }
 0x3a0   :  { %v417_v21 = vadd.f32 %v416_v19, %v343_v17 }
 0x3a2   :  { %433 = vrot.lane.b32.xlu0 %v417_v21, %s7785_s3  ;;  %427 = vrot.lane.b32.xlu1 %v417_v21, %s7786_s28 }
 0x3a6   :  { %v7120_v25 = vpop.f32.mrb[2].mxu1  ;;  %435 = vrot.lane.b32.xlu0 %v8006_v23, %s7785_s3  ;;  %439 = vrot.lane.b32.xlu1 %v417_v21, %s7787_s12 }
 0x3a7   :  { %v787_v26 = vpop.f32.mrb[3].mxu1  ;;  %v8015_v28 = vadd.f32 %v7120_v25, %v720_v24 }
 0x3a8   :  { %v8020_v30 = vadd.f32 %v787_v26, %v720_v24 }
 0x3aa   :  { %800 = vrot.lane.b32.xlu1 %v8015_v28, %s7786_s28 }
 0x3ae   :  { %v7131_v31 = vpop.f32.mrb[4].mxu1  ;;  %798 = vrot.lane.b32.xlu1 %v8020_v30, %s7786_s28 }
 0x3af   :  { %v8024_v32 = vadd.f32 %v7131_v31, %v1091_v29  ;;  %v1158_v33 = vpop.f32.mrb[5].mxu1 }
 0x3b0   :  { %v8042_v34 = vadd.f32 %v1158_v33, %v1091_v29 }
 0x3b2   :  { %804 = vrot.lane.b32.xlu1 %v8020_v30, %s7785_s3 }
 0x3b6   :  { %810 = vrot.lane.b32.xlu1 %v8020_v30, %s7787_s12 }
 0x3ba   :  { %806 = vrot.lane.b32.xlu1 %v8015_v28, %s7785_s3 }
 0x3be   :  { %812 = vrot.lane.b32.xlu1 %v8015_v28, %s7787_s12 }
 0x3c2   :  { %429 = vrot.lane.b32.xlu1 %v8006_v23, %s7786_s28 }
 0x3c6   :  { %441 = vrot.lane.b32.xlu1 %v8006_v23, %s7787_s12 }
 0x3ca   :  { %1169 = vrot.lane.b32.xlu1 %v8042_v34, %s7786_s28 }
 0x414   :  { %v434_v40 = vpop.permute.xlu0 %433  ;;  %v428_v41 = vpop.permute.xlu1 %427 }
 0x415   :  { %v445_v44 = vcombine.low %v417_v21, %v434_v40  ;;  %v446_v45 = vcombine.high %v417_v21, %v434_v40 }
 0x417   :  { %v453_v50 = vrot.slane %v445_v44, %v8047_v43  ;;  %v460_v51 = vrot.slane %v446_v45, %v8047_v43 }
 0x418   :  { %v440_v46 = vpop.permute.xlu1 %439  ;;  %v436_v15 = vpop.permute.xlu0 %435 }
 0x419   :  { %v461_v47 = vcombine.low %v428_v41, %v440_v46  ;;  %v462_v48 = vcombine.high %v428_v41, %v440_v46  ;;  %v513_v25 = vcombine.low %v8006_v23, %v436_v15  ;;  %v514_v37 = vcombine.high %v8006_v23, %v436_v15 }
 0x41b   :  { %v469_v52 = vrot.slane %v461_v47, %v8047_v43  ;;  %v476_v53 = vrot.slane %v462_v48, %v8047_v43  ;;  %v8075_v44 = vrot.slane %v513_v25, %v8047_v43 }
 0x41c   :  { %v8056_v54 = vpop.permute.xlu1 %800 }
 0x41d   :  { %v477_v55 = vcombine.low %v453_v50, %v469_v52  ;;  %v478_v56 = vcombine.high %v453_v50, %v469_v52  ;;  %v493_v57 = vcombine.low %v460_v51, %v476_v53  ;;  %v494_v58 = vcombine.high %v460_v51, %v476_v53 }
 0x41e   :  { %v8088_v52 = vrot.slane %v514_v37, %v8047_v43 }
 0x41f   :  { %v485_v59 = vrot.slane %v477_v55, %v8050_v49  ;;  %v492_v60 = vrot.slane %v478_v56, %v8050_v49  ;;  %v501_v61 = vrot.slane %v493_v57, %v8050_v49  ;;  %v508_v62 = vrot.slane %v494_v58, %v8050_v49 }
 0x420   :  { %v799_v0 = vpop.permute.xlu1 %798 }
 0x421   :  { %v581_v5 = vcombine.low %v485_v59, %v492_v60  ;;  %v6782_v6 = vcombine.high %v485_v59, %v492_v60  ;;  %v597_v7 = vcombine.low %v501_v61, %v508_v62  ;;  %v6783_v9 = vcombine.high %v501_v61, %v508_v62 }
 0x423   :  { %v588_v11 = vrot.slane %v581_v5, %v8047_v43  ;;  %v596_v12 = vrot.slane %v6782_v6, %v8047_v43  ;;  %v604_v13 = vrot.slane %v597_v7, %v8047_v43  ;;  %v612_v14 = vrot.slane %v6783_v9, %v8047_v43 }
 0x424   :  { %v805_v10 = vpop.permute.xlu1 %804 }
 0x425   :  { %v816_v17 = vcombine.low %v8020_v30, %v805_v10  ;;  %v817_v18 = vcombine.high %v8020_v30, %v805_v10  ;;  %v613_v26 = vcombine.low %v588_v11, %v596_v12  ;;  %v629_v29 = vcombine.low %v604_v13, %v612_v14 }
 0x426   :  { %v614_v38 = vcombine.high %v588_v11, %v596_v12  ;;  %v630_v45 = vcombine.high %v604_v13, %v612_v14 }
 0x427   :  { %v824_v31 = vrot.slane %v816_v17, %v8047_v43  ;;  %v831_v33 = vrot.slane %v817_v18, %v8047_v43  ;;  %v8078_v46 = vrot.slane %v613_v26, %v8050_v49  ;;  %v8081_v47 = vrot.slane %v629_v29, %v8050_v49 }
 0x428   :  { %v811_v19 = vpop.permute.xlu1 %810  ;;  %v8093_v57 = vrot.slane %v614_v38, %v8050_v49  ;;  %v8100_v6 = vrot.slane %v630_v45, %v8050_v49 }
 0x429   :  { %v832_v21 = vcombine.low %v799_v0, %v811_v19  ;;  %v833_v24 = vcombine.high %v799_v0, %v811_v19  ;;  %v645_v5 = vcombine.low %v8078_v46, %v8081_v47 }
 0x42b   :  { %v840_v35 = vrot.slane %v832_v21, %v8047_v43  ;;  %v847_v36 = vrot.slane %v833_v24, %v8047_v43 }
 0x42c   :  { %v807_v39 = vpop.permute.xlu1 %806 }
 0x42d   :  { %v848_v30 = vcombine.low %v824_v31, %v840_v35  ;;  %v849_v40 = vcombine.high %v824_v31, %v840_v35  ;;  %v864_v41 = vcombine.low %v831_v33, %v847_v36  ;;  %v865_v42 = vcombine.high %v831_v33, %v847_v36 }
 0x42e   :  { %v884_v53 = vcombine.low %v8015_v28, %v807_v39  ;;  %v885_v55 = vcombine.high %v8015_v28, %v807_v39 }
 0x42f   :  { %v856_v48 = vrot.slane %v848_v30, %v8050_v49  ;;  %v863_v23 = vrot.slane %v849_v40, %v8050_v49  ;;  %v872_v50 = vrot.slane %v864_v41, %v8050_v49  ;;  %v879_v51 = vrot.slane %v865_v42, %v8050_v49 }
 0x430   :  { %v813_v56 = vpop.permute.xlu1 %812  ;;  %v892_v11 = vrot.slane %v884_v53, %v8047_v43  ;;  %v899_v12 = vrot.slane %v885_v55, %v8047_v43 }
 0x431   :  { %v952_v58 = vcombine.low %v856_v48, %v863_v23  ;;  %v6788_v59 = vcombine.high %v856_v48, %v863_v23  ;;  %v968_v60 = vcombine.low %v872_v50, %v879_v51  ;;  %v6789_v61 = vcombine.high %v872_v50, %v879_v51 }
 0x432   :  { %v900_v62 = vcombine.low %v8056_v54, %v813_v56  ;;  %v901_v0 = vcombine.high %v8056_v54, %v813_v56  ;;  %v647_v56 = vcombine.low %v8093_v57, %v8100_v6 }
 0x433   :  { %v959_v28 = vrot.slane %v952_v58, %v8047_v43  ;;  %v967_v7 = vrot.slane %v6788_v59, %v8047_v43  ;;  %v975_v9 = vrot.slane %v968_v60, %v8047_v43  ;;  %v983_v10 = vrot.slane %v6789_v61, %v8047_v43 }
 0x434   :  { %v908_v54 = vrot.slane %v900_v62, %v8047_v43  ;;  %v915_v13 = vrot.slane %v901_v0, %v8047_v43  ;;  %v430_v14 = vpop.permute.xlu1 %429 }
 0x435   :  { %v984_v15 = vcombine.low %v959_v28, %v967_v7  ;;  %v985_v17 = vcombine.high %v959_v28, %v967_v7  ;;  %v1000_v18 = vcombine.low %v975_v9, %v983_v10  ;;  %v1001_v19 = vcombine.high %v975_v9, %v983_v10 }
 0x436   :  { %v916_v21 = vcombine.low %v892_v11, %v908_v54  ;;  %v917_v24 = vcombine.high %v892_v11, %v908_v54  ;;  %v932_v25 = vcombine.low %v899_v12, %v915_v13  ;;  %v933_v26 = vcombine.high %v899_v12, %v915_v13 }
 0x437   :  { %v992_v29 = vrot.slane %v984_v15, %v8050_v49  ;;  %v1008_v31 = vrot.slane %v1000_v18, %v8050_v49  ;;  %v999_v33 = vrot.slane %v985_v17, %v8050_v49  ;;  %v1015_v35 = vrot.slane %v1001_v19, %v8050_v49 }
 0x438   :  { %v924_v36 = vrot.slane %v916_v21, %v8050_v49  ;;  %v931_v37 = vrot.slane %v917_v24, %v8050_v49  ;;  %v940_v38 = vrot.slane %v932_v25, %v8050_v49  ;;  %v947_v39 = vrot.slane %v933_v26, %v8050_v49  ;;  %v442_v30 = vpop.permute.xlu1 %441 }
 0x439   :  { %v529_v40 = vcombine.low %v430_v14, %v442_v30  ;;  %v530_v41 = vcombine.high %v430_v14, %v442_v30  ;;  %v1016_v42 = vcombine.low %v992_v29, %v1008_v31  ;;  %v1018_v45 = vcombine.low %v999_v33, %v1015_v35 }
 0x43a   :  { %v1020_v48 = vcombine.low %v924_v36, %v931_v37  ;;  %v6790_v23 = vcombine.high %v924_v36, %v931_v37  ;;  %v1036_v50 = vcombine.low %v940_v38, %v947_v39  ;;  %v6791_v51 = vcombine.high %v940_v38, %v947_v39 }
 0x43b   :  { %v537_v53 = vrot.slane %v529_v40, %v8047_v43  ;;  %v544_v55 = vrot.slane %v530_v41, %v8047_v43  ;;  %7133 = vmatpush3.xpose.msk.msra.mxu0 %vm1459_vm8, %v1016_v42  ;;  %7143 = vmatpush3.xpose.msk.msra.mxu1 %vm1459_vm8, %v1018_v45  ;;  %v1017_v11 = vcombine.high %v992_v29, %v1008_v31 }
 0x43c   :  { %v1027_v58 = vrot.slane %v1020_v48, %v8047_v43  ;;  %v1035_v59 = vrot.slane %v6790_v23, %v8047_v43  ;;  %v1043_v60 = vrot.slane %v1036_v50, %v8047_v43  ;;  %v1051_v61 = vrot.slane %v6791_v51, %v8047_v43  ;;  %7137 = vmatprep.subr.mxu0 %v7784_v20 }
 0x43d   :  { %v545_v62 = vcombine.low %v8075_v44, %v537_v53  ;;  %v546_v0 = vcombine.high %v8075_v44, %v537_v53  ;;  %v561_v28 = vcombine.low %v8088_v52, %v544_v55  ;;  %v562_v7 = vcombine.high %v8088_v52, %v544_v55  ;;  %7152 = vmatprep.subr.mxu1 %v7784_v20 }
 0x43e   :  { %v1052_v9 = vcombine.low %v1027_v58, %v1035_v59  ;;  %v1068_v10 = vcombine.low %v1043_v60, %v1051_v61  ;;  %7135 = vmatmul.mubr.msk.f32.vlgmr.msra.gmra.mrb[2].mxu0 %vm1459_vm8, %v645_v5  ;;  %7145 = vmatmul.mubr.msk.f32.vlgmr.msra.gmra.mrb[6].mxu1 %vm1459_vm8, %v647_v56  ;;  %v646_v44 = vcombine.high %v8078_v46, %v8081_v47  ;;  %v7791_v55 = vmov 1966171168  }
 0x43f   :  { %v553_v12 = vrot.slane %v545_v62, %v8050_v49  ;;  %v560_v54 = vrot.slane %v546_v0, %v8050_v49  ;;  %v569_v13 = vrot.slane %v561_v28, %v8050_v49  ;;  %v576_v14 = vrot.slane %v562_v7, %v8050_v49  ;;  %7138 = vmatpush3.xpose.msk.msra.mxu0 %vm1459_vm8, %v1017_v11 }
 0x440   :  { %7139 = vmatprep.mubr.msk.f32.mxu0 %vm7788_vm7, %v7784_v20  ;;  %v1060_v52 = vrot.slane %v1052_v9, %v8050_v49  ;;  %v1076_v5 = vrot.slane %v1068_v10, %v8050_v49  ;;  %7147 = vmatprep.subr.mxu0 %v7784_v20  ;;  %v1053_v21 = vcombine.high %v1027_v58, %v1035_v59  ;;  %v85_v56 = vunpack.c.l.s4 %v7791_v55 }
 0x441   :  { %v649_v15 = vcombine.low %v553_v12, %v560_v54  ;;  %v6784_v17 = vcombine.high %v553_v12, %v560_v54  ;;  %v665_v18 = vcombine.low %v569_v13, %v576_v14  ;;  %v6785_v19 = vcombine.high %v569_v13, %v576_v14  ;;  %7154 = vmatprep.mubr.msk.f32.mxu1 %vm7788_vm7, %v7784_v20 }
 0x442   :  { %v1069_v24 = vcombine.high %v1043_v60, %v1051_v61  ;;  %v1019_v25 = vcombine.high %v999_v33, %v1015_v35  ;;  %v1084_v26 = vcombine.low %v1060_v52, %v1076_v5  ;;  %7140 = vmatmul.mubr.msk.f32.vlgmr.msra.gmra.mrb[4].mxu0 %vm1459_vm8, %v646_v44  ;;  %v648_v33 = vcombine.high %v8093_v57, %v8100_v6 }
 0x443   :  { %v656_v29 = vrot.slane %v649_v15, %v8047_v43  ;;  %v664_v46 = vrot.slane %v6784_v17, %v8047_v43  ;;  %v672_v47 = vrot.slane %v665_v18, %v8047_v43  ;;  %v680_v31 = vrot.slane %v6785_v19, %v8047_v43  ;;  %7149 = vmatprep.mubr.msk.f32.mxu0 %vm7788_vm7, %v7784_v20 }
 0x444   :  { %7148 = vmatpush3.xpose.msk.msra.mxu0 %vm1459_vm8, %v1019_v25  ;;  %7153 = vmatpush3.xpose.msk.msra.mxu1 %vm1459_vm8, %v1084_v26  ;;  %v1085_v39 = vcombine.high %v1060_v52, %v1076_v5  ;;  %v1067_v30 = vrot.slane %v1053_v21, %v8050_v49  ;;  %v1083_v40 = vrot.slane %v1069_v24, %v8050_v49  ;;  %v86_v58 = vunpack.c.0.s8 %v85_v56 }
 0x445   :  { %v681_v35 = vcombine.low %v656_v29, %v664_v46  ;;  %v682_v36 = vcombine.high %v656_v29, %v664_v46  ;;  %v697_v37 = vcombine.low %v672_v47, %v680_v31  ;;  %v698_v38 = vcombine.high %v672_v47, %v680_v31  ;;  %7157 = vmatprep.subr.mxu0 %v7784_v20 }
 0x446   :  { %7162 = vmatprep.subr.mxu1 %v7784_v20  ;;  %v1086_v23 = vcombine.low %v1067_v30, %v1083_v40  ;;  %v1087_v50 = vcombine.high %v1067_v30, %v1083_v40  ;;  %v89_v59 = vsub.s32 %v86_v58, %v7890_v1  ;;  %v82_v60 = vsel %vm81_vm9, -1e+09, %v7784_v20 }
 0x447   :  { %7150 = vmatmul.mubr.msk.f32.vlgmr.msra.gmra.mrb[6].mxu0 %vm1459_vm8, %v648_v33  ;;  %v689_v57 = vrot.slane %v681_v35, %v8050_v49  ;;  %v705_v6 = vrot.slane %v697_v37, %v8050_v49  ;;  %v696_v45 = vrot.slane %v682_v36, %v8050_v49  ;;  %v712_v48 = vrot.slane %v698_v38, %v8050_v49 }
 0x448   :  { %7158 = vmatpush3.xpose.msk.msra.mxu0 %vm1459_vm8, %v1085_v39  ;;  %7159 = vmatprep.mubr.msk.f32.mxu0 %vm7788_vm7, %v7784_v20  ;;  %v90_v61 = vrot.slane %v82_v60, %v89_v59 }
 0x449   :  { %7167 = vmatprep.subr.mxu0 %v7784_v20  ;;  %v713_v41 = vcombine.low %v689_v57, %v705_v6  ;;  %v714_v42 = vcombine.high %v689_v57, %v705_v6  ;;  %v715_v51 = vcombine.low %v696_v45, %v712_v48  ;;  %v716_v53 = vcombine.high %v696_v45, %v712_v48 }
 0x44a   :  { %v98_v62 = vrot.slane %v90_v61, %v89_v59  ;;  %v91_v28 = vcombine.high %v90_v61, %v90_v61 }
 0x44b   :  { %7155 = vmatmul.mubr.msk.f32.vlgmr.msra.gmra.mrb[8].mxu1 %vm1459_vm8, %v713_v41  ;;  %7160 = vmatmul.mubr.msk.f32.vlgmr.msra.gmra.mrb[8].mxu0 %vm1459_vm8, %v714_v42 }
 0x44c   :  { %7163 = vmatpush3.xpose.msk.msra.mxu1 %vm1459_vm8, %v1086_v23  ;;  %7168 = vmatpush3.xpose.msk.msra.mxu0 %vm1459_vm8, %v1087_v50  ;;  %v109_v0 = vrot.slane %v98_v62, %v7893_v2  ;;  %v105_v9 = vrot.slane %v91_v28, %v89_v59 }
 0x44d   :  { %7164 = vmatprep.mubr.msk.f32.mxu1 %vm7788_vm7, %v7784_v20  ;;  %7169 = vmatprep.mubr.msk.f32.mxu0 %vm7788_vm7, %v7784_v20 }
 0x44e   :  { %7172 = vmatprep.subr.mxu1 %v7784_v20  ;;  %7177 = vmatprep.subr.mxu0 %v7784_v20  ;;  %v120_v7 = vrot.slane %v109_v0, %v89_v59  ;;  %v113_v11 = vrot.slane %v105_v9, %v7893_v2 }
 0x44f   :  { %7165 = vmatmul.mubr.msk.f32.vlgmr.msra.gmra.mrb[10].mxu1 %vm1459_vm8, %v715_v51  ;;  %7170 = vmatmul.mubr.msk.f32.vlgmr.msra.gmra.mrb[10].mxu0 %vm1459_vm8, %v716_v53 }
 0x450   :  { %7174 = vmatprep.mubr.msk.f32.mxu1 %vm7788_vm7, %v7784_v20  ;;  %7179 = vmatprep.mubr.msk.f32.mxu0 %vm7788_vm7, %v7784_v20  ;;  %v128_v10 = vrot.slane %v120_v7, %v89_v59  ;;  %v121_v12 = vcombine.high %v120_v7, %v120_v7  ;;  %v144_v4 = vrot.slane %v113_v11, %v89_v59 }
 0x452   :  { %v136_v54 = vcombine.high %v128_v10, %v128_v10  ;;  %v8196_v13 = vrot.slane %v128_v10, %v7893_v2  ;;  %v135_v44 = vrot.slane %v121_v12, %v89_v59  ;;  %v145_v24 = vcombine.high %v144_v4, %v144_v4 }
 0x453   :  { %v152_v38 = vrot.slane %v144_v4, %v89_v59 }
 0x454   :  { %v8199_v17 = vrot.slane %v136_v54, %v7893_v2  ;;  %v8203_v25 = vrot.slane %v135_v44, %v7893_v2  ;;  %v137_v26 = vcombine.high %v135_v44, %v135_v44  ;;  %v159_v35 = vrot.slane %v145_v24, %v89_v59 }
 0x455   :  { %v8218_v45 = vrot.slane %v152_v38, %v7893_v2  ;;  %v160_v23 = vcombine.high %v152_v38, %v152_v38 }
 0x456   :  { %v8209_v37 = vrot.slane %v137_v26, %v7893_v2  ;;  %v8214_v41 = vrot.slane %v159_v35, %v7893_v2  ;;  %v161_v48 = vcombine.high %v159_v35, %v159_v35 }
 0x457   :  { %v8227_v0 = vrot.slane %v160_v23, %v7893_v2 }
 0x458   :  { %v8224_v62 = vrot.slane %v161_v48, %v7893_v2 }
 0x511   :  { %v1532_v14 = vpop.f32.mrb[2].mxu0  ;;  %v1684_v5 = vpop.f32.mrb[6].mxu1 }
 0x512   :  { %v2068_v52 = vmul.f32 0.35355338, %v1532_v14  ;;  %v7136_v15 = vpop.f32.mrb[3].mxu0  ;;  %v2070_v18 = vmul.f32 0.35355338, %v1684_v5  ;;  %v7146_v19 = vpop.f32.mrb[7].mxu1 }
 0x514   :  { %v2116_v21 = vadd.f32 %v8196_v13, %v2068_v52  ;;  %v2118_v47 = vadd.f32 %v8199_v17, %v2070_v18  ;;  %v1170_v18 = vpop.permute.xlu1 %1169 }
 0x515   :  { %v1608_v29 = vpop.f32.mrb[4].mxu0 }
 0x516   :  { %v2124_v46 = vsel %vm1459_vm8, %v2116_v21, -inf  ;;  %v2069_v31 = vmul.f32 0.35355338, %v1608_v29  ;;  %v7141_v33 = vpop.f32.mrb[5].mxu0  ;;  %v2130_v30 = vsel %vm1459_vm8, %v2118_v47, -inf }
 0x517   :  { %2125 = vmax.xlane.f32.xlu0 %v2124_v46 }
 0x518   :  { %v2117_v36 = vadd.f32 %v8203_v25, %v2069_v31 }
 0x51a   :  { %v1760_v39 = vpop.f32.mrb[6].mxu0  ;;  %v2127_v6 = vsel %vm1459_vm8, %v2117_v36, -inf }
 0x51b   :  { %v2071_v40 = vmul.f32 0.35355338, %v1760_v39  ;;  %v7151_v57 = vpop.f32.mrb[7].mxu0  ;;  %2131 = vmax.xlane.f32.xlu0 %v2130_v30  ;;  %2128 = vmax.xlane.f32.xlu1 %v2127_v6 }
 0x51d   :  { %v2119_v42 = vadd.f32 %v8209_v37, %v2071_v40 }
 0x51e   :  { %v1836_v50 = vpop.f32.mrb[8].mxu1  ;;  %v1912_v51 = vpop.f32.mrb[8].mxu0 }
 0x51f   :  { %v2072_v53 = vmul.f32 0.35355338, %v1836_v50  ;;  %v2073_v55 = vmul.f32 0.35355338, %v1912_v51  ;;  %v2133_v56 = vsel %vm1459_vm8, %v2119_v42, -inf  ;;  %v7156_v58 = vpop.f32.mrb[9].mxu1 }
 0x520   :  { %2134 = vmax.xlane.f32.xlu0 %v2133_v56  ;;  %v7161_v59 = vpop.f32.mrb[9].mxu0 }
 0x521   :  { %v2121_v60 = vadd.f32 %v8214_v41, %v2073_v55  ;;  %v2120_v61 = vadd.f32 %v8218_v45, %v2072_v53 }
 0x522   :  { %v1988_v28 = vpop.f32.mrb[10].mxu1  ;;  %v2064_v7 = vpop.f32.mrb[10].mxu0 }
 0x523   :  { %v2074_v9 = vmul.f32 0.35355338, %v1988_v28  ;;  %v2075_v10 = vmul.f32 0.35355338, %v2064_v7  ;;  %v7166_v11 = vpop.f32.mrb[11].mxu1  ;;  %v7171_v12 = vpop.f32.mrb[11].mxu0 }
 0x524   :  { %v2139_v54 = vsel %vm1459_vm8, %v2121_v60, -inf  ;;  %v2136_v4 = vsel %vm1459_vm8, %v2120_v61, -inf }
 0x525   :  { %2140 = vmax.xlane.f32.xlu0 %v2139_v54  ;;  %2137 = vmax.xlane.f32.xlu1 %v2136_v4  ;;  %v8232_v14 = vadd.f32 %v8224_v62, %v2075_v10  ;;  %v2122_v44 = vadd.f32 %v8227_v0, %v2074_v9 }
 0x527   :  { %v2145_v52 = vsel %vm1459_vm8, %v8232_v14, -inf  ;;  %v2142_v5 = vsel %vm1459_vm8, %v2122_v44, -inf }
 0x529   :  { %2146 = vmax.xlane.f32.xlu0 %v2145_v52  ;;  %2143 = vmax.xlane.f32.xlu1 %v2142_v5 }
 0x53a   :  { %1181 = vrot.lane.b32.xlu1 %v8042_v34, %s7787_s12 }
 0x53f   :  { %1175 = vrot.lane.b32.xlu0 %v8042_v34, %s7785_s3 }
 0x5a4   :  { %v2126_v15 = vpop.xlane.xlu0 %2125 }
 0x5a5   :  { %v2148_v19 = vsub.f32 %v2116_v21, %v2126_v15 }
 0x5a7   :  { %v2156_v24 = vmul.f32 1.442695, %v2148_v19 }
 0x5a8   :  { %v2132_v26 = vpop.xlane.xlu0 %2131  ;;  %v2129_v46 = vpop.xlane.xlu1 %2128 }
 0x5a9   :  { %7591 = vpow2.f32 %v2156_v24  ;;  %v2150_v29 = vsub.f32 %v2118_v47, %v2132_v26  ;;  %v2149_v31 = vsub.f32 %v2117_v36, %v2129_v46 }
 0x5ab   :  { %v2160_v33 = vmul.f32 1.442695, %v2150_v29  ;;  %v2158_v35 = vmul.f32 1.442695, %v2149_v31 }
 0x5ad   :  { %7593 = vpow2.f32 %v2160_v33  ;;  %v2135_v38 = vpop.xlane.xlu0 %2134 }
 0x5ae   :  { %7595 = vpow2.f32 %v2158_v35  ;;  %v2151_v39 = vsub.f32 %v2119_v42, %v2135_v38 }
 0x5b0   :  { %v2162_v30 = vmul.f32 1.442695, %v2151_v39 }
 0x5b2   :  { %7597 = vpow2.f32 %v2162_v30  ;;  %v2141_v40 = vpop.xlane.xlu0 %2140  ;;  %v2138_v57 = vpop.xlane.xlu1 %2137 }
 0x5b3   :  { %v8242_v6 = vpop.eup %7591  ;;  %v2152_v48 = vsub.f32 %v2120_v61, %v2138_v57  ;;  %v2153_v47 = vsub.f32 %v2121_v60, %v2141_v40 }
 0x5b4   :  { %v2172_v21 = vsel %vm1459_vm8, %v8242_v6, 0.0 }
 0x5b5   :  { %v2164_v23 = vmul.f32 1.442695, %v2152_v48  ;;  %2173 = vadd.xlane.f32.xlu1 %v2172_v21  ;;  %v2166_v59 = vmul.f32 1.442695, %v2153_v47 }
 0x5b6   :  { %v8246_v36 = vpop.xlane.xlu0 %2146  ;;  %v2144_v50 = vpop.xlane.xlu1 %2143 }
 0x5b7   :  { %v8248_v51 = vpop.eup %7593  ;;  %v2154_v53 = vsub.f32 %v2122_v44, %v2144_v50  ;;  %7599 = vpow2.f32 %v2164_v23 }
 0x5b8   :  { %v8250_v42 = vpop.eup %7595  ;;  %v2178_v55 = vsel %vm1459_vm8, %v8248_v51, 0.0 }
 0x5b9   :  { %v2168_v56 = vmul.f32 1.442695, %v2154_v53  ;;  %2179 = vadd.xlane.f32.xlu1 %v2178_v55  ;;  %v2175_v58 = vsel %vm1459_vm8, %v8250_v42, 0.0 }
 0x5ba   :  { %v1176_v61 = vpop.permute.xlu0 %1175  ;;  %2176 = vadd.xlane.f32.xlu0 %v2175_v58  ;;  %v1182_v60 = vpop.permute.xlu1 %1181 }
 0x5bb   :  { %v1187_v28 = vcombine.low %v8042_v34, %v1176_v61  ;;  %v1188_v7 = vcombine.high %v8042_v34, %v1176_v61  ;;  %v1203_v9 = vcombine.low %v1170_v18, %v1182_v60  ;;  %7601 = vpow2.f32 %v2168_v56 }
 0x5bc   :  { %v8258_v10 = vpop.eup %7597  ;;  %v1204_v11 = vcombine.high %v1170_v18, %v1182_v60  ;;  %7603 = vpow2.f32 %v2166_v59 }
 0x5bd   :  { %v1195_v12 = vrot.slane %v1187_v28, %v8047_v43  ;;  %v1202_v54 = vrot.slane %v1188_v7, %v8047_v43  ;;  %v1211_v4 = vrot.slane %v1203_v9, %v8047_v43  ;;  %v2181_v44 = vsel %vm1459_vm8, %v8258_v10, 0.0 }
 0x5be   :  { %v1218_v52 = vrot.slane %v1204_v11, %v8047_v43  ;;  %2182 = vadd.xlane.f32.xlu0 %v2181_v44 }
 0x5bf   :  { %v1219_v5 = vcombine.low %v1195_v12, %v1211_v4  ;;  %v1220_v34 = vcombine.high %v1195_v12, %v1211_v4 }
 0x5c0   :  { %v1235_v15 = vcombine.low %v1202_v54, %v1218_v52  ;;  %v1236_v19 = vcombine.high %v1202_v54, %v1218_v52  ;;  %v2155_v54 = vsub.f32 %v8232_v14, %v8246_v36 }
 0x5c1   :  { %v1227_v24 = vrot.slane %v1219_v5, %v8050_v49  ;;  %v1234_v18 = vrot.slane %v1220_v34, %v8050_v49  ;;  %v8268_v26 = vpop.eup %7599 }
 0x5c2   :  { %v1243_v29 = vrot.slane %v1235_v15, %v8050_v49  ;;  %v1250_v46 = vrot.slane %v1236_v19, %v8050_v49  ;;  %v2184_v35 = vsel %vm1459_vm8, %v8268_v26, 0.0  ;;  %v2170_v4 = vmul.f32 1.442695, %v2155_v54 }
 0x5c3   :  { %v1323_v31 = vcombine.low %v1227_v24, %v1234_v18  ;;  %v6794_v33 = vcombine.high %v1227_v24, %v1234_v18  ;;  %2185 = vadd.xlane.f32.xlu1 %v2184_v35 }
 0x5c4   :  { %v1339_v38 = vcombine.low %v1243_v29, %v1250_v46  ;;  %v6795_v39 = vcombine.high %v1243_v29, %v1250_v46  ;;  %7605 = vpow2.f32 %v2170_v4 }
 0x5c5   :  { %v1330_v30 = vrot.slane %v1323_v31, %v8047_v43  ;;  %v1338_v40 = vrot.slane %v6794_v33, %v8047_v43  ;;  %v8276_v57 = vpop.eup %7601 }
 0x5c6   :  { %v1346_v48 = vrot.slane %v1339_v38, %v8047_v43  ;;  %v1354_v21 = vrot.slane %v6795_v39, %v8047_v43  ;;  %v2190_v23 = vsel %vm1459_vm8, %v8276_v57, 0.0  ;;  %v8282_v53 = vpop.eup %7603 }
 0x5c7   :  { %v1355_v47 = vcombine.low %v1330_v30, %v1338_v40  ;;  %v1356_v50 = vcombine.high %v1330_v30, %v1338_v40  ;;  %2191 = vadd.xlane.f32.xlu0 %v2190_v23  ;;  %v2187_v28 = vsel %vm1459_vm8, %v8282_v53, 0.0 }
 0x5c8   :  { %v1371_v55 = vcombine.low %v1346_v48, %v1354_v21  ;;  %v1372_v56 = vcombine.high %v1346_v48, %v1354_v21 }
 0x5c9   :  { %v1363_v58 = vrot.slane %v1355_v47, %v8050_v49  ;;  %v1370_v59 = vrot.slane %v1356_v50, %v8050_v49 }
 0x5ca   :  { %v1379_v61 = vrot.slane %v1371_v55, %v8050_v49  ;;  %v1386_v60 = vrot.slane %v1372_v56, %v8050_v49 }
 0x5cb   :  { %2188 = vadd.xlane.f32.xlu0 %v2187_v28 }
 0x5cc   :  { %v1387_v7 = vcombine.low %v1363_v58, %v1379_v61  ;;  %v1388_v9 = vcombine.high %v1363_v58, %v1379_v61  ;;  %v1389_v11 = vcombine.low %v1370_v59, %v1386_v60  ;;  %v1390_v12 = vcombine.high %v1370_v59, %v1386_v60 }
 0x5ce   :  { %7173 = vmatpush3.msra.mxu1 %v1387_v7  ;;  %7178 = vmatpush3.msra.mxu0 %v1388_v9  ;;  %v8298_v44 = vpop.eup %7605 }
 0x5cf   :  { %7182 = vmatprep.subr.mxu1 %v7784_v20  ;;  %7187 = vmatprep.subr.mxu0 %v7784_v20  ;;  %v2193_v52 = vsel %vm1459_vm8, %v8298_v44, 0.0 }
 0x5d4   :  { %1177 = vrot.lane.b32.xlu1 %v8024_v32, %s7785_s3 }
 0x5e1   :  { %1171 = vrot.lane.b32.xlu0 %v8024_v32, %s7786_s28 }
 0x5f8   :  { %2194 = vadd.xlane.f32.xlu1 %v2193_v52 }
 0x609   :  { %1183 = vrot.lane.b32.xlu1 %v8024_v32, %s7787_s12 }
 0x642   :  { %v2174_v5 = vpop.xlane.xlu1 %2173 }
 0x643   :  { %7607 = vrcp.f32 %v2174_v5 }
 0x646   :  { %v2180_v34 = vpop.xlane.xlu1 %2179 }
 0x647   :  { %v2177_v15 = vpop.xlane.xlu0 %2176  ;;  %7609 = vrcp.f32 %v2180_v34 }
 0x648   :  { %7611 = vrcp.f32 %v2177_v15 }
 0x64b   :  { %v2183_v19 = vpop.xlane.xlu0 %2182 }
 0x64c   :  { %7613 = vrcp.f32 %v2183_v19 }
 0x64d   :  { %v7608_v14 = vpop.eup %7607 }
 0x64e   :  { %v2204_v36 = vmul.f32 %v7608_v14, %v8242_v6 }
 0x650   :  { %7175 = vmatmul.mubr.msk.f32.vlgmr.msra.gmra.mrb[12].mxu1 %vm1459_vm8, %v2204_v36 }
 0x651   :  { %v7610_v24 = vpop.eup %7609  ;;  %7183 = vmatpush3.msra.mxu1 %v1389_v11  ;;  %7184 = vmatprep.mubr.msk.f32.mxu1 %vm7788_vm7, %v7784_v20 }
 0x652   :  { %v7612_v18 = vpop.eup %7611  ;;  %v2206_v29 = vmul.f32 %v7610_v24, %v8248_v51  ;;  %7192 = vmatprep.subr.mxu1 %v7784_v20  ;;  %v2186_v51 = vpop.xlane.xlu1 %2185 }
 0x653   :  { %v2205_v46 = vmul.f32 %v7612_v18, %v8250_v42  ;;  %7615 = vrcp.f32 %v2186_v51 }
 0x654   :  { %7185 = vmatmul.mubr.msk.f32.vlgmr.msra.gmra.mrb[14].mxu1 %vm1459_vm8, %v2206_v29  ;;  %v2192_v42 = vpop.xlane.xlu0 %2191 }
 0x655   :  { %7180 = vmatmul.mubr.msk.f32.vlgmr.msra.gmra.mrb[12].mxu0 %vm1459_vm8, %v2205_v46  ;;  %7194 = vmatprep.mubr.msk.f32.mxu1 %vm7788_vm7, %v7784_v20 }
 0x656   :  { %v7614_v6 = vpop.eup %7613  ;;  %7188 = vmatpush3.msra.mxu0 %v1390_v12  ;;  %7189 = vmatprep.mubr.msk.f32.mxu0 %vm7788_vm7, %v7784_v20  ;;  %v1178_v33 = vpop.permute.xlu1 %1177 }
 0x657   :  { %v2207_v31 = vmul.f32 %v7614_v6, %v8258_v10  ;;  %7197 = vmatprep.subr.mxu0 %v7784_v20  ;;  %v1255_v39 = vcombine.low %v8024_v32, %v1178_v33  ;;  %v1256_v30 = vcombine.high %v8024_v32, %v1178_v33 }
 0x658   :  { %v2189_v35 = vpop.xlane.xlu0 %2188 }
 0x659   :  { %7190 = vmatmul.mubr.msk.f32.vlgmr.msra.gmra.mrb[14].mxu0 %vm1459_vm8, %v2207_v31  ;;  %v1263_v23 = vrot.slane %v1255_v39, %v8047_v43  ;;  %v1270_v47 = vrot.slane %v1256_v30, %v8047_v43  ;;  %7617 = vrcp.f32 %v2189_v35 }
 0x65a   :  { %7199 = vmatprep.mubr.msk.f32.mxu0 %vm7788_vm7, %v7784_v20  ;;  %7619 = vrcp.f32 %v2192_v42 }
 0x65c   :  { %v1172_v40 = vpop.permute.xlu0 %1171 }
 0x65d   :  { %v7616_v15 = vpop.eup %7615 }
 0x663   :  { %v7618_v18 = vpop.eup %7617 }
 0x664   :  { %v7620_v6 = vpop.eup %7619  ;;  %v2209_v39 = vmul.f32 %v7618_v18, %v8282_v53 }
 0x685   :  { %v2195_v38 = vpop.xlane.xlu1 %2194 }
 0x686   :  { %7621 = vrcp.f32 %v2195_v38  ;;  %v2208_v38 = vmul.f32 %v7616_v15, %v8268_v26 }
 0x689   :  { %v1184_v48 = vpop.permute.xlu1 %1183 }
 0x68a   :  { %v1271_v21 = vcombine.low %v1172_v40, %v1184_v48  ;;  %v1272_v10 = vcombine.high %v1172_v40, %v1184_v48  ;;  %v2210_v48 = vmul.f32 %v7620_v6, %v8276_v57 }
 0x68c   :  { %v1279_v50 = vrot.slane %v1271_v21, %v8047_v43  ;;  %v1286_v55 = vrot.slane %v1272_v10, %v8047_v43 }
 0x68e   :  { %v1287_v56 = vcombine.low %v1263_v23, %v1279_v50  ;;  %v1288_v58 = vcombine.high %v1263_v23, %v1279_v50  ;;  %v1303_v59 = vcombine.low %v1270_v47, %v1286_v55  ;;  %v1304_v61 = vcombine.high %v1270_v47, %v1286_v55 }
 0x690   :  { %v1295_v32 = vrot.slane %v1287_v56, %v8050_v49  ;;  %v1302_v60 = vrot.slane %v1288_v58, %v8050_v49  ;;  %v1311_v28 = vrot.slane %v1303_v59, %v8050_v49  ;;  %v1318_v7 = vrot.slane %v1304_v61, %v8050_v49  ;;  %v7622_v35 = vpop.eup %7621 }
 0x691   :  { %v2211_v21 = vmul.f32 %v7622_v35, %v8298_v44 }
 0x692   :  { %v1391_v9 = vcombine.low %v1295_v32, %v1302_v60  ;;  %v6796_v11 = vcombine.high %v1295_v32, %v1302_v60  ;;  %v1407_v12 = vcombine.low %v1311_v28, %v1318_v7  ;;  %v6797_v54 = vcombine.high %v1311_v28, %v1318_v7 }
 0x694   :  { %v1398_v4 = vrot.slane %v1391_v9, %v8047_v43  ;;  %v1406_v52 = vrot.slane %v6796_v11, %v8047_v43  ;;  %v1414_v5 = vrot.slane %v1407_v12, %v8047_v43  ;;  %v1422_v34 = vrot.slane %v6797_v54, %v8047_v43 }
 0x696   :  { %v1423_v19 = vcombine.low %v1398_v4, %v1406_v52  ;;  %v1439_v14 = vcombine.low %v1414_v5, %v1422_v34  ;;  %v1424_v36 = vcombine.high %v1398_v4, %v1406_v52  ;;  %v1440_v24 = vcombine.high %v1414_v5, %v1422_v34 }
 0x698   :  { %v1431_v29 = vrot.slane %v1423_v19, %v8050_v49  ;;  %v1447_v46 = vrot.slane %v1439_v14, %v8050_v49  ;;  %v1438_v31 = vrot.slane %v1424_v36, %v8050_v49  ;;  %v1454_v51 = vrot.slane %v1440_v24, %v8050_v49 }
 0x69a   :  { %v1455_v42 = vcombine.low %v1431_v29, %v1447_v46  ;;  %v1456_v33 = vcombine.high %v1431_v29, %v1447_v46  ;;  %v1457_v30 = vcombine.low %v1438_v31, %v1454_v51  ;;  %v1458_v40 = vcombine.high %v1438_v31, %v1454_v51 }
 0x69c   :  { %7193 = vmatpush3.msra.mxu1 %v1455_v42  ;;  %7198 = vmatpush3.msra.mxu0 %v1456_v33 }
 0x69d   :  { %7195 = vmatmul.mubr.msk.f32.vlgmr.msra.gmra.mrb[16].mxu1 %vm1459_vm8, %v2208_v38  ;;  %7200 = vmatmul.mubr.msk.f32.vlgmr.msra.gmra.mrb[16].mxu0 %vm1459_vm8, %v2209_v39 }
 0x69e   :  { %7202 = vmatprep.subr.mxu1 %v7784_v20  ;;  %7207 = vmatprep.subr.mxu0 %v7784_v20 }
 0x69f   :  { %7203 = vmatpush3.msra.mxu1 %v1457_v30  ;;  %7208 = vmatpush3.msra.mxu0 %v1458_v40 }
 0x6a0   :  { %7204 = vmatprep.mubr.msk.f32.mxu1 %vm7788_vm7, %v7784_v20  ;;  %7209 = vmatprep.mubr.msk.f32.mxu0 %vm7788_vm7, %v7784_v20 }
 0x6a1   :  { %7205 = vmatmul.mubr.msk.f32.vlgmr.msra.gmra.mrb[18].mxu1 %vm1459_vm8, %v2210_v48  ;;  %7210 = vmatmul.mubr.msk.f32.vlgmr.msra.gmra.mrb[18].mxu0 %vm1459_vm8, %v2211_v21 }
 0x723   :  { %v2281_v26 = vpop.f32.mrb[12].mxu1 }
 0x724   :  { %v7176_v53 = vpop.f32.mrb[13].mxu1 }
 0x727   :  { %v2427_v10 = vpop.f32.mrb[14].mxu1 }
 0x728   :  { %v2354_v23 = vpop.f32.mrb[12].mxu0  ;;  %v2796_v47 = vcombine.low %v2281_v26, %v2427_v10  ;;  %v2797_v57 = vcombine.high %v2281_v26, %v2427_v10  ;;  %v7186_v50 = vpop.f32.mrb[15].mxu1 }
 0x729   :  { %v7181_v44 = vpop.f32.mrb[13].mxu0 }
 0x72a   :  { %v2804_v61 = vrot.slane %v2796_v47, %v8047_v43  ;;  %v2811_v32 = vrot.slane %v2797_v57, %v8047_v43 }
 0x72c   :  { %v2500_v55 = vpop.f32.mrb[14].mxu0 }
 0x72d   :  { %v2812_v56 = vcombine.low %v2354_v23, %v2500_v55  ;;  %v2813_v58 = vcombine.high %v2354_v23, %v2500_v55  ;;  %v7191_v59 = vpop.f32.mrb[15].mxu0 }
 0x72f   :  { %v2820_v60 = vrot.slane %v2812_v56, %v8047_v43  ;;  %v2827_v28 = vrot.slane %v2813_v58, %v8047_v43 }
 0x731   :  { %v2828_v7 = vcombine.low %v2804_v61, %v2820_v60  ;;  %v2829_v9 = vcombine.high %v2804_v61, %v2820_v60  ;;  %v2844_v11 = vcombine.low %v2811_v32, %v2827_v28  ;;  %v2845_v12 = vcombine.high %v2811_v32, %v2827_v28 }
 0x733   :  { %v2836_v54 = vrot.slane %v2828_v7, %v8050_v49  ;;  %v2843_v4 = vrot.slane %v2829_v9, %v8050_v49  ;;  %v2852_v52 = vrot.slane %v2844_v11, %v8050_v49  ;;  %v2859_v5 = vrot.slane %v2845_v12, %v8050_v49  ;;  %v6776_v12 = vld [vmem:[%s9022_s2 + $0x60] sm:$0xff] }
 0x735   :  { %v2932_v34 = vcombine.low %v2836_v54, %v2843_v4  ;;  %v6822_v15 = vcombine.high %v2836_v54, %v2843_v4  ;;  %v2948_v19 = vcombine.low %v2852_v52, %v2859_v5  ;;  %v6823_v14 = vcombine.high %v2852_v52, %v2859_v5  ;;  %v6777_v54 = vld [vmem:[%s9022_s2 + $0x68] sm:$0xff] }
 0x737   :  { %v2939_v36 = vrot.slane %v2932_v34, %v8047_v43  ;;  %v2947_v24 = vrot.slane %v6822_v15, %v8047_v43  ;;  %v2955_v18 = vrot.slane %v2948_v19, %v8047_v43  ;;  %v2963_v29 = vrot.slane %v6823_v14, %v8047_v43 }
 0x738   :  { %v7469_v15 = vpack.c.bf16 %v6777_v54, %v6776_v12 }
 0x739   :  { %v2964_v46 = vcombine.low %v2939_v36, %v2947_v24  ;;  %v2980_v6 = vcombine.low %v2955_v18, %v2963_v29  ;;  %v2965_v31 = vcombine.high %v2939_v36, %v2947_v24  ;;  %v2981_v51 = vcombine.high %v2955_v18, %v2963_v29  ;;  %v6778_v18 = vld [vmem:[%s9022_s2 + $0x70] sm:$0xff]  ;;  %v6779_v29 = vld [vmem:[%s9022_s2 + $0x78] sm:$0xff] }
 0x73a   :  { %7470 = vmatprep.subr.bf16.mxu1 %v7469_v15 }
 0x73b   :  { %v8367_v42 = vrot.slane %v2964_v46, %v8050_v49  ;;  %v8370_v33 = vrot.slane %v2980_v6, %v8050_v49  ;;  %v2979_v35 = vrot.slane %v2965_v31, %v8050_v49  ;;  %v2995_v38 = vrot.slane %v2981_v51, %v8050_v49  ;;  %7472 = vmatpush3.bf16.msra.mxu1 %v7469_v15 }
 0x73d   :  { %v2997_v39 = vcombine.high %v8367_v42, %v8370_v33  ;;  %v2996_v30 = vcombine.low %v8367_v42, %v8370_v33  ;;  %v2998_v40 = vcombine.low %v2979_v35, %v2995_v38  ;;  %v2999_v48 = vcombine.high %v2979_v35, %v2995_v38  ;;  %v7681_v33 = vld [vmem:[#allocation7] sm:$0xff] }
 0x73e   :  { %v7473_v35 = vpack.c.bf16 %v6779_v29, %v6778_v18  ;;  %v3102_v42 = vsub.s32 5, %v7890_v1 }
 0x73f   :  { %3070 = vrot.lane.b32.xlu0 %v2997_v39, %s7782_s14 }
 0x740   :  { %7474 = vmatprep.subr.bf16.mxu1 %v7473_v35 }
 0x741   :  { %7476 = vmatpush3.bf16.msra.mxu1 %v7473_v35  ;;  %v3226_v35 = vld [vmem:[#allocation2 + $0x8] sm:$0xff] }
 0x743   :  { %3078 = vrot.lane.b32.xlu0 %v2998_v40, %s7778_s23 }
 0x747   :  { %3086 = vrot.lane.b32.xlu0 %v2999_v48, %s7792_s13 }
 0x770   :  { %v2573_v21 = vpop.f32.mrb[16].mxu1  ;;  %v2646_v26 = vpop.f32.mrb[16].mxu0 }
 0x771   :  { %v7196_v53 = vpop.f32.mrb[17].mxu1  ;;  %v7201_v10 = vpop.f32.mrb[17].mxu0 }
 0x774   :  { %v2719_v23 = vpop.f32.mrb[18].mxu1  ;;  %v2792_v47 = vpop.f32.mrb[18].mxu0 }
 0x775   :  { %v2864_v57 = vcombine.low %v2573_v21, %v2719_v23  ;;  %v2865_v50 = vcombine.high %v2573_v21, %v2719_v23  ;;  %v2880_v44 = vcombine.low %v2646_v26, %v2792_v47  ;;  %v2881_v55 = vcombine.high %v2646_v26, %v2792_v47  ;;  %v7206_v56 = vpop.f32.mrb[19].mxu1  ;;  %v7211_v58 = vpop.f32.mrb[19].mxu0 }
 0x777   :  { %v2872_v59 = vrot.slane %v2864_v57, %v8047_v43  ;;  %v2879_v61 = vrot.slane %v2865_v50, %v8047_v43  ;;  %v2888_v32 = vrot.slane %v2880_v44, %v8047_v43  ;;  %v2895_v60 = vrot.slane %v2881_v55, %v8047_v43 }
 0x779   :  { %v2896_v28 = vcombine.low %v2872_v59, %v2888_v32  ;;  %v2897_v7 = vcombine.high %v2872_v59, %v2888_v32  ;;  %v2912_v9 = vcombine.low %v2879_v61, %v2895_v60  ;;  %v2913_v11 = vcombine.high %v2879_v61, %v2895_v60 }
 0x77b   :  { %v2904_v4 = vrot.slane %v2896_v28, %v8050_v49  ;;  %v2911_v52 = vrot.slane %v2897_v7, %v8050_v49  ;;  %v2920_v5 = vrot.slane %v2912_v9, %v8050_v49  ;;  %v2927_v34 = vrot.slane %v2913_v11, %v8050_v49 }
 0x77d   :  { %v3000_v19 = vcombine.low %v2904_v4, %v2911_v52  ;;  %v6824_v14 = vcombine.high %v2904_v4, %v2911_v52  ;;  %v3016_v36 = vcombine.low %v2920_v5, %v2927_v34  ;;  %v6825_v24 = vcombine.high %v2920_v5, %v2927_v34 }
 0x77f   :  { %v3007_v46 = vrot.slane %v3000_v19, %v8047_v43  ;;  %v3015_v6 = vrot.slane %v6824_v14, %v8047_v43  ;;  %v3023_v31 = vrot.slane %v3016_v36, %v8047_v43  ;;  %v3031_v51 = vrot.slane %v6825_v24, %v8047_v43 }
 0x781   :  { %v3032_v38 = vcombine.low %v3007_v46, %v3015_v6  ;;  %v3048_v39 = vcombine.low %v3023_v31, %v3031_v51  ;;  %v3033_v40 = vcombine.high %v3007_v46, %v3015_v6  ;;  %v3049_v48 = vcombine.high %v3023_v31, %v3031_v51 }
 0x783   :  { %v3040_v21 = vrot.slane %v3032_v38, %v8050_v49  ;;  %v3056_v26 = vrot.slane %v3048_v39, %v8050_v49  ;;  %v3047_v53 = vrot.slane %v3033_v40, %v8050_v49  ;;  %v3063_v10 = vrot.slane %v3049_v48, %v8050_v49  ;;  %v3227_v38 = vld [vmem:[#allocation2 + $0x10] sm:$0xff]  ;;  %v3228_v40 = vld [vmem:[#allocation2 + $0x18] sm:$0xff] }
 0x784   :  { %v7481_v48 = vpack.c.bf16 %v3228_v40, %v3227_v38 }
 0x785   :  { %v3065_v23 = vcombine.high %v3040_v21, %v3056_v26  ;;  %v3064_v47 = vcombine.low %v3040_v21, %v3056_v26  ;;  %v3066_v57 = vcombine.low %v3047_v53, %v3063_v10  ;;  %v3067_v50 = vcombine.high %v3047_v53, %v3063_v10 }
 0x787   :  { %3072 = vrot.lane.b32.xlu1 %v3065_v23, %s7782_s14 }
 0x78b   :  { %3080 = vrot.lane.b32.xlu1 %v3066_v57, %s7778_s23  ;;  %v3215_v57 = vsub.s32 6, %v7890_v1 }
 0x78f   :  { %3088 = vrot.lane.b32.xlu1 %v3067_v50, %s7792_s13  ;;  %v3221_v50 = vsub.s32 7, %v7890_v1  ;;  %v6900_v1 = vld [vmem:[%s9024_s4 + $0x40] sm:$0xff] }
 0x7b1   :  { %v3071_v44 = vpop.permute.xlu0 %3070 }
 0x7b2   :  { %v3092_v56 = vsel %vm1459_vm8, %v2996_v30, %v3071_v44  ;;  %v3103_v30 = vrot.slane %v7681_v33, %v3102_v42  ;;  %v3216_v44 = vrot.slane %v7681_v33, %v3215_v57 }
 0x7b5   :  { %v3079_v55 = vpop.permute.xlu0 %3078 }
 0x7b6   :  { %v3095_v58 = vsel %vm3094_vm10, %v3092_v56, %v3079_v55 }
 0x7b9   :  { %v3087_v59 = vpop.permute.xlu0 %3086 }
 0x7ba   :  { %v3098_v61 = vsel %vm3097_vm11, %v3095_v58, %v3087_v59  ;;  %v3222_v58 = vrot.slane %v7681_v33, %v3221_v50  ;;  %v3337_v33 = vld [vmem:[%s9024_s4 + $0x10] sm:$0xff] }
 0x7bb   :  { %7220 = vmatprep.mubr.msk.f32.mxu1 %vm281_vm6, %v3098_v61 }
 0x7f9   :  { %v3073_v32 = vpop.permute.xlu1 %3072 }
 0x7fa   :  { %v3093_v28 = vsel %vm1459_vm8, %v3064_v47, %v3073_v32 }
 0x7fd   :  { %v3081_v60 = vpop.permute.xlu1 %3080 }
 0x7fe   :  { %v3096_v7 = vsel %vm3094_vm10, %v3093_v28, %v3081_v60 }
 0x801   :  { %v3089_v9 = vpop.permute.xlu1 %3088 }
 0x802   :  { %v3099_v11 = vsel %vm3097_vm11, %v3096_v7, %v3089_v9  ;;  %v3335_v9 = vld [vmem:[%s9024_s4] sm:$0xff] }
 0x803   :  { %7221 = vmatmul.mubr.msk.f32.vlgmr.msra.gmra.mrb[20].mxu1 %vm281_vm6, %v3099_v11  ;;  %v3336_v11 = vld [vmem:[%s9024_s4 + $0x8] sm:$0xff] }
 0x8d6   :  { %v7222_v12 = vpop.f32.mrb[20].mxu1 }
 0x8d7   :  { %v3182_v54 = vadd.f32 %v7222_v12, %v3103_v30  ;;  %v3176_v4 = vpop.f32.mrb[21].mxu1  ;;  %v3338_v12 = vld [vmem:[%s9024_s4 + $0x18] sm:$0xff] }
 0x8d8   :  { %v3177_v52 = vadd.f32 %v3176_v4, %v3103_v30  ;;  %v7485_v30 = vpack.c.bf16 %v3336_v11, %v3335_v9  ;;  %v3339_v4 = vld [vmem:[%s9024_s4 + $0x20] sm:$0xff] }
 0x8d9   :  { %v3186_v5 = vadd.f32 %v3182_v54, %v7972_v8  ;;  %v7489_v54 = vpack.c.bf16 %v3338_v12, %v3337_v33 }
 0x8da   :  { %v3185_v34 = vadd.f32 %v3177_v52, %v7962_v63  ;;  %v3225_v63 = vld [vmem:[#allocation2] sm:$0xff]  ;;  %7486 = vmatprep.subr.bf16.mxu1 %v7485_v30  ;;  %v3340_v52 = vld [vmem:[%s9024_s4 + $0x28] sm:$0xff] }
 0x8db   :  { %v3190_v15 = vsel %vm281_vm6, %v3186_v5, 0.0  ;;  %v7477_v39 = vpack.c.bf16 %v3226_v35, %v3225_v63  ;;  %7488 = vmatpush3.bf16.msra.mxu1 %v7485_v30 }
 0x8dc   :  { %3191 = vadd.xlane.f32.xlu1 %v3190_v15  ;;  %v3187_v19 = vsel %vm281_vm6, %v3185_v34, 0.0  ;;  %7490 = vmatprep.subr.bf16.mxu1 %v7489_v54  ;;  %v3342_v15 = vld [vmem:[%s9024_s4 + $0x38] sm:$0xff] }
 0x8dd   :  { %3188 = vadd.xlane.f32.xlu0 %v3187_v19  ;;  %7478 = vmatprep.subr.bf16.mxu0 %v7477_v39 }
 0x8de   :  { %7480 = vmatpush3.bf16.msra.mxu0 %v7477_v39 }
 0x8df   :  { %7482 = vmatprep.subr.bf16.mxu0 %v7481_v48  ;;  %7492 = vmatpush3.bf16.msra.mxu1 %v7489_v54 }
 0x8e2   :  { %7484 = vmatpush3.bf16.msra.mxu0 %v7481_v48 }
 0x969   :  { %v3192_v14 = vpop.xlane.xlu1 %3191 }
 0x96a   :  { %v3194_v36 = vmul.f32 0.03125, %v3192_v14  ;;  %v3189_v24 = vpop.xlane.xlu0 %3188  ;;  %v6828_v14 = vld [vmem:[#allocation5] ss:$0 sm:$0xff] }
 0x96b   :  { %v3193_v18 = vmul.f32 0.03125, %v3189_v24 }
 0x96c   :  { %v3196_v29 = vsub.f32 %v3186_v5, %v3194_v36  ;;  %v7493_v5 = vpack.c.bf16 %v3340_v52, %v3339_v4 }
 0x96d   :  { %v3195_v46 = vsub.f32 %v3185_v34, %v3193_v18  ;;  %v3341_v34 = vld [vmem:[%s9024_s4 + $0x30] sm:$0xff] }
 0x96e   :  { %v3198_v51 = vmul.f32 %v3196_v29, %v3196_v29  ;;  %7494 = vmatprep.subr.bf16.mxu1 %v7493_v5  ;;  %v7497_v19 = vpack.c.bf16 %v3342_v15, %v3341_v34 }
 0x96f   :  { %v3197_v6 = vmul.f32 %v3195_v46, %v3195_v46  ;;  %7496 = vmatpush3.bf16.msra.mxu1 %v7493_v5 }
 0x970   :  { %v3202_v8 = vsel %vm281_vm6, %v3198_v51, 0.0  ;;  %7498 = vmatprep.subr.bf16.mxu1 %v7497_v19 }
 0x971   :  { %v3199_v31 = vsel %vm281_vm6, %v3197_v6, 0.0 }
 0x972   :  { %3200 = vadd.xlane.f32.xlu0 %v3199_v31 }
 0x973   :  { %7500 = vmatpush3.bf16.msra.mxu1 %v7497_v19 }
 0x976   :  { %3203 = vadd.xlane.f32.xlu0 %v3202_v8 }
 0x9ff   :  { %v3201_v21 = vpop.xlane.xlu0 %3200 }
 0xa00   :  { %v3205_v26 = vmul.f32 0.03125, %v3201_v21 }
 0xa02   :  { %v3207_v53 = vadd.f32 1e-05, %v3205_v26 }
 0xa03   :  { %v3204_v10 = vpop.xlane.xlu0 %3203 }
 0xa04   :  { %7623 = vrsqrt.f32 %v3207_v53  ;;  %v3206_v23 = vmul.f32 0.03125, %v3204_v10 }
 0xa06   :  { %v3208_v47 = vadd.f32 1e-05, %v3206_v23 }
 0xa08   :  { %7625 = vrsqrt.f32 %v3208_v47 }
 0xa0e   :  { %v7624_v55 = vpop.eup %7623 }
 0xa0f   :  { %v3211_v56 = vmul.f32 %v7624_v55, %v3195_v46  ;;  %v8466_v55 = vld [vmem:[#allocation7 + $0x8] sm:$0xff] }
 0xa11   :  { %v3217_v59 = vmul.f32 %v3216_v44, %v3211_v56  ;;  %v3346_v56 = vrot.slane %v8466_v55, %v7893_v2 }
 0xa12   :  { %v7626_v61 = vpop.eup %7625 }
 0xa13   :  { %v3212_v32 = vmul.f32 %v7626_v61, %v3196_v29  ;;  %v3223_v60 = vadd.f32 %v3222_v58, %v3217_v59 }
 0xa15   :  { %v3218_v28 = vmul.f32 %v3216_v44, %v3212_v32  ;;  %7231 = vmatprep.mubr.msk.f32.mxu0 %vm281_vm6, %v3223_v60 }
 0xa17   :  { %v3224_v7 = vadd.f32 %v3222_v58, %v3218_v28 }
 0xa19   :  { %7232 = vmatmul.mubr.msk.f32.vlgmr.msra.gmra.mrb[20].mxu0 %vm281_vm6, %v3224_v7 }
 0xaec   :  { %v7233_v36 = vpop.f32.mrb[20].mxu0 }
 0xaed   :  { %v3314_v24 = vadd.f32 %v7233_v36, %v6828_v14  ;;  %v3308_v18 = vpop.f32.mrb[21].mxu0  ;;  %v6841_v36 = vld [vmem:[%s9022_s2 + $0xc0] sm:$0xff] }
 0xaee   :  { %v3309_v29 = vadd.f32 %v6828_v14, %v3308_v18  ;;  %v6834_v14 = vld [vmem:[%s9022_s2 + $0x88] sm:$0xff] }
 0xaef   :  { %v3318_v46 = vmul.f32 %v3314_v24, %v3314_v24  ;;  %v6842_v18 = vld [vmem:[%s9022_s2 + $0xc8] sm:$0xff] }
 0xaf0   :  { %v3317_v6 = vmul.f32 %v3309_v29, %v3309_v29 }
 0xaf1   :  { %v3320_v31 = vmul.f32 %v3318_v46, %v3314_v24  ;;  %v6836_v46 = vld [vmem:[%s9022_s2 + $0x98] sm:$0xff] }
 0xaf2   :  { %v3319_v51 = vmul.f32 %v3317_v6, %v3309_v29  ;;  %v7517_v6 = vpack.c.bf16 %v6842_v18, %v6841_v36 }
 0xaf3   :  { %v3322_v8 = vmul.f32 0.044715, %v3320_v31 }
 0xaf4   :  { %v3321_v63 = vmul.f32 0.044715, %v3319_v51  ;;  %v6843_v51 = vld [vmem:[%s9022_s2 + $0xd0] sm:$0xff]  ;;  %7518 = vmatprep.subr.bf16.mxu1 %v7517_v6 }
 0xaf5   :  { %v3324_v35 = vadd.f32 %v3322_v8, %v3314_v24  ;;  %v6844_v8 = vld [vmem:[%s9022_s2 + $0xd8] sm:$0xff] }
 0xaf6   :  { %v3323_v38 = vadd.f32 %v3321_v63, %v3309_v29  ;;  %v7521_v63 = vpack.c.bf16 %v6844_v8, %v6843_v51 }
 0xaf7   :  { %v3326_v39 = vmul.f32 0.7978846, %v3324_v35  ;;  %v6837_v35 = vld [vmem:[%s9022_s2 + $0xa0] sm:$0xff] }
 0xaf8   :  { %v3325_v40 = vmul.f32 0.7978846, %v3323_v38  ;;  %v6838_v38 = vld [vmem:[%s9022_s2 + $0xa8] sm:$0xff] }
 0xaf9   :  { %7627 = vtanh.f32 %v3326_v39  ;;  %v7509_v39 = vpack.c.bf16 %v6838_v38, %v6837_v35 }
 0xafa   :  { %7629 = vtanh.f32 %v3325_v40 }
 0xb03   :  { %v7628_v48 = vpop.eup %7627 }
 0xb04   :  { %v7630_v21 = vpop.eup %7629  ;;  %v3330_v26 = vadd.f32 1.0, %v7628_v48 }
 0xb05   :  { %v3329_v53 = vadd.f32 1.0, %v7630_v21 }
 0xb06   :  { %v3332_v10 = vmul.f32 0.5, %v3330_v26 }
 0xb07   :  { %v3331_v23 = vmul.f32 0.5, %v3329_v53 }
 0xb08   :  { %v3334_v44 = vmul.f32 %v3332_v10, %v3314_v24 }
 0xb09   :  { %v3333_v47 = vmul.f32 %v3331_v23, %v3309_v29  ;;  %v6835_v29 = vld [vmem:[%s9022_s2 + $0x90] sm:$0xff]  ;;  %v3460_v23 = vrot.slane %v8466_v55, %v7896_v3 }
 0xb0a   :  { %v7505_v31 = vpack.c.bf16 %v6836_v46, %v6835_v29 }
 0xb0b   :  { %7250 = vmatprep.mubr.msk.f32.mxu1 %vm3347_vm12, %v3333_v47 }
 0xb0c   :  { %7251 = vmatmul.mubr.msk.f32.vlgmr.msra.gmra.mrb[22].mxu1 %vm3347_vm12, %v3334_v44 }
 0xb0d   :  { %7520 = vmatpush3.bf16.msra.mxu1 %v7517_v6 }
 0xb0e   :  { %7522 = vmatprep.subr.bf16.mxu1 %v7521_v63 }
 0xb11   :  { %7524 = vmatpush3.bf16.msra.mxu1 %v7521_v63 }
 0xb12   :  { %7296 = vmatprep.subr.mxu1 %v7784_v20 }
 0xbdf   :  { %v7252_v58 = vpop.f32.mrb[22].mxu1 }
 0xbe0   :  { %v3426_v59 = vadd.f32 %v7252_v58, %v3346_v56  ;;  %v3420_v61 = vpop.f32.mrb[23].mxu1 }
 0xbe1   :  { %v3421_v32 = vadd.f32 %v3420_v61, %v3346_v56 }
 0xbe2   :  { %v3430_v28 = vadd.f32 %v3426_v59, %v3224_v7  ;;  %v3466_v59 = vrot.slane %v8466_v55, %v7998_v16 }
 0xbe3   :  { %v3429_v9 = vadd.f32 %v3421_v32, %v3223_v60  ;;  %v6833_v60 = vld [vmem:[%s9022_s2 + $0x80] sm:$0xff] }
 0xbe4   :  { %v3434_v11 = vsel %vm281_vm6, %v3430_v28, 0.0  ;;  %v7501_v24 = vpack.c.bf16 %v6834_v14, %v6833_v60 }
 0xbe5   :  { %3435 = vadd.xlane.f32.xlu0 %v3434_v11  ;;  %v3431_v30 = vsel %vm281_vm6, %v3429_v9, 0.0 }
 0xbe6   :  { %3432 = vadd.xlane.f32.xlu1 %v3431_v30  ;;  %7502 = vmatprep.subr.bf16.mxu0 %v7501_v24 }
 0xbe7   :  { %7504 = vmatpush3.bf16.msra.mxu0 %v7501_v24 }
 0xbe8   :  { %7506 = vmatprep.subr.bf16.mxu0 %v7505_v31 }
 0xbeb   :  { %7508 = vmatpush3.bf16.msra.mxu0 %v7505_v31 }
 0xbec   :  { %7510 = vmatprep.subr.bf16.mxu0 %v7509_v39 }
 0xc72   :  { %v3436_v33 = vpop.xlane.xlu0 %3435 }
 0xc73   :  { %v3438_v12 = vmul.f32 0.03125, %v3436_v33  ;;  %v3433_v54 = vpop.xlane.xlu1 %3432 }
 0xc74   :  { %v3437_v4 = vmul.f32 0.03125, %v3433_v54  ;;  %v3492_v54 = vrot.slane %v8466_v55, %v8002_v22 }
 0xc75   :  { %v3440_v52 = vsub.f32 %v3430_v28, %v3438_v12  ;;  %v6839_v28 = vld [vmem:[%s9022_s2 + $0xb0] sm:$0xff]  ;;  %v4240_v12 = vrot.slane %v8466_v55, %v3102_v42 }
 0xc76   :  { %v3439_v5 = vsub.f32 %v3429_v9, %v3437_v4  ;;  %v6840_v9 = vld [vmem:[%s9022_s2 + $0xb8] sm:$0xff] }
 0xc77   :  { %v3442_v34 = vmul.f32 %v3440_v52, %v3440_v52  ;;  %v7513_v33 = vpack.c.bf16 %v6840_v9, %v6839_v28 }
 0xc78   :  { %v3441_v15 = vmul.f32 %v3439_v5, %v3439_v5 }
 0xc79   :  { %v3446_v19 = vsel %vm281_vm6, %v3442_v34, 0.0 }
 0xc7a   :  { %3447 = vadd.xlane.f32.xlu0 %v3446_v19  ;;  %v3443_v7 = vsel %vm281_vm6, %v3441_v15, 0.0 }
 0xc7b   :  { %3444 = vadd.xlane.f32.xlu1 %v3443_v7  ;;  %v3869_v7 = vrot.slane %v8466_v55, %v8013_v27 }
 0xd07   :  { %v3448_v40 = vpop.xlane.xlu0 %3447 }
 0xd08   :  { %v3450_v48 = vmul.f32 0.03125, %v3448_v40  ;;  %v3445_v21 = vpop.xlane.xlu1 %3444 }
 0xd09   :  { %v3449_v26 = vmul.f32 0.03125, %v3445_v21 }
 0xd0a   :  { %v3452_v53 = vadd.f32 1e-05, %v3450_v48 }
 0xd0b   :  { %v3451_v10 = vadd.f32 1e-05, %v3449_v26 }
 0xd0c   :  { %7631 = vrsqrt.f32 %v3452_v53 }
 0xd0d   :  { %7633 = vrsqrt.f32 %v3451_v10 }
 0xd16   :  { %v7632_v47 = vpop.eup %7631 }
 0xd17   :  { %v7634_v44 = vpop.eup %7633  ;;  %v3456_v56 = vmul.f32 %v7632_v47, %v3440_v52 }
 0xd18   :  { %v3455_v58 = vmul.f32 %v7634_v44, %v3439_v5 }
 0xd19   :  { %v3462_v61 = vmul.f32 %v3460_v23, %v3456_v56 }
 0xd1a   :  { %v3461_v32 = vmul.f32 %v3460_v23, %v3455_v58 }
 0xd1b   :  { %v8517_v30 = vadd.f32 %v3466_v59, %v3462_v61 }
 0xd1c   :  { %v8515_v11 = vadd.f32 %v3466_v59, %v3461_v32 }
 0xd1e   :  { %7261 = vmatprep.mubr.msk.f32.mxu0 %vm281_vm6, %v8515_v11  ;;  %7283 = vmatprep.mubr.msk.f32.mxu1 %vm281_vm6, %v8515_v11 }
 0xd1f   :  { %7262 = vmatmul.mubr.msk.f32.vlgmr.msra.gmra.mrb[22].mxu0 %vm281_vm6, %v8517_v30  ;;  %7284 = vmatmul.mubr.msk.f32.vlgmr.msra.gmra.mrb[24].mxu1 %vm281_vm6, %v8517_v30 }
 0xd20   :  { %7512 = vmatpush3.bf16.msra.mxu0 %v7509_v39  ;;  %7272 = vmatprep.mubr.msk.f32.mxu0 %vm281_vm6, %v8515_v11 }
 0xd21   :  { %7514 = vmatprep.subr.bf16.mxu0 %v7513_v33  ;;  %7298 = vmatprep.mubr.msk.f32.mxu1 %vm7788_vm7, %v7784_v20 }
 0xd24   :  { %7516 = vmatpush3.bf16.msra.mxu0 %v7513_v33 }
 0xd25   :  { %7286 = vmatprep.subr.mxu0 %v7784_v20 }
 0xd27   :  { %7273 = vmatmul.mubr.msk.f32.vlgmr.msra.gmra.mrb[24].mxu0 %vm281_vm6, %v8517_v30 }
 0xd28   :  { %7288 = vmatprep.mubr.msk.f32.mxu0 %vm7788_vm7, %v7784_v20 }
 0xdf2   :  { %v7263_v4 = vpop.f32.mrb[22].mxu0  ;;  %v7285_v52 = vpop.f32.mrb[24].mxu1 }
 0xdf3   :  { %v8541_v5 = vadd.f32 %v7285_v52, %v4240_v12  ;;  %v3565_v34 = vpop.f32.mrb[23].mxu0  ;;  %v4307_v15 = vpop.f32.mrb[25].mxu1  ;;  %v8559_v55 = vadd.f32 %v7263_v4, %v3492_v54 }
 0xdf4   :  { %v3566_v19 = vadd.f32 %v3565_v34, %v3492_v54  ;;  %v8567_v24 = vadd.f32 %v4307_v15, %v4240_v12 }
 0xdf6   :  { %3576 = vrot.lane.b32.xlu1 %v3566_v19, %s7786_s28 }
 0xdfa   :  { %v7274_v60 = vpop.f32.mrb[24].mxu0 }
 0xdfb   :  { %v3936_v14 = vpop.f32.mrb[25].mxu0  ;;  %v8550_v42 = vadd.f32 %v7274_v60, %v3869_v7 }
 0xdfc   :  { %v3937_v36 = vadd.f32 %v3936_v14, %v3869_v7 }
 0xdfe   :  { %3953 = vrot.lane.b32.xlu0 %v3937_v36, %s7785_s3  ;;  %3947 = vrot.lane.b32.xlu1 %v3937_v36, %s7786_s28 }
 0xe02   :  { %3582 = vrot.lane.b32.xlu0 %v3566_v19, %s7785_s3  ;;  %3959 = vrot.lane.b32.xlu1 %v3937_v36, %s7787_s12 }
 0xe06   :  { %3949 = vrot.lane.b32.xlu0 %v8550_v42, %s7786_s28  ;;  %3588 = vrot.lane.b32.xlu1 %v3566_v19, %s7787_s12 }
 0xe0a   :  { %3961 = vrot.lane.b32.xlu0 %v8550_v42, %s7787_s12  ;;  %3955 = vrot.lane.b32.xlu1 %v8550_v42, %s7785_s3 }
 0xe0e   :  { %3584 = vrot.lane.b32.xlu0 %v8559_v55, %s7785_s3  ;;  %3578 = vrot.lane.b32.xlu1 %v8559_v55, %s7786_s28 }
 0xe12   :  { %3590 = vrot.lane.b32.xlu1 %v8559_v55, %s7787_s12 }
 0xe16   :  { %4318 = vrot.lane.b32.xlu1 %v8567_v24, %s7786_s28 }
 0xe68   :  { %v3577_v18 = vpop.permute.xlu1 %3576 }
 0xe70   :  { %v3954_v29 = vpop.permute.xlu0 %3953  ;;  %v3948_v46 = vpop.permute.xlu1 %3947 }
 0xe71   :  { %v3965_v6 = vcombine.low %v3937_v36, %v3954_v29  ;;  %v3966_v31 = vcombine.high %v3937_v36, %v3954_v29 }
 0xe73   :  { %v3973_v38 = vrot.slane %v3965_v6, %v8047_v43  ;;  %v3980_v39 = vrot.slane %v3966_v31, %v8047_v43 }
 0xe74   :  { %v3583_v51 = vpop.permute.xlu0 %3582  ;;  %v3960_v8 = vpop.permute.xlu1 %3959 }
 0xe75   :  { %v3981_v63 = vcombine.low %v3948_v46, %v3960_v8  ;;  %v3982_v35 = vcombine.high %v3948_v46, %v3960_v8  ;;  %v3594_v21 = vcombine.low %v3566_v19, %v3583_v51  ;;  %v3595_v26 = vcombine.high %v3566_v19, %v3583_v51 }
 0xe77   :  { %v3989_v40 = vrot.slane %v3981_v63, %v8047_v43  ;;  %v3996_v48 = vrot.slane %v3982_v35, %v8047_v43  ;;  %v3602_v33 = vrot.slane %v3594_v21, %v8047_v43  ;;  %v3609_v12 = vrot.slane %v3595_v26, %v8047_v43 }
 0xe78   :  { %v3589_v53 = vpop.permute.xlu1 %3588  ;;  %v3950_v56 = vpop.permute.xlu0 %3949 }
 0xe79   :  { %v3997_v10 = vcombine.low %v3973_v38, %v3989_v40  ;;  %v3998_v23 = vcombine.high %v3973_v38, %v3989_v40  ;;  %v4013_v47 = vcombine.low %v3980_v39, %v3996_v48  ;;  %v4014_v44 = vcombine.high %v3980_v39, %v3996_v48 }
 0xe7a   :  { %v3610_v58 = vcombine.low %v3577_v18, %v3589_v53  ;;  %v3611_v59 = vcombine.high %v3577_v18, %v3589_v53 }
 0xe7b   :  { %v4005_v61 = vrot.slane %v3997_v10, %v8050_v49  ;;  %v4012_v32 = vrot.slane %v3998_v23, %v8050_v49  ;;  %v4021_v28 = vrot.slane %v4013_v47, %v8050_v49  ;;  %v4028_v9 = vrot.slane %v4014_v44, %v8050_v49 }
 0xe7c   :  { %v3618_v54 = vrot.slane %v3610_v58, %v8047_v43  ;;  %v3625_v4 = vrot.slane %v3611_v59, %v8047_v43  ;;  %v3956_v52 = vpop.permute.xlu1 %3955  ;;  %v3962_v51 = vpop.permute.xlu0 %3961 }
 0xe7d   :  { %v4101_v34 = vcombine.low %v4005_v61, %v4012_v32  ;;  %v6857_v15 = vcombine.high %v4005_v61, %v4012_v32  ;;  %v4117_v19 = vcombine.low %v4021_v28, %v4028_v9  ;;  %v6858_v7 = vcombine.high %v4021_v28, %v4028_v9 }
 0xe7e   :  { %v3626_v60 = vcombine.low %v3602_v33, %v3618_v54  ;;  %v3627_v14 = vcombine.high %v3602_v33, %v3618_v54  ;;  %v3642_v36 = vcombine.low %v3609_v12, %v3625_v4  ;;  %v3643_v18 = vcombine.high %v3609_v12, %v3625_v4 }
 0xe7f   :  { %v8584_v29 = vrot.slane %v4101_v34, %v8047_v43  ;;  %v8587_v46 = vrot.slane %v6857_v15, %v8047_v43  ;;  %v8590_v6 = vrot.slane %v4117_v19, %v8047_v43  ;;  %v8593_v31 = vrot.slane %v6858_v7, %v8047_v43 }
 0xe80   :  { %v3634_v8 = vrot.slane %v3626_v60, %v8050_v49  ;;  %v3641_v63 = vrot.slane %v3627_v14, %v8050_v49  ;;  %v3650_v35 = vrot.slane %v3642_v36, %v8050_v49  ;;  %v3657_v38 = vrot.slane %v3643_v18, %v8050_v49  ;;  %v3579_v39 = vpop.permute.xlu1 %3578  ;;  %v3585_v12 = vpop.permute.xlu0 %3584 }
 0xe81   :  { %v4133_v40 = vcombine.low %v8584_v29, %v8587_v46  ;;  %v4134_v48 = vcombine.high %v8584_v29, %v8587_v46  ;;  %v4049_v23 = vcombine.low %v3950_v56, %v3962_v51  ;;  %v4050_v47 = vcombine.high %v3950_v56, %v3962_v51 }
 0xe82   :  { %v3730_v21 = vcombine.low %v3634_v8, %v3641_v63  ;;  %v6851_v26 = vcombine.high %v3634_v8, %v3641_v63  ;;  %v3746_v53 = vcombine.low %v3650_v35, %v3657_v38  ;;  %v6852_v10 = vcombine.high %v3650_v35, %v3657_v38 }
 0xe83   :  { %v4033_v44 = vcombine.low %v8550_v42, %v3956_v52  ;;  %v4034_v58 = vcombine.high %v8550_v42, %v3956_v52  ;;  %v4149_v59 = vcombine.low %v8590_v6, %v8593_v31  ;;  %v4150_v61 = vcombine.high %v8590_v6, %v8593_v31 }
 0xe84   :  { %v8610_v32 = vrot.slane %v3730_v21, %v8047_v43  ;;  %v8613_v28 = vrot.slane %v6851_v26, %v8047_v43  ;;  %v4057_v9 = vrot.slane %v4049_v23, %v8047_v43  ;;  %v4064_v56 = vrot.slane %v4050_v47, %v8047_v43  ;;  %v3591_v54 = vpop.permute.xlu1 %3590 }
 0xe85   :  { %v4041_v33 = vrot.slane %v4033_v44, %v8047_v43  ;;  %v4048_v42 = vrot.slane %v4034_v58, %v8047_v43  ;;  %v8620_v4 = vrot.slane %v3746_v53, %v8047_v43  ;;  %v8623_v52 = vrot.slane %v6852_v10, %v8047_v43 }
 0xe86   :  { %v3762_v34 = vcombine.low %v8610_v32, %v8613_v28  ;;  %v3763_v15 = vcombine.high %v8610_v32, %v8613_v28  ;;  %v3662_v36 = vcombine.low %v8559_v55, %v3585_v12  ;;  %v3663_v18 = vcombine.high %v8559_v55, %v3585_v12 }
 0xe87   :  { %v4065_v19 = vcombine.low %v4041_v33, %v4057_v9  ;;  %v4066_v7 = vcombine.high %v4041_v33, %v4057_v9  ;;  %v4081_v60 = vcombine.low %v4048_v42, %v4064_v56  ;;  %v4082_v14 = vcombine.high %v4048_v42, %v4064_v56 }
 0xe88   :  { %v3678_v6 = vcombine.low %v3579_v39, %v3591_v54  ;;  %v3679_v31 = vcombine.high %v3579_v39, %v3591_v54  ;;  %v3670_v38 = vrot.slane %v3662_v36, %v8047_v43  ;;  %v3677_v21 = vrot.slane %v3663_v18, %v8047_v43 }
 0xe89   :  { %v4073_v51 = vrot.slane %v4065_v19, %v8050_v49  ;;  %v4080_v8 = vrot.slane %v4066_v7, %v8050_v49  ;;  %v4089_v63 = vrot.slane %v4081_v60, %v8050_v49  ;;  %v4096_v35 = vrot.slane %v4082_v14, %v8050_v49 }
 0xe8a   :  { %v3686_v26 = vrot.slane %v3678_v6, %v8047_v43  ;;  %v3693_v53 = vrot.slane %v3679_v31, %v8047_v43  ;;  %v3778_v7 = vcombine.low %v8620_v4, %v8623_v52  ;;  %v3779_v60 = vcombine.high %v8620_v4, %v8623_v52 }
 0xe8b   :  { %v4169_v10 = vcombine.low %v4073_v51, %v4080_v8  ;;  %v6859_v55 = vcombine.high %v4073_v51, %v4080_v8  ;;  %v4185_v23 = vcombine.low %v4089_v63, %v4096_v35  ;;  %v6860_v39 = vcombine.high %v4089_v63, %v4096_v35 }
 0xe8c   :  { %v3694_v47 = vcombine.low %v3670_v38, %v3686_v26  ;;  %v3695_v44 = vcombine.high %v3670_v38, %v3686_v26  ;;  %v3710_v58 = vcombine.low %v3677_v21, %v3693_v53  ;;  %v3711_v32 = vcombine.high %v3677_v21, %v3693_v53 }
 0xe8d   :  { %v4176_v28 = vrot.slane %v4169_v10, %v8047_v43  ;;  %v4184_v9 = vrot.slane %v6859_v55, %v8047_v43  ;;  %v4192_v56 = vrot.slane %v4185_v23, %v8047_v43  ;;  %v4200_v33 = vrot.slane %v6860_v39, %v8047_v43 }
 0xe8e   :  { %v3702_v42 = vrot.slane %v3694_v47, %v8050_v49  ;;  %v3709_v12 = vrot.slane %v3695_v44, %v8050_v49  ;;  %v3718_v54 = vrot.slane %v3710_v58, %v8050_v49  ;;  %v3725_v19 = vrot.slane %v3711_v32, %v8050_v49 }
 0xe8f   :  { %v4201_v14 = vcombine.low %v4176_v28, %v4184_v9  ;;  %v4217_v36 = vcombine.low %v4192_v56, %v4200_v33  ;;  %v4141_v8 = vrot.slane %v4133_v40, %v8050_v49  ;;  %v4157_v63 = vrot.slane %v4149_v59, %v8050_v49 }
 0xe90   :  { %v3798_v18 = vcombine.low %v3702_v42, %v3709_v12  ;;  %v6853_v6 = vcombine.high %v3702_v42, %v3709_v12  ;;  %v3814_v31 = vcombine.low %v3718_v54, %v3725_v19  ;;  %v6854_v51 = vcombine.high %v3718_v54, %v3725_v19 }
 0xe91   :  { %v4148_v35 = vrot.slane %v4134_v48, %v8050_v49  ;;  %v4164_v4 = vrot.slane %v4150_v61, %v8050_v49  ;;  %v4165_v53 = vcombine.low %v4141_v8, %v4157_v63  ;;  %v3770_v40 = vrot.slane %v3762_v34, %v8050_v49 }
 0xe92   :  { %v3805_v52 = vrot.slane %v3798_v18, %v8047_v43  ;;  %v3813_v38 = vrot.slane %v6853_v6, %v8047_v43  ;;  %v3821_v21 = vrot.slane %v3814_v31, %v8047_v43  ;;  %v3829_v26 = vrot.slane %v6854_v51, %v8047_v43 }
 0xe93   :  { %v4167_v10 = vcombine.low %v4148_v35, %v4164_v4  ;;  %v3786_v59 = vrot.slane %v3778_v7, %v8050_v49  ;;  %v4202_v55 = vcombine.high %v4176_v28, %v4184_v9  ;;  %v4218_v46 = vcombine.high %v4192_v56, %v4200_v33  ;;  %7287 = vmatpush3.xpose.msk.msra.mxu0 %vm1459_vm8, %v4165_v53 }
 0xe94   :  { %v3830_v23 = vcombine.low %v3805_v52, %v3813_v38  ;;  %v3846_v29 = vcombine.low %v3821_v21, %v3829_v26  ;;  %v3777_v61 = vrot.slane %v3763_v15, %v8050_v49  ;;  %7291 = vmatprep.subr.mxu0 %v7784_v20  ;;  %v4166_v39 = vcombine.high %v4141_v8, %v4157_v63 }
 0xe95   :  { %7297 = vmatpush3.xpose.msk.msra.mxu1 %vm1459_vm8, %v4167_v10  ;;  %v3794_v48 = vcombine.low %v3770_v40, %v3786_v59  ;;  %v3793_v47 = vrot.slane %v3779_v60, %v8050_v49  ;;  %v4209_v34 = vrot.slane %v4201_v14, %v8050_v49  ;;  %v4225_v44 = vrot.slane %v4217_v36, %v8050_v49 }
 0xe96   :  { %7306 = vmatprep.subr.mxu1 %v7784_v20  ;;  %v3838_v58 = vrot.slane %v3830_v23, %v8050_v49  ;;  %v3854_v32 = vrot.slane %v3846_v29, %v8050_v49  ;;  %v3831_v28 = vcombine.high %v3805_v52, %v3813_v38  ;;  %v3847_v9 = vcombine.high %v3821_v21, %v3829_v26 }
 0xe97   :  { %7289 = vmatmul.mubr.msk.f32.vlgmr.msra.gmra.mrb[26].mxu0 %vm1459_vm8, %v3794_v48  ;;  %v3796_v15 = vcombine.low %v3777_v61, %v3793_v47  ;;  %v4233_v56 = vcombine.low %v4209_v34, %v4225_v44  ;;  %v4216_v33 = vrot.slane %v4202_v55, %v8050_v49  ;;  %v4232_v42 = vrot.slane %v4218_v46, %v8050_v49 }
 0xe98   :  { %7292 = vmatpush3.xpose.msk.msra.mxu0 %vm1459_vm8, %v4166_v39  ;;  %7293 = vmatprep.mubr.msk.f32.mxu0 %vm7788_vm7, %v7784_v20  ;;  %v3795_v12 = vcombine.high %v3770_v40, %v3786_v59  ;;  %v3862_v54 = vcombine.low %v3838_v58, %v3854_v32  ;;  %v4168_v19 = vcombine.high %v4148_v35, %v4164_v4 }
 0xe99   :  { %7299 = vmatmul.mubr.msk.f32.vlgmr.msra.gmra.mrb[26].mxu1 %vm1459_vm8, %v3796_v15  ;;  %7301 = vmatprep.subr.mxu0 %v7784_v20  ;;  %v3845_v7 = vrot.slane %v3831_v28, %v8050_v49  ;;  %v3861_v60 = vrot.slane %v3847_v9, %v8050_v49  ;;  %v4235_v14 = vcombine.low %v4216_v33, %v4232_v42 }
 0xe9a   :  { %7307 = vmatpush3.xpose.msk.msra.mxu1 %vm1459_vm8, %v4233_v56  ;;  %7308 = vmatprep.mubr.msk.f32.mxu1 %vm7788_vm7, %v7784_v20  ;;  %v3797_v36 = vcombine.high %v3777_v61, %v3793_v47  ;;  %v4234_v18 = vcombine.high %v4209_v34, %v4225_v44  ;;  %v3863_v6 = vcombine.high %v3838_v58, %v3854_v32 }
 0xe9b   :  { %7294 = vmatmul.mubr.msk.f32.vlgmr.msra.gmra.mrb[28].mxu0 %vm1459_vm8, %v3795_v12  ;;  %7316 = vmatprep.subr.mxu1 %v7784_v20  ;;  %v3864_v31 = vcombine.low %v3845_v7, %v3861_v60  ;;  %v4236_v51 = vcombine.high %v4216_v33, %v4232_v42  ;;  %v3865_v8 = vcombine.high %v3845_v7, %v3861_v60 }
 0xe9c   :  { %7302 = vmatpush3.xpose.msk.msra.mxu0 %vm1459_vm8, %v4168_v19  ;;  %7303 = vmatprep.mubr.msk.f32.mxu0 %vm7788_vm7, %v7784_v20 }
 0xe9d   :  { %7311 = vmatprep.subr.mxu0 %v7784_v20  ;;  %7309 = vmatmul.mubr.msk.f32.vlgmr.msra.gmra.mrb[28].mxu1 %vm1459_vm8, %v3862_v54 }
 0xe9e   :  { %7317 = vmatpush3.xpose.msk.msra.mxu1 %vm1459_vm8, %v4235_v14  ;;  %7318 = vmatprep.mubr.msk.f32.mxu1 %vm7788_vm7, %v7784_v20 }
 0xe9f   :  { %7304 = vmatmul.mubr.msk.f32.vlgmr.msra.gmra.mrb[30].mxu0 %vm1459_vm8, %v3797_v36  ;;  %7326 = vmatprep.subr.mxu1 %v7784_v20 }
 0xea0   :  { %7312 = vmatpush3.xpose.msk.msra.mxu0 %vm1459_vm8, %v4234_v18  ;;  %7313 = vmatprep.mubr.msk.f32.mxu0 %vm7788_vm7, %v7784_v20 }
 0xea1   :  { %7321 = vmatprep.subr.mxu0 %v7784_v20  ;;  %7319 = vmatmul.mubr.msk.f32.vlgmr.msra.gmra.mrb[30].mxu1 %vm1459_vm8, %v3864_v31 }
 0xea2   :  { %7328 = vmatprep.mubr.msk.f32.mxu1 %vm7788_vm7, %v7784_v20 }
 0xea3   :  { %7314 = vmatmul.mubr.msk.f32.vlgmr.msra.gmra.mrb[32].mxu0 %vm1459_vm8, %v3863_v6 }
 0xea4   :  { %7322 = vmatpush3.xpose.msk.msra.mxu0 %vm1459_vm8, %v4236_v51  ;;  %7323 = vmatprep.mubr.msk.f32.mxu0 %vm7788_vm7, %v7784_v20 }
 0xea5   :  { %7331 = vmatprep.subr.mxu0 %v7784_v20 }
 0xea7   :  { %7324 = vmatmul.mubr.msk.f32.vlgmr.msra.gmra.mrb[34].mxu0 %vm1459_vm8, %v3865_v8 }
 0xea8   :  { %7333 = vmatprep.mubr.msk.f32.mxu0 %vm7788_vm7, %v7784_v20 }
 0xf6a   :  { %v4680_v63 = vpop.f32.mrb[26].mxu0 }
 0xf6b   :  { %v5216_v35 = vmul.f32 0.35355338, %v4680_v63  ;;  %v7290_v4 = vpop.f32.mrb[27].mxu0 }
 0xf6c   :  { %v4832_v52 = vpop.f32.mrb[26].mxu1 }
 0xf6d   :  { %v5218_v38 = vmul.f32 0.35355338, %v4832_v52  ;;  %v7300_v21 = vpop.f32.mrb[27].mxu1  ;;  %v5224_v26 = vadd.f32 %v5216_v35, %v8196_v13 }
 0xf6e   :  { %v4756_v53 = vpop.f32.mrb[28].mxu0 }
 0xf6f   :  { %v5217_v10 = vmul.f32 0.35355338, %v4756_v53  ;;  %v7295_v40 = vpop.f32.mrb[29].mxu0  ;;  %v5232_v59 = vsel %vm1459_vm8, %v5224_v26, -inf  ;;  %v5226_v55 = vadd.f32 %v5218_v38, %v8199_v17 }
 0xf70   :  { %5233 = vmax.xlane.f32.xlu0 %v5232_v59  ;;  %v4984_v23 = vpop.f32.mrb[28].mxu1 }
 0xf71   :  { %v5225_v29 = vadd.f32 %v5217_v10, %v8203_v25  ;;  %v5220_v46 = vmul.f32 0.35355338, %v4984_v23  ;;  %v7310_v48 = vpop.f32.mrb[29].mxu1  ;;  %v5238_v34 = vsel %vm1459_vm8, %v5226_v55, -inf }
 0xf72   :  { %v4908_v61 = vpop.f32.mrb[30].mxu0 }
 0xf73   :  { %v5219_v39 = vmul.f32 0.35355338, %v4908_v61  ;;  %v7305_v47 = vpop.f32.mrb[31].mxu0  ;;  %v5235_v13 = vsel %vm1459_vm8, %v5225_v29, -inf  ;;  %v5228_v44 = vadd.f32 %v5220_v46, %v8218_v45 }
 0xf74   :  { %5239 = vmax.xlane.f32.xlu0 %v5238_v34  ;;  %5236 = vmax.xlane.f32.xlu1 %v5235_v13  ;;  %v5136_v58 = vpop.f32.mrb[30].mxu1 }
 0xf75   :  { %v5227_v17 = vadd.f32 %v5219_v39, %v8209_v37  ;;  %v5222_v32 = vmul.f32 0.35355338, %v5136_v58  ;;  %v7320_v28 = vpop.f32.mrb[31].mxu1  ;;  %v5244_v25 = vsel %vm1459_vm8, %v5228_v44, -inf }
 0xf76   :  { %v5060_v9 = vpop.f32.mrb[32].mxu0 }
 0xf77   :  { %v5221_v15 = vmul.f32 0.35355338, %v5060_v9  ;;  %v7315_v56 = vpop.f32.mrb[33].mxu0  ;;  %v5241_v33 = vsel %vm1459_vm8, %v5227_v17, -inf  ;;  %v5230_v42 = vadd.f32 %v5222_v32, %v8227_v0 }
 0xf78   :  { %5242 = vmax.xlane.f32.xlu0 %v5241_v33  ;;  %5245 = vmax.xlane.f32.xlu1 %v5244_v25 }
 0xf79   :  { %v5229_v45 = vadd.f32 %v5221_v15, %v8214_v41  ;;  %v5250_v12 = vsel %vm1459_vm8, %v5230_v42, -inf  ;;  %v4319_v41 = vpop.permute.xlu1 %4318 }
 0xf7a   :  { %v5212_v54 = vpop.f32.mrb[34].mxu0 }
 0xf7b   :  { %v5223_v19 = vmul.f32 0.35355338, %v5212_v54  ;;  %v7325_v37 = vpop.f32.mrb[35].mxu0  ;;  %v5247_v7 = vsel %vm1459_vm8, %v5229_v45, -inf }
 0xf7c   :  { %5248 = vmax.xlane.f32.xlu0 %v5247_v7  ;;  %5251 = vmax.xlane.f32.xlu1 %v5250_v12 }
 0xf7d   :  { %v8732_v60 = vadd.f32 %v5223_v19, %v8224_v62 }
 0xf7f   :  { %v5253_v14 = vsel %vm1459_vm8, %v8732_v60, -inf }
 0xf80   :  { %5254 = vmax.xlane.f32.xlu0 %v5253_v14 }
 0xf8d   :  { %4330 = vrot.lane.b32.xlu1 %v8567_v24, %s7787_s12 }
 0xf96   :  { %4324 = vrot.lane.b32.xlu0 %v8567_v24, %s7785_s3 }
 0xffd   :  { %v5234_v0 = vpop.xlane.xlu0 %5233 }
 0xffe   :  { %v5256_v36 = vsub.f32 %v5224_v26, %v5234_v0 }
0x1000   :  { %v5264_v18 = vmul.f32 1.442695, %v5256_v36 }
0x1001   :  { %v5240_v6 = vpop.xlane.xlu0 %5239  ;;  %v5237_v31 = vpop.xlane.xlu1 %5236 }
0x1002   :  { %7635 = vpow2.f32 %v5264_v18  ;;  %v5258_v51 = vsub.f32 %v5226_v55, %v5240_v6  ;;  %v5257_v62 = vsub.f32 %v5225_v29, %v5237_v31 }
0x1004   :  { %v5268_v8 = vmul.f32 1.442695, %v5258_v51  ;;  %v5266_v63 = vmul.f32 1.442695, %v5257_v62 }
0x1005   :  { %v5243_v35 = vpop.xlane.xlu0 %5242  ;;  %v5246_v4 = vpop.xlane.xlu1 %5245 }
0x1006   :  { %7637 = vpow2.f32 %v5268_v8  ;;  %v5259_v52 = vsub.f32 %v5227_v17, %v5243_v35  ;;  %v5260_v38 = vsub.f32 %v5228_v44, %v5246_v4 }
0x1007   :  { %7639 = vpow2.f32 %v5266_v63 }
0x1008   :  { %v5270_v21 = vmul.f32 1.442695, %v5259_v52  ;;  %v5272_v53 = vmul.f32 1.442695, %v5260_v38 }
0x1009   :  { %v5249_v10 = vpop.xlane.xlu0 %5248  ;;  %v5252_v40 = vpop.xlane.xlu1 %5251 }
0x100a   :  { %7641 = vpow2.f32 %v5270_v21  ;;  %v5261_v26 = vsub.f32 %v5229_v45, %v5249_v10  ;;  %v5262_v59 = vsub.f32 %v5230_v42, %v5252_v40 }
0x100b   :  { %7643 = vpow2.f32 %v5272_v53 }
0x100c   :  { %v8740_v23 = vpop.eup %7635  ;;  %v5276_v55 = vmul.f32 1.442695, %v5262_v59  ;;  %v5274_v29 = vmul.f32 1.442695, %v5261_v26 }
0x100d   :  { %v8742_v46 = vpop.xlane.xlu0 %5254  ;;  %v5280_v48 = vsel %vm1459_vm8, %v8740_v23, 0.0  ;;  %v4331_v61 = vpop.permute.xlu1 %4330 }
0x100e   :  { %5281 = vadd.xlane.f32.xlu1 %v5280_v48  ;;  %v4352_v39 = vcombine.low %v4319_v41, %v4331_v61  ;;  %v4353_v47 = vcombine.high %v4319_v41, %v4331_v61  ;;  %7645 = vpow2.f32 %v5276_v55 }
0x100f   :  { %7647 = vpow2.f32 %v5274_v29 }
0x1010   :  { %v8746_v34 = vpop.eup %7637  ;;  %v4360_v58 = vrot.slane %v4352_v39, %v8047_v43  ;;  %v4367_v25 = vrot.slane %v4353_v47, %v8047_v43 }
0x1011   :  { %v8748_v13 = vpop.eup %7639  ;;  %v4325_v44 = vpop.permute.xlu0 %4324  ;;  %v5286_v17 = vsel %vm1459_vm8, %v8746_v34, 0.0 }
0x1012   :  { %v4336_v32 = vcombine.low %v8567_v24, %v4325_v44  ;;  %v4337_v28 = vcombine.high %v8567_v24, %v4325_v44  ;;  %5287 = vadd.xlane.f32.xlu1 %v5286_v17  ;;  %v5283_v9 = vsel %vm1459_vm8, %v8748_v13, 0.0  ;;  %v5263_v44 = vsub.f32 %v8732_v60, %v8742_v46 }
0x1013   :  { %5284 = vadd.xlane.f32.xlu0 %v5283_v9 }
0x1014   :  { %v8758_v15 = vpop.eup %7641  ;;  %v4344_v56 = vrot.slane %v4336_v32, %v8047_v43  ;;  %v4351_v33 = vrot.slane %v4337_v28, %v8047_v43 }
0x1015   :  { %v8762_v42 = vpop.eup %7643  ;;  %v5289_v45 = vsel %vm1459_vm8, %v8758_v15, 0.0 }
0x1016   :  { %v4368_v12 = vcombine.low %v4344_v56, %v4360_v58  ;;  %v4369_v24 = vcombine.high %v4344_v56, %v4360_v58  ;;  %v4384_v54 = vcombine.low %v4351_v33, %v4367_v25  ;;  %v4385_v19 = vcombine.high %v4351_v33, %v4367_v25 }
0x1017   :  { %5290 = vadd.xlane.f32.xlu0 %v5289_v45  ;;  %v5292_v37 = vsel %vm1459_vm8, %v8762_v42, 0.0  ;;  %v5278_v58 = vmul.f32 1.442695, %v5263_v44 }
0x1018   :  { %v4376_v7 = vrot.slane %v4368_v12, %v8050_v49  ;;  %v4383_v14 = vrot.slane %v4369_v24, %v8050_v49  ;;  %v4392_v41 = vrot.slane %v4384_v54, %v8050_v49  ;;  %v4399_v0 = vrot.slane %v4385_v19, %v8050_v49  ;;  %5293 = vadd.xlane.f32.xlu1 %v5292_v37  ;;  %v8772_v36 = vpop.eup %7645 }
0x1019   :  { %v8774_v62 = vpop.eup %7647  ;;  %v5298_v8 = vsel %vm1459_vm8, %v8772_v36, 0.0  ;;  %7649 = vpow2.f32 %v5278_v58 }
0x101a   :  { %v4472_v18 = vcombine.low %v4376_v7, %v4383_v14  ;;  %v6863_v6 = vcombine.high %v4376_v7, %v4383_v14  ;;  %v4488_v31 = vcombine.low %v4392_v41, %v4399_v0  ;;  %v6864_v51 = vcombine.high %v4392_v41, %v4399_v0 }
0x101b   :  { %5299 = vadd.xlane.f32.xlu0 %v5298_v8  ;;  %v5295_v40 = vsel %vm1459_vm8, %v8774_v62, 0.0 }
0x101c   :  { %v4479_v63 = vrot.slane %v4472_v18, %v8047_v43  ;;  %v4487_v35 = vrot.slane %v6863_v6, %v8047_v43  ;;  %v4495_v4 = vrot.slane %v4488_v31, %v8047_v43  ;;  %v4503_v52 = vrot.slane %v6864_v51, %v8047_v43 }
0x101e   :  { %v4504_v38 = vcombine.low %v4479_v63, %v4487_v35  ;;  %v4520_v21 = vcombine.low %v4495_v4, %v4503_v52  ;;  %v4505_v53 = vcombine.high %v4479_v63, %v4487_v35  ;;  %v4521_v10 = vcombine.high %v4495_v4, %v4503_v52 }
0x101f   :  { %5296 = vadd.xlane.f32.xlu0 %v5295_v40 }
0x1020   :  { %v4512_v26 = vrot.slane %v4504_v38, %v8050_v49  ;;  %v4528_v59 = vrot.slane %v4520_v21, %v8050_v49  ;;  %v4519_v55 = vrot.slane %v4505_v53, %v8050_v49  ;;  %v4535_v29 = vrot.slane %v4521_v10, %v8050_v49 }
0x1022   :  { %v4536_v48 = vcombine.low %v4512_v26, %v4528_v59  ;;  %v4537_v61 = vcombine.high %v4512_v26, %v4528_v59  ;;  %v4538_v39 = vcombine.low %v4519_v55, %v4535_v29  ;;  %v4539_v47 = vcombine.high %v4519_v55, %v4535_v29 }
0x1023   :  { %v8796_v17 = vpop.eup %7649 }
0x1024   :  { %7327 = vmatpush3.msra.mxu1 %v4536_v48  ;;  %7332 = vmatpush3.msra.mxu0 %v4537_v61  ;;  %v5301_v32 = vsel %vm1459_vm8, %v8796_v17, 0.0 }
0x1025   :  { %7336 = vmatprep.subr.mxu1 %v7784_v20  ;;  %7341 = vmatprep.subr.mxu0 %v7784_v20 }
0x1029   :  { %4326 = vrot.lane.b32.xlu1 %v8541_v5, %s7785_s3 }
0x1035   :  { %4320 = vrot.lane.b32.xlu0 %v8541_v5, %s7786_s28 }
0x104d   :  { %5302 = vadd.xlane.f32.xlu1 %v5301_v32 }
0x105e   :  { %4332 = vrot.lane.b32.xlu1 %v8541_v5, %s7787_s12 }
0x109b   :  { %v5282_v28 = vpop.xlane.xlu1 %5281 }
0x109c   :  { %7651 = vrcp.f32 %v5282_v28 }
0x109f   :  { %v5288_v25 = vpop.xlane.xlu1 %5287 }
0x10a0   :  { %v5285_v9 = vpop.xlane.xlu0 %5284  ;;  %7653 = vrcp.f32 %v5288_v25 }
0x10a1   :  { %7655 = vrcp.f32 %v5285_v9 }
0x10a4   :  { %v5291_v56 = vpop.xlane.xlu0 %5290 }
0x10a5   :  { %7657 = vrcp.f32 %v5291_v56 }
0x10a6   :  { %v7652_v60 = vpop.eup %7651 }
0x10a7   :  { %v5312_v46 = vmul.f32 %v7652_v60, %v8740_v23 }
0x10a9   :  { %7329 = vmatmul.mubr.msk.f32.vlgmr.msra.gmra.mrb[32].mxu1 %vm1459_vm8, %v5312_v46 }
0x10aa   :  { %v7654_v33 = vpop.eup %7653  ;;  %7337 = vmatpush3.msra.mxu1 %v4538_v39  ;;  %7338 = vmatprep.mubr.msk.f32.mxu1 %vm7788_vm7, %v7784_v20 }
0x10ab   :  { %v7656_v45 = vpop.eup %7655  ;;  %v5314_v12 = vmul.f32 %v7654_v33, %v8746_v34  ;;  %7346 = vmatprep.subr.mxu1 %v7784_v20  ;;  %v5294_v34 = vpop.xlane.xlu1 %5293 }
0x10ac   :  { %v5313_v24 = vmul.f32 %v7656_v45, %v8748_v13  ;;  %v5300_v13 = vpop.xlane.xlu0 %5299  ;;  %7659 = vrcp.f32 %v5294_v34 }
0x10ad   :  { %7339 = vmatmul.mubr.msk.f32.vlgmr.msra.gmra.mrb[34].mxu1 %vm1459_vm8, %v5314_v12 }
0x10ae   :  { %7334 = vmatmul.mubr.msk.f32.vlgmr.msra.gmra.mrb[36].mxu0 %vm1459_vm8, %v5313_v24  ;;  %7348 = vmatprep.mubr.msk.f32.mxu1 %vm7788_vm7, %v7784_v20 }
0x10af   :  { %v7658_v23 = vpop.eup %7657  ;;  %7342 = vmatpush3.msra.mxu0 %v4539_v47  ;;  %7343 = vmatprep.mubr.msk.f32.mxu0 %vm7788_vm7, %v7784_v20  ;;  %v4327_v19 = vpop.permute.xlu1 %4326 }
0x10b0   :  { %v5315_v54 = vmul.f32 %v7658_v23, %v8758_v15  ;;  %7351 = vmatprep.subr.mxu0 %v7784_v20  ;;  %v5297_v37 = vpop.xlane.xlu0 %5296  ;;  %v4404_v14 = vcombine.low %v8541_v5, %v4327_v19  ;;  %v4405_v41 = vcombine.high %v8541_v5, %v4327_v19 }
0x10b1   :  { %7661 = vrcp.f32 %v5297_v37 }
0x10b2   :  { %7344 = vmatmul.mubr.msk.f32.vlgmr.msra.gmra.mrb[38].mxu0 %vm1459_vm8, %v5315_v54  ;;  %v4412_v31 = vrot.slane %v4404_v14, %v8047_v43  ;;  %v4419_v51 = vrot.slane %v4405_v41, %v8047_v43  ;;  %7663 = vrcp.f32 %v5300_v13 }
0x10b3   :  { %7353 = vmatprep.mubr.msk.f32.mxu0 %vm7788_vm7, %v7784_v20 }
0x10b4   :  { %v4321_v0 = vpop.permute.xlu0 %4320 }
0x10b6   :  { %v7660_v47 = vpop.eup %7659 }
0x10b7   :  { %v5316_v23 = vmul.f32 %v7660_v47, %v8762_v42 }
0x10bb   :  { %v7662_v25 = vpop.eup %7661 }
0x10bc   :  { %v7664_v60 = vpop.eup %7663  ;;  %v5317_v54 = vmul.f32 %v7662_v25, %v8774_v62 }
0x10bd   :  { %v5318_v19 = vmul.f32 %v7664_v60, %v8772_v36 }
0x10da   :  { %v5303_v7 = vpop.xlane.xlu1 %5302 }
0x10db   :  { %7665 = vrcp.f32 %v5303_v7 }
0x10de   :  { %v4333_v18 = vpop.permute.xlu1 %4332 }
0x10df   :  { %v4420_v6 = vcombine.low %v4321_v0, %v4333_v18  ;;  %v4421_v15 = vcombine.high %v4321_v0, %v4333_v18 }
0x10e1   :  { %v4428_v8 = vrot.slane %v4420_v6, %v8047_v43  ;;  %v4435_v63 = vrot.slane %v4421_v15, %v8047_v43 }
0x10e3   :  { %v4436_v35 = vcombine.low %v4412_v31, %v4428_v8  ;;  %v4437_v4 = vcombine.high %v4412_v31, %v4428_v8  ;;  %v4452_v52 = vcombine.low %v4419_v51, %v4435_v63  ;;  %v4453_v38 = vcombine.high %v4419_v51, %v4435_v63 }
0x10e5   :  { %v4444_v5 = vrot.slane %v4436_v35, %v8050_v49  ;;  %v4451_v21 = vrot.slane %v4437_v4, %v8050_v49  ;;  %v4460_v53 = vrot.slane %v4452_v52, %v8050_v49  ;;  %v4467_v10 = vrot.slane %v4453_v38, %v8050_v49  ;;  %v7666_v24 = vpop.eup %7665 }
0x10e6   :  { %v5319_v37 = vmul.f32 %v7666_v24, %v8796_v17 }
0x10e7   :  { %v4540_v40 = vcombine.low %v4444_v5, %v4451_v21  ;;  %v6865_v26 = vcombine.high %v4444_v5, %v4451_v21  ;;  %v4556_v59 = vcombine.low %v4460_v53, %v4467_v10  ;;  %v6866_v55 = vcombine.high %v4460_v53, %v4467_v10 }
0x10e9   :  { %v4547_v29 = vrot.slane %v4540_v40, %v8047_v43  ;;  %v4555_v48 = vrot.slane %v6865_v26, %v8047_v43  ;;  %v4563_v61 = vrot.slane %v4556_v59, %v8047_v43  ;;  %v4571_v39 = vrot.slane %v6866_v55, %v8047_v43 }
0x10eb   :  { %v4572_v44 = vcombine.low %v4547_v29, %v4555_v48  ;;  %v4588_v58 = vcombine.low %v4563_v61, %v4571_v39  ;;  %v4573_v32 = vcombine.high %v4547_v29, %v4555_v48  ;;  %v4589_v28 = vcombine.high %v4563_v61, %v4571_v39 }
0x10ed   :  { %v4580_v9 = vrot.slane %v4572_v44, %v8050_v49  ;;  %v4596_v56 = vrot.slane %v4588_v58, %v8050_v49  ;;  %v4587_v46 = vrot.slane %v4573_v32, %v8050_v49  ;;  %v4603_v33 = vrot.slane %v4589_v28, %v8050_v49 }
0x10ef   :  { %v4604_v45 = vcombine.low %v4580_v9, %v4596_v56  ;;  %v4605_v12 = vcombine.high %v4580_v9, %v4596_v56  ;;  %v4606_v34 = vcombine.low %v4587_v46, %v4603_v33  ;;  %v4607_v13 = vcombine.high %v4587_v46, %v4603_v33 }
0x10f1   :  { %7347 = vmatpush3.msra.mxu1 %v4604_v45  ;;  %7352 = vmatpush3.msra.mxu0 %v4605_v12 }
0x10f2   :  { %7349 = vmatmul.mubr.msk.f32.vlgmr.msra.gmra.mrb[36].mxu1 %vm1459_vm8, %v5316_v23  ;;  %7354 = vmatmul.mubr.msk.f32.vlgmr.msra.gmra.mrb[40].mxu0 %vm1459_vm8, %v5317_v54 }
0x10f3   :  { %7356 = vmatprep.subr.mxu1 %v7784_v20  ;;  %7361 = vmatprep.subr.mxu0 %v7784_v20 }
0x10f4   :  { %7357 = vmatpush3.msra.mxu1 %v4606_v34  ;;  %7362 = vmatpush3.msra.mxu0 %v4607_v13 }
0x10f5   :  { %7358 = vmatprep.mubr.msk.f32.mxu1 %vm7788_vm7, %v7784_v20  ;;  %7363 = vmatprep.mubr.msk.f32.mxu0 %vm7788_vm7, %v7784_v20 }
0x10f6   :  { %7359 = vmatmul.mubr.msk.f32.vlgmr.msra.gmra.mrb[38].mxu1 %vm1459_vm8, %v5318_v19  ;;  %7364 = vmatmul.mubr.msk.f32.vlgmr.msra.gmra.mrb[42].mxu0 %vm1459_vm8, %v5319_v37 }
0x117c   :  { %v5389_v42 = vpop.f32.mrb[32].mxu1 }
0x117d   :  { %v7330_v62 = vpop.f32.mrb[33].mxu1 }
0x1180   :  { %v5535_v7 = vpop.f32.mrb[34].mxu1 }
0x1181   :  { %v5462_v14 = vpop.f32.mrb[36].mxu0  ;;  %v5904_v41 = vcombine.low %v5389_v42, %v5535_v7  ;;  %v5905_v36 = vcombine.high %v5389_v42, %v5535_v7  ;;  %v7340_v0 = vpop.f32.mrb[35].mxu1 }
0x1182   :  { %v7335_v17 = vpop.f32.mrb[37].mxu0 }
0x1183   :  { %v5912_v51 = vrot.slane %v5904_v41, %v8047_v43  ;;  %v5919_v8 = vrot.slane %v5905_v36, %v8047_v43 }
0x1185   :  { %v5608_v18 = vpop.f32.mrb[38].mxu0 }
0x1186   :  { %v5920_v6 = vcombine.low %v5462_v14, %v5608_v18  ;;  %v5921_v15 = vcombine.high %v5462_v14, %v5608_v18  ;;  %v7345_v31 = vpop.f32.mrb[39].mxu0 }
0x1188   :  { %v5928_v63 = vrot.slane %v5920_v6, %v8047_v43  ;;  %v5935_v35 = vrot.slane %v5921_v15, %v8047_v43 }
0x118a   :  { %v5936_v4 = vcombine.low %v5912_v51, %v5928_v63  ;;  %v5937_v52 = vcombine.high %v5912_v51, %v5928_v63  ;;  %v5952_v38 = vcombine.low %v5919_v8, %v5935_v35  ;;  %v5953_v5 = vcombine.high %v5919_v8, %v5935_v35  ;;  %v6845_v8 = vld [vmem:[%s9022_s2 + $0xe0] sm:$0xff]  ;;  %v6846_v63 = vld [vmem:[%s9022_s2 + $0xe8] sm:$0xff] }
0x118c   :  { %v5944_v21 = vrot.slane %v5936_v4, %v8050_v49  ;;  %v5951_v53 = vrot.slane %v5937_v52, %v8050_v49  ;;  %v5960_v10 = vrot.slane %v5952_v38, %v8050_v49  ;;  %v5967_v40 = vrot.slane %v5953_v5, %v8050_v49 }
0x118d   :  { %v7525_v5 = vpack.c.bf16 %v6846_v63, %v6845_v8 }
0x118e   :  { %v6040_v26 = vcombine.low %v5944_v21, %v5951_v53  ;;  %v6891_v59 = vcombine.high %v5944_v21, %v5951_v53  ;;  %v6056_v55 = vcombine.low %v5960_v10, %v5967_v40  ;;  %v6892_v29 = vcombine.high %v5960_v10, %v5967_v40 }
0x118f   :  { %7526 = vmatprep.subr.bf16.mxu1 %v7525_v5 }
0x1190   :  { %v6047_v48 = vrot.slane %v6040_v26, %v8047_v43  ;;  %v6055_v61 = vrot.slane %v6891_v59, %v8047_v43  ;;  %v6063_v39 = vrot.slane %v6056_v55, %v8047_v43  ;;  %v6071_v47 = vrot.slane %v6892_v29, %v8047_v43  ;;  %v6847_v26 = vld [vmem:[%s9022_s2 + $0xf0] sm:$0xff]  ;;  %v6848_v59 = vld [vmem:[%s9022_s2 + $0xf8] sm:$0xff]  ;;  %7528 = vmatpush3.bf16.msra.mxu1 %v7525_v5 }
0x1192   :  { %v6072_v44 = vcombine.low %v6047_v48, %v6055_v61  ;;  %v6088_v58 = vcombine.low %v6063_v39, %v6071_v47  ;;  %v6073_v32 = vcombine.high %v6047_v48, %v6055_v61  ;;  %v6089_v28 = vcombine.high %v6063_v39, %v6071_v47 }
0x1193   :  { %v7529_v39 = vpack.c.bf16 %v6848_v59, %v6847_v26 }
0x1194   :  { %v8865_v25 = vrot.slane %v6072_v44, %v8050_v49  ;;  %v8868_v9 = vrot.slane %v6088_v58, %v8050_v49  ;;  %v6087_v56 = vrot.slane %v6073_v32, %v8050_v49  ;;  %v6103_v60 = vrot.slane %v6089_v28, %v8050_v49 }
0x1195   :  { %7530 = vmatprep.subr.bf16.mxu1 %v7529_v39 }
0x1196   :  { %v6105_v46 = vcombine.high %v8865_v25, %v8868_v9  ;;  %v6104_v33 = vcombine.low %v8865_v25, %v8868_v9  ;;  %v6106_v45 = vcombine.low %v6087_v56, %v6103_v60  ;;  %v6107_v12 = vcombine.high %v6087_v56, %v6103_v60  ;;  %7532 = vmatpush3.bf16.msra.mxu1 %v7529_v39  ;;  %v7682_v25 = vld [vmem:[#allocation7 + $0x8] sm:$0xff] }
0x1197   :  { %v6209_v9 = vrot.slane %v7682_v25, %v3215_v57 }
0x1198   :  { %6178 = vrot.lane.b32.xlu0 %v6105_v46, %s7782_s14 }
0x119c   :  { %6186 = vrot.lane.b32.xlu0 %v6106_v45, %s7778_s23 }
0x11a0   :  { %6194 = vrot.lane.b32.xlu0 %v6107_v12, %s7792_s13 }
0x11c5   :  { %v5681_v24 = vpop.f32.mrb[36].mxu1  ;;  %v5754_v23 = vpop.f32.mrb[40].mxu0 }
0x11c6   :  { %v7350_v54 = vpop.f32.mrb[37].mxu1  ;;  %v7355_v34 = vpop.f32.mrb[41].mxu0 }
0x11c9   :  { %v5827_v13 = vpop.f32.mrb[38].mxu1  ;;  %v5900_v19 = vpop.f32.mrb[42].mxu0 }
0x11ca   :  { %v5972_v37 = vcombine.low %v5681_v24, %v5827_v13  ;;  %v5973_v42 = vcombine.high %v5681_v24, %v5827_v13  ;;  %v5988_v62 = vcombine.low %v5754_v23, %v5900_v19  ;;  %v5989_v7 = vcombine.high %v5754_v23, %v5900_v19  ;;  %v7360_v14 = vpop.f32.mrb[39].mxu1  ;;  %v7365_v41 = vpop.f32.mrb[43].mxu0 }
0x11cc   :  { %v5980_v36 = vrot.slane %v5972_v37, %v8047_v43  ;;  %v5987_v0 = vrot.slane %v5973_v42, %v8047_v43  ;;  %v5996_v17 = vrot.slane %v5988_v62, %v8047_v43  ;;  %v6003_v18 = vrot.slane %v5989_v7, %v8047_v43 }
0x11ce   :  { %v6004_v6 = vcombine.low %v5980_v36, %v5996_v17  ;;  %v6005_v15 = vcombine.high %v5980_v36, %v5996_v17  ;;  %v6020_v31 = vcombine.low %v5987_v0, %v6003_v18  ;;  %v6021_v51 = vcombine.high %v5987_v0, %v6003_v18 }
0x11d0   :  { %v6012_v35 = vrot.slane %v6004_v6, %v8050_v49  ;;  %v6019_v4 = vrot.slane %v6005_v15, %v8050_v49  ;;  %v6028_v52 = vrot.slane %v6020_v31, %v8050_v49  ;;  %v6035_v38 = vrot.slane %v6021_v51, %v8050_v49 }
0x11d2   :  { %v6108_v21 = vcombine.low %v6012_v35, %v6019_v4  ;;  %v6893_v53 = vcombine.high %v6012_v35, %v6019_v4  ;;  %v6124_v10 = vcombine.low %v6028_v52, %v6035_v38  ;;  %v6894_v40 = vcombine.high %v6028_v52, %v6035_v38 }
0x11d4   :  { %v6115_v55 = vrot.slane %v6108_v21, %v8047_v43  ;;  %v6123_v29 = vrot.slane %v6893_v53, %v8047_v43  ;;  %v6131_v48 = vrot.slane %v6124_v10, %v8047_v43  ;;  %v6139_v61 = vrot.slane %v6894_v40, %v8047_v43  ;;  %v6333_v21 = vld [vmem:[#allocation2 + $0x28] sm:$0xff]  ;;  %v6334_v53 = vld [vmem:[#allocation2 + $0x30] sm:$0xff]  ;;  %v6335_v40 = vld [vmem:[#allocation2 + $0x38] sm:$0xff] }
0x11d5   :  { %v7537_v26 = vpack.c.bf16 %v6335_v40, %v6334_v53 }
0x11d6   :  { %v6140_v47 = vcombine.low %v6115_v55, %v6123_v29  ;;  %v6156_v44 = vcombine.low %v6131_v48, %v6139_v61  ;;  %v6141_v58 = vcombine.high %v6115_v55, %v6123_v29  ;;  %v6157_v32 = vcombine.high %v6131_v48, %v6139_v61 }
0x11d8   :  { %v6148_v28 = vrot.slane %v6140_v47, %v8050_v49  ;;  %v6164_v56 = vrot.slane %v6156_v44, %v8050_v49  ;;  %v6155_v60 = vrot.slane %v6141_v58, %v8050_v49  ;;  %v6171_v46 = vrot.slane %v6157_v32, %v8050_v49  ;;  %v8929_v47 = vld [vmem:[#allocation7 + $0x10] sm:$0x1f] }
0x11d9   :  { %v6322_v44 = vrot.slane %v7682_v25, %v3221_v50 }
0x11da   :  { %v6173_v45 = vcombine.high %v6148_v28, %v6164_v56  ;;  %v6172_v12 = vcombine.low %v6148_v28, %v6164_v56  ;;  %v6174_v24 = vcombine.low %v6155_v60, %v6171_v46  ;;  %v6175_v43 = vcombine.high %v6155_v60, %v6171_v46 }
0x11db   :  { %v6328_v28 = vrot.slane %v8929_v47, %v7893_v2  ;;  %v6901_v2 = vld [vmem:[%s9024_s4 + $0x48] sm:$0xff] }
0x11dc   :  { %6180 = vrot.lane.b32.xlu1 %v6173_v45, %s7782_s14  ;;  %v7541_v50 = vpack.c.bf16 %v6901_v2, %v6900_v1  ;;  %v6580_v1 = vld [vmem:[%s9027_s7 + $0x18] sm:$0xff] }
0x11de   :  { %7542 = vmatprep.subr.bf16.mxu1 %v7541_v50 }
0x11e0   :  { %6188 = vrot.lane.b32.xlu1 %v6174_v24, %s7778_s23 }
0x11e4   :  { %6196 = vrot.lane.b32.xlu1 %v6175_v43, %s7792_s13  ;;  %v6902_v43 = vld [vmem:[%s9024_s4 + $0x50] sm:$0xff] }
0x120a   :  { %v6179_v23 = vpop.permute.xlu0 %6178 }
0x120b   :  { %v6200_v34 = vsel %vm1459_vm8, %v6104_v33, %v6179_v23  ;;  %v6903_v23 = vld [vmem:[%s9024_s4 + $0x58] sm:$0xff] }
0x120e   :  { %v6187_v54 = vpop.permute.xlu0 %6186 }
0x120f   :  { %v6202_v49 = vsel %vm3094_vm10, %v6200_v34, %v6187_v54  ;;  %v7545_v54 = vpack.c.bf16 %v6903_v23, %v6902_v43  ;;  %v6904_v34 = vld [vmem:[%s9024_s4 + $0x60] sm:$0xff] }
0x1212   :  { %v6195_v13 = vpop.permute.xlu0 %6194 }
0x1213   :  { %v6204_v19 = vsel %vm3097_vm11, %v6202_v49, %v6195_v13  ;;  %v6905_v49 = vld [vmem:[%s9024_s4 + $0x68] sm:$0xff] }
0x1214   :  { %7374 = vmatprep.mubr.msk.f32.mxu1 %vm281_vm6, %v6204_v19  ;;  %v7549_v13 = vpack.c.bf16 %v6905_v49, %v6904_v34  ;;  %v6906_v19 = vld [vmem:[%s9024_s4 + $0x70] sm:$0xff] }
0x124e   :  { %v6181_v37 = vpop.permute.xlu1 %6180 }
0x124f   :  { %v6201_v62 = vsel %vm1459_vm8, %v6172_v12, %v6181_v37  ;;  %v6907_v37 = vld [vmem:[%s9024_s4 + $0x78] sm:$0xff] }
0x1252   :  { %v6189_v42 = vpop.permute.xlu1 %6188 }
0x1253   :  { %v6203_v7 = vsel %vm3094_vm10, %v6201_v62, %v6189_v42  ;;  %v7553_v42 = vpack.c.bf16 %v6907_v37, %v6906_v19  ;;  %v6897_v62 = vld [vmem:[#allocation5 + $0x1] ss:$0 sm:$0xff] }
0x1256   :  { %v6197_v14 = vpop.permute.xlu1 %6196 }
0x1257   :  { %v6205_v41 = vsel %vm3097_vm11, %v6203_v7, %v6197_v14 }
0x1258   :  { %7375 = vmatmul.mubr.msk.f32.vlgmr.msra.gmra.mrb[40].mxu1 %vm281_vm6, %v6205_v41 }
0x1259   :  { %7544 = vmatpush3.bf16.msra.mxu1 %v7541_v50 }
0x125a   :  { %7546 = vmatprep.subr.bf16.mxu1 %v7545_v54 }
0x125d   :  { %7548 = vmatpush3.bf16.msra.mxu1 %v7545_v54 }
0x125e   :  { %7550 = vmatprep.subr.bf16.mxu1 %v7549_v13 }
0x1261   :  { %7552 = vmatpush3.bf16.msra.mxu1 %v7549_v13  ;;  %v6568_v13 = vrot.slane %v8929_v47, %v7998_v16  ;;  %v6663_v16 = vld [vmem:[%s9028_s8] sm:$0xff] }
0x1262   :  { %7554 = vmatprep.subr.bf16.mxu1 %v7553_v42 }
0x1265   :  { %7556 = vmatpush3.bf16.msra.mxu1 %v7553_v42  ;;  %v6574_v42 = vrot.slane %v8929_v47, %v8002_v22  ;;  %v6664_v22 = vld [vmem:[%s9028_s8 + $0x8] sm:$0xff] }
0x132b   :  { %v7376_v33 = vpop.f32.mrb[40].mxu1 }
0x132c   :  { %v6288_v36 = vadd.f32 %v7376_v33, %v6209_v9  ;;  %v6282_v0 = vpop.f32.mrb[41].mxu1 }
0x132d   :  { %v6283_v17 = vadd.f32 %v6282_v0, %v6209_v9 }
0x132e   :  { %v6292_v18 = vadd.f32 %v6288_v36, %v8517_v30 }
0x132f   :  { %v6291_v6 = vadd.f32 %v6283_v17, %v8515_v11  ;;  %v6332_v11 = vld [vmem:[#allocation2 + $0x20] sm:$0xff] }
0x1330   :  { %v6296_v15 = vsel %vm281_vm6, %v6292_v18, 0.0  ;;  %v7533_v10 = vpack.c.bf16 %v6333_v21, %v6332_v11 }
0x1331   :  { %6297 = vadd.xlane.f32.xlu1 %v6296_v15  ;;  %v6293_v31 = vsel %vm281_vm6, %v6291_v6, 0.0 }
0x1332   :  { %6294 = vadd.xlane.f32.xlu0 %v6293_v31  ;;  %7534 = vmatprep.subr.bf16.mxu0 %v7533_v10 }
0x1333   :  { %7536 = vmatpush3.bf16.msra.mxu0 %v7533_v10 }
0x1334   :  { %7538 = vmatprep.subr.bf16.mxu0 %v7537_v26 }
0x1337   :  { %7540 = vmatpush3.bf16.msra.mxu0 %v7537_v26 }
0x13be   :  { %v6298_v51 = vpop.xlane.xlu1 %6297 }
0x13bf   :  { %v6300_v8 = vmul.f32 0.03125, %v6298_v51  ;;  %v6295_v63 = vpop.xlane.xlu0 %6294 }
0x13c0   :  { %v6299_v35 = vmul.f32 0.03125, %v6295_v63 }
0x13c1   :  { %v6302_v4 = vsub.f32 %v6292_v18, %v6300_v8 }
0x13c2   :  { %v6301_v57 = vsub.f32 %v6291_v6, %v6299_v35 }
0x13c3   :  { %v6304_v5 = vmul.f32 %v6302_v4, %v6302_v4 }
0x13c4   :  { %v6303_v52 = vmul.f32 %v6301_v57, %v6301_v57 }
0x13c5   :  { %v6308_v30 = vsel %vm281_vm6, %v6304_v5, 0.0 }
0x13c6   :  { %v6305_v38 = vsel %vm281_vm6, %v6303_v52, 0.0 }
0x13c7   :  { %6306 = vadd.xlane.f32.xlu0 %v6305_v38 }
0x13cb   :  { %6309 = vadd.xlane.f32.xlu0 %v6308_v30  ;;  %v6455_v30 = vrot.slane %v8929_v47, %v7896_v3 }
0x1454   :  { %v6307_v59 = vpop.xlane.xlu0 %6306 }
0x1455   :  { %v6311_v55 = vmul.f32 0.03125, %v6307_v59 }
0x1457   :  { %v6313_v29 = vadd.f32 1e-05, %v6311_v55 }
0x1458   :  { %v6310_v48 = vpop.xlane.xlu0 %6309 }
0x1459   :  { %7667 = vrsqrt.f32 %v6313_v29  ;;  %v6312_v61 = vmul.f32 0.03125, %v6310_v48 }
0x145b   :  { %v6314_v39 = vadd.f32 1e-05, %v6312_v61 }
0x145d   :  { %7669 = vrsqrt.f32 %v6314_v39 }
0x1463   :  { %v7668_v58 = vpop.eup %7667 }
0x1464   :  { %v6317_v32 = vmul.f32 %v7668_v58, %v6301_v57 }
0x1466   :  { %v6323_v56 = vmul.f32 %v6322_v44, %v6317_v32 }
0x1467   :  { %v7670_v60 = vpop.eup %7669 }
0x1468   :  { %v6318_v46 = vmul.f32 %v7670_v60, %v6302_v4  ;;  %v6329_v45 = vadd.f32 %v6328_v28, %v6323_v56  ;;  %v6577_v60 = vld [vmem:[%s9027_s7] sm:$0xff] }
0x146a   :  { %v6324_v12 = vmul.f32 %v6322_v44, %v6318_v46  ;;  %7385 = vmatprep.mubr.msk.f32.mxu0 %vm281_vm6, %v6329_v45  ;;  %v6578_v46 = vld [vmem:[%s9027_s7 + $0x8] sm:$0xff] }
0x146c   :  { %v6330_v24 = vadd.f32 %v6328_v28, %v6324_v12  ;;  %v7793_v12 = vmov 0.0|0.0  }
0x146d   :  { %7557 = vmatprep.subr.bf16.mxu0 %v7793_v12 }
0x146e   :  { %7386 = vmatmul.mubr.msk.f32.vlgmr.msra.gmra.mrb[44].mxu0 %vm281_vm6, %v6330_v24 }
0x146f   :  { %7415 = vmatprep.mubr.msk.f32.mxu0 %vm7788_vm7, %v7784_v20 }
0x1541   :  { %v7387_v7 = vpop.f32.mrb[44].mxu0 }
0x1542   :  { %v6422_v14 = vadd.f32 %v7387_v7, %v6897_v62  ;;  %v6416_v41 = vpop.f32.mrb[45].mxu0 }
0x1543   :  { %v6417_v25 = vadd.f32 %v6897_v62, %v6416_v41 }
0x1544   :  { %v6426_v9 = vmul.f32 %v6422_v14, %v6422_v14 }
0x1545   :  { %v6425_v33 = vmul.f32 %v6417_v25, %v6417_v25 }
0x1546   :  { %v6428_v36 = vmul.f32 %v6426_v9, %v6422_v14 }
0x1547   :  { %v6427_v0 = vmul.f32 %v6425_v33, %v6417_v25 }
0x1548   :  { %v6430_v17 = vmul.f32 0.044715, %v6428_v36 }
0x1549   :  { %v6429_v18 = vmul.f32 0.044715, %v6427_v0  ;;  %v6665_v0 = vld [vmem:[%s9028_s8 + $0x10] sm:$0xff] }
0x154a   :  { %v6432_v6 = vadd.f32 %v6430_v17, %v6422_v14  ;;  %v7564_v17 = vpack.c.bf16 %v6664_v22, %v6663_v16 }
0x154b   :  { %v6431_v15 = vadd.f32 %v6429_v18, %v6417_v25  ;;  %v6666_v18 = vld [vmem:[%s9028_s8 + $0x18] sm:$0xff]  ;;  %s6754_s8 = sshll.u32 %s7794_s11, 4  ;;  %s6755_s8 = int_to_ptr.vmem [resolvable:$true] %s6754_s8 }
0x154c   :  { %v6434_v31 = vmul.f32 0.7978846, %v6432_v6  ;;  %v7567_v6 = vpack.c.bf16 %v6666_v18, %v6665_v0  ;;  %s7749_s1 = scalar_lea.vmem %s6755_s8, 32  ;;  %p7754_p11 = scmp.lt.s32.totalorder %s6755_s8, %s6755_s8 }
0x154d   :  { %v6433_v51 = vmul.f32 0.7978846, %v6431_v15  ;;  %p7750_p10 = scmp.ne.s32.totalorder %s6755_s8, %s7749_s1  ;;  %p7755_p12 = scmp.lt.s32.totalorder %s7749_s1, %s7749_s1 }
0x154e   :  { %7671 = vtanh.f32 %v6434_v31 }
0x154f   :  { %7673 = vtanh.f32 %v6433_v51  ;;  %p7756_p13 = por %p7755_p12, %p7754_p11 }
0x1551   :  { %p7757_p0 = pnand %p7756_p13, %p7750_p10 }
0x1558   :  { %v7672_v8 = vpop.eup %7671 }
0x1559   :  { %v7674_v63 = vpop.eup %7673  ;;  %v6438_v35 = vadd.f32 1.0, %v7672_v8 }
0x155a   :  { %v6437_v4 = vadd.f32 1.0, %v7674_v63  ;;  %v6911_v63 = vld [vmem:[%s9029_s9] ss:$0 sm:$0xff] }
0x155b   :  { %v6440_v57 = vmul.f32 0.5, %v6438_v35 }
0x155c   :  { %v6439_v52 = vmul.f32 0.5, %v6437_v4 }
0x155d   :  { %v6442_v5 = vmul.f32 %v6440_v57, %v6422_v14 }
0x155e   :  { %v6441_v38 = vmul.f32 %v6439_v52, %v6417_v25 }
0x1560   :  { %7404 = vmatprep.mubr.msk.f32.mxu1 %vm3347_vm12, %v6441_v38 }
0x1561   :  { %7405 = vmatmul.mubr.msk.f32.vlgmr.msra.gmra.mrb[42].mxu1 %vm3347_vm12, %v6442_v5 }
0x1634   :  { %v7406_v11 = vpop.f32.mrb[42].mxu1 }
0x1635   :  { %v6534_v21 = vadd.f32 %v7406_v11, %v6455_v30  ;;  %v6528_v53 = vpop.f32.mrb[43].mxu1 }
0x1636   :  { %v6529_v10 = vadd.f32 %v6528_v53, %v6455_v30 }
0x1637   :  { %v6538_v40 = vadd.f32 %v6534_v21, %v6330_v24  ;;  %v7558_v24 = vpack.c.bf16 %v6578_v46, %v6577_v60 }
0x1638   :  { %v6537_v26 = vadd.f32 %v6529_v10, %v6329_v45  ;;  %v6579_v45 = vld [vmem:[%s9027_s7 + $0x10] sm:$0xff] }
0x1639   :  { %v6542_v59 = vsel %vm281_vm6, %v6538_v40, 0.0  ;;  %7559 = vmatpush3.bf16.msra.mxu0 %v7558_v24  ;;  %v7561_v2 = vpack.c.bf16 %v6580_v1, %v6579_v45 }
0x163a   :  { %6543 = vadd.xlane.f32.xlu1 %v6542_v59  ;;  %v6539_v55 = vsel %vm281_vm6, %v6537_v26, 0.0  ;;  %7560 = vmatprep.subr.bf16.mxu0 %v7793_v12 }
0x163b   :  { %6540 = vadd.xlane.f32.xlu0 %v6539_v55 }
0x163d   :  { %7562 = vmatpush3.bf16.msra.mxu0 %v7561_v2 }
0x163e   :  { %7563 = vmatprep.subr.bf16.mxu0 %v7793_v12 }
0x16c7   :  { %v6544_v29 = vpop.xlane.xlu1 %6543 }
0x16c8   :  { %v6546_v48 = vmul.f32 0.03125, %v6544_v29  ;;  %v6541_v61 = vpop.xlane.xlu0 %6540 }
0x16c9   :  { %v6545_v39 = vmul.f32 0.03125, %v6541_v61 }
0x16ca   :  { %v6548_v44 = vsub.f32 %v6538_v40, %v6546_v48 }
0x16cb   :  { %v6547_v58 = vsub.f32 %v6537_v26, %v6545_v39 }
0x16cc   :  { %v6550_v32 = vmul.f32 %v6548_v44, %v6548_v44 }
0x16cd   :  { %v6549_v3 = vmul.f32 %v6547_v58, %v6547_v58 }
0x16ce   :  { %v6554_v28 = vsel %vm281_vm6, %v6550_v32, 0.0 }
0x16cf   :  { %6555 = vadd.xlane.f32.xlu1 %v6554_v28  ;;  %v6551_v56 = vsel %vm281_vm6, %v6549_v3, 0.0 }
0x16d0   :  { %6552 = vadd.xlane.f32.xlu0 %v6551_v56 }
0x175c   :  { %v6556_v50 = vpop.xlane.xlu1 %6555 }
0x175d   :  { %v6558_v43 = vmul.f32 0.03125, %v6556_v50  ;;  %v6553_v23 = vpop.xlane.xlu0 %6552 }
0x175e   :  { %v6557_v54 = vmul.f32 0.03125, %v6553_v23 }
0x175f   :  { %v6560_v34 = vadd.f32 1e-05, %v6558_v43 }
0x1760   :  { %v6559_v49 = vadd.f32 1e-05, %v6557_v54 }
0x1761   :  { %7675 = vrsqrt.f32 %v6560_v34 }
0x1762   :  { %7677 = vrsqrt.f32 %v6559_v49 }
0x176b   :  { %v7676_v19 = vpop.eup %7675 }
0x176c   :  { %v7678_v37 = vpop.eup %7677  ;;  %v6564_v62 = vmul.f32 %v7676_v19, %v6548_v44 }
0x176d   :  { %v6563_v7 = vmul.f32 %v7678_v37, %v6547_v58 }
0x176e   :  { %v6570_v14 = vmul.f32 %v6568_v13, %v6564_v62 }
0x176f   :  { %v6569_v41 = vmul.f32 %v6568_v13, %v6563_v7 }
0x1770   :  { %v6576_v25 = vadd.f32 %v6574_v42, %v6570_v14 }
0x1771   :  { %v6575_v9 = vadd.f32 %v6574_v42, %v6569_v41 }
0x1772   :  { %v6587_v33 = vrot.slane %v6576_v25, 7 }
0x1774   :  { %v6589_v36 = vsel %vm6588_vm13, %v6587_v33, %v6575_v9 }
0x1775   :  { %7416 = vmatmul.mubr.msk.f32.vlgmr.msra.gmra.mrb[46].mxu0 %vm281_vm6, %v6589_v36 }
0x1776   :  { %7426 = vmatprep.mubr.msk.f32.mxu0 %vm7788_vm7, %v7784_v20  ;;  %7565 = vmatpush3.bf16.msra.mxu0 %v7564_v17  ;;  %v6584_v20 = vrot.slane %v8929_v47, %v8013_v27 }
0x1777   :  { %7566 = vmatprep.subr.bf16.mxu0 %v7793_v12 }
0x177a   :  { %7568 = vmatpush3.bf16.msra.mxu0 %v7567_v6 }
0x1848   :  { %v6658_v15 = vpop.f32.mrb[46].mxu0 }
0x1849   :  { %v6659_v31 = vadd.f32 %v6658_v15, %v6584_v20  ;;  %v7417_v51 = vpop.f32.mrb[47].mxu0 }
0x184b   :  { %7679 = vtanh.f32 %v6659_v31 }
0x1855   :  { %v7680_v8 = vpop.eup %7679 }
0x1856   :  { %7427 = vmatmul.mubr.msk.f32.vlgmr.msra.gmra.mrb[48].mxu0 %vm281_vm6, %v7680_v8 }
0x1929   :  { %v6743_v35 = vpop.f32.mrb[48].mxu0 }
0x192a   :  { %v6744_v4 = vadd.f32 %v6911_v63, %v6743_v35  ;;  %v7428_v57 = vpop.f32.mrb[49].mxu0 }
0x192c   :  { %6747 = vst [vmem:[#allocation8] sm:$0x3] %v6744_v4 }
0x192d   :  { %7760 = shalt.err (!%p7757_p0)
}
0x192e   :  { %s7761_s16 = scalar_lea.hbm %s9030_s10, 32 }
0x192f   :  { %p7762_p1 = scmp.ne.s32.totalorder %s9030_s10, %s7761_s16  ;;  %p7765_p2 = scmp.lt.u32.totalorder %s7761_s16, %s9030_s10 }
0x1931   :  { %p7767_p3 = pnand %p7765_p2, %p7762_p1 }
0x1933   :  { %7770 = shalt.err (!%p7767_p3)
}
0x1934   :  { %6757 = dma.vmem_to_hbm [thread:$0]  %s6755_s8, 32, %s9030_s10, [#allocation4]  }
0x1935   :  { %7775 = dma.done.wait [#allocation4], 32  }
0x1936   :  { %7776 = vsyncadd [#allocation4], 4294967264 }
0x1937   :  { %6761 = vsyncpa [#allocation3], 1 }
0x1938   :  { %6762 = vsyncpa [#allocation6], 1 }
0x1939   :  { %6763 = vsyncpa [#allocation4], 1 }

</bundles_post_ra>
